<compile_context>
chip_gen: v5e
topology: v5e:2x2
jax: 0.10.0
libtpu: 0.0.40
codegen_flags: <defaults>
</compile_context>

<pallas_src>
import functools
import jax
import jax.numpy as jnp
from jax.experimental import pallas as pl
from jax.experimental.pallas import tpu as pltpu

EPS = 1e-8


# ----------------------------------------------------------------------------
# Pallas kernel
# ----------------------------------------------------------------------------
def dien_kernel(b_real,
                emb_ref, mask_ref, rowm_ref, nval_ref, q_ref,
                wih_ref, bx_ref, whh3_ref, bhn_ref,
                w1x_ref, w1pr_ref, w1q_ref, b1_ref, aatt_ref, w2_ref, b2_ref,
                expand_ref, fold_ref,
                wghx_ref, bgh_ref, wh2ur_ref, wch_ref,
                wm1h_ref, wm1q_ref, bm1_ref, am1_ref,
                wm2_ref, bm2_ref, am2_ref, wm3_ref, bm3_ref,
                out_ref,
                gru_scr):
    f32 = jnp.float32
    T, Bp, D = emb_ref.shape
    H = wch_ref.shape[0]
    A = w1x_ref.shape[1]

    # ---- hoisted: x-side GRU projection (one matmul), gate slabs split ONCE ----
    emb_flat = emb_ref[...].reshape(T * Bp, D)
    xproj = jnp.dot(emb_flat, wih_ref[...], preferred_element_type=f32) + bx_ref[...]
    xr_all = xproj[:, 0:H].reshape(T, Bp, H)
    xz_all = xproj[:, H:2 * H].reshape(T, Bp, H)
    xn_all = xproj[:, 2 * H:3 * H].reshape(T, Bp, H)

    whr = whh3_ref[0]                                           # [H, H] lane-0 aligned
    whz = whh3_ref[1]
    whn = whh3_ref[2]
    bhn = bhn_ref[...]                                          # [1, H]
    mask_all = mask_ref[...]                                    # [T, Bp, 1]

    # ---- pass 1: serial GRU, fully unrolled, lane-aligned gate matmuls ----
    h = jnp.zeros((Bp, H), f32)
    for t in range(T):
        m = mask_all[t]
        hp_r = jnp.dot(h, whr, preferred_element_type=f32)
        hp_z = jnp.dot(h, whz, preferred_element_type=f32)
        hp_n = jnp.dot(h, whn, preferred_element_type=f32)
        r = jax.nn.sigmoid(xr_all[t] + hp_r)
        z = jax.nn.sigmoid(xz_all[t] + hp_z)
        n = jnp.tanh(xn_all[t] + r * (hp_n + bhn))
        h_new = (1.0 - z) * n + z * h
        gru_scr[t] = h_new
        h = m * h_new + (1.0 - m) * h

    gru_all = gru_scr[...]                                      # [T, Bp, H]
    gru_flat = gru_all.reshape(T * Bp, H)
    q = q_ref[...]                                              # [Bp, D]

    # ---- hoisted: attention first layer, all contractions on the MXU ----
    q_term = jnp.dot(q, w1q_ref[...], preferred_element_type=f32) + b1_ref[...]  # [Bp,A]
    qw_all = jnp.dot(q, w1pr_ref[...], preferred_element_type=f32)               # [Bp,H*A]
    # bilinear (outer-product) term via MXU expand / fold: O(1) code in H
    gru_exp = jnp.dot(gru_flat, expand_ref[...], preferred_element_type=f32)     # [T*Bp,H*A]
    prod = (gru_exp.reshape(T, Bp, H * A) * qw_all[None]).reshape(T * Bp, H * A)
    pterm = jnp.dot(prod, fold_ref[...], preferred_element_type=f32)             # [T*Bp,A]
    a1 = (jnp.dot(gru_flat, w1x_ref[...], preferred_element_type=f32) + pterm
          ).reshape(T, Bp, A) + q_term[None]

    # ---- attention Dice (stats over all valid (t,b) rows) + score ----
    nval = jnp.maximum(nval_ref[...], 1.0)                      # [1, 1]
    nvar = jnp.maximum(nval_ref[...] - 1.0, 1.0)
    mean_a = jnp.sum((a1 * mask_all).reshape(T * Bp, A), axis=0, keepdims=True) / nval
    diff = ((a1 - mean_a) * mask_all).reshape(T * Bp, A)
    var_a = jnp.sum(diff * diff, axis=0, keepdims=True) / nvar
    pg = jax.nn.sigmoid((a1 - mean_a) * jax.lax.rsqrt(var_a + EPS))
    aatt = aatt_ref[...]
    d = a1 * (aatt + pg * (1.0 - aatt))                         # folded Dice blend
    att_all = (jnp.dot(d.reshape(T * Bp, A), w2_ref[...], preferred_element_type=f32)
               + b2_ref[...]).reshape(T, Bp, 1)                 # traced, no scratch

    # ---- hoisted: gh-side AUGRU projections (candidate | update | reset), split ONCE ----
    ghp = jnp.dot(gru_flat, wghx_ref[...], preferred_element_type=f32) + bgh_ref[...]
    ghc_all = ghp[:, 0:H].reshape(T, Bp, H)
    ghu_all = ghp[:, H:H + 1].reshape(T, Bp, 1)
    ghr_all = ghp[:, H + 1:H + 2].reshape(T, Bp, 1)
    wuh = wh2ur_ref[:, 0:1]                                     # [H, 1]
    wrh = wh2ur_ref[:, 1:2]                                     # [H, 1]
    wch = wch_ref[...]                                          # [H, H]

    # ---- pass 2: serial AUGRU, fully unrolled ----
    h2 = jnp.zeros((Bp, H), f32)
    for t in range(T):
        m = mask_all[t]
        hu = jnp.dot(h2, wuh, preferred_element_type=f32)       # [Bp, 1]
        hr = jnp.dot(h2, wrh, preferred_element_type=f32)       # [Bp, 1]
        u = att_all[t] * jax.nn.sigmoid(ghu_all[t] + hu)
        r = jax.nn.sigmoid(ghr_all[t] + hr)
        th = jnp.tanh(ghc_all[t]
                      + jnp.dot(h2 * r, wch, preferred_element_type=f32))
        h_new = (1.0 - u) * h2 + u * th
        h2 = m * h_new + (1.0 - m) * h2

    # ---- final MLP: Linear -> Dice -> Linear -> Dice -> Linear -> sigmoid ----
    rowm = rowm_ref[...]                                        # [Bp, 1] real-row mask
    nb = float(b_real)
    nbv = float(max(b_real - 1, 1))

    def dice_rows(xv, alpha):
        mean = jnp.sum(xv * rowm, axis=0, keepdims=True) / nb
        dd = (xv - mean) * rowm
        var = jnp.sum(dd * dd, axis=0, keepdims=True) / nbv
        p = jax.nn.sigmoid((xv - mean) * jax.lax.rsqrt(var + EPS))
        return xv * (alpha + p * (1.0 - alpha))                 # folded Dice blend

    l1 = (jnp.dot(h2, wm1h_ref[...], preferred_element_type=f32)
          + jnp.dot(q, wm1q_ref[...], preferred_element_type=f32) + bm1_ref[...])
    d1 = dice_rows(l1, am1_ref[...])
    l2 = jnp.dot(d1, wm2_ref[...], preferred_element_type=f32) + bm2_ref[...]
    d2 = dice_rows(l2, am2_ref[...])
    l3 = jnp.dot(d2, wm3_ref[...], preferred_element_type=f32) + bm3_ref[...]
    out_ref[...] = jax.nn.sigmoid(l3)


# ----------------------------------------------------------------------------
# Host-side wrapper: embedding lookup, batch padding, weight fusion, pallas_call
# ----------------------------------------------------------------------------
def dien_forward(x, params, field_dims):
    table = params["embed_table"]
    offsets = jnp.concatenate(
        [jnp.zeros((1,), jnp.int32),
         jnp.cumsum(jnp.asarray(field_dims, jnp.int32))[:-1]])
    emb = table[x + offsets[None, :]]                           # [B, F, D]
    B, F, D = emb.shape
    T = F - 1
    H = D
    A = params["w1x"].shape[1]
    Bp = ((B + 7) // 8) * 8                                     # pad batch to sublanes

    lengths = jnp.sum((x[:, :-1] > 0).astype(jnp.int32), axis=1)        # [B]
    mask2d = (jnp.arange(T)[:, None] < lengths[None, :]).astype(jnp.float32)  # [T, B]
    emb_t = jnp.transpose(emb[:, :T, :], (1, 0, 2))             # [T, B, D]
    query = emb[:, -1, :]                                       # [B, D]

    padB = Bp - B
    emb_t = jnp.pad(emb_t, ((0, 0), (0, padB), (0, 0)))
    mask = jnp.pad(mask2d, ((0, 0), (0, padB)))[:, :, None]     # [T, Bp, 1]
    query = jnp.pad(query, ((0, padB), (0, 0)))                 # [Bp, D]
    rowm = (jnp.arange(Bp) < B).astype(jnp.float32)[:, None]    # [Bp, 1]
    nval = jnp.sum(mask).reshape(1, 1)                          # total valid rows

    # ---- one-time host-side weight fusion / re-layout (constants only) ----
    wih3, whh3, bih3, bhh3 = (params[k] for k in ["wih3", "whh3", "bih3", "bhh3"])
    wih_cat = jnp.concatenate([wih3[0], wih3[1], wih3[2]], axis=1)       # [D, 3H]
    bx_cat = jnp.concatenate(
        [bih3[0] + bhh3[0], bih3[1] + bhh3[1], bih3[2]], axis=1)         # [1, 3H]
    bhn = bhh3[2]                                                        # [1, H]
    w1pr = jnp.transpose(params["w1p"], (1, 0, 2)).reshape(D, H * A)     # [D, H*A]
    # MXU expand / fold constants for the bilinear attention term
    expand_mat = jnp.repeat(jnp.eye(H, dtype=jnp.float32), A, axis=1)    # [H, H*A]
    fold_mat = jnp.tile(jnp.eye(A, dtype=jnp.float32), (H, 1))           # [H*A, A]
    wu, wr, wc = params["wu"], params["wr"], params["wc"]
    wghx = jnp.concatenate([wc[:H], wu[:H], wr[:H]], axis=1)             # [H, H+2]
    bgh = jnp.concatenate([params["bc"], params["bu"], params["br"]], axis=1)  # [1, H+2]
    wh2ur = jnp.concatenate([wu[H:], wr[H:]], axis=1)                    # [H, 2]
    wch = wc[H:]                                                         # [H, H]
    wm1h, wm1q = params["wm1"][:H], params["wm1"][H:]

    args = [emb_t, mask, rowm, nval, query,
            wih_cat, bx_cat, whh3, bhn,
            params["w1x"], w1pr, params["w1q"], params["b1"], params["aatt"],
            params["w2"], params["b2"],
            expand_mat, fold_mat,
            wghx, bgh, wh2ur, wch,
            wm1h, wm1q, params["bm1"], params["am1"],
            params["wm2"], params["bm2"], params["am2"],
            params["wm3"], params["bm3"]]

    vmem = pl.BlockSpec(memory_space=pltpu.MemorySpace.VMEM)
    out = pl.pallas_call(
        functools.partial(dien_kernel, B),
        out_shape=jax.ShapeDtypeStruct((Bp, 1), jnp.float32),
        in_specs=[vmem] * len(args),
        out_specs=vmem,
        scratch_shapes=[pltpu.VMEM((T, Bp, H), jnp.float32)],   # GRU outputs slab
        compiler_params=pltpu.CompilerParams(vmem_limit_bytes=32 * 1024 * 1024),
    )(*args)
    return out[:B]


# ----------------------------------------------------------------------------
# Pure-JAX reference (mirrors the PyTorch math, incl. explicit outer-product p)
# ----------------------------------------------------------------------------
def dien_reference(x, params, field_dims):
    table = params["embed_table"]
    offsets = jnp.concatenate(
        [jnp.zeros((1,), jnp.int32),
         jnp.cumsum(jnp.asarray(field_dims, jnp.int32))[:-1]])
    emb = table[x + offsets[None, :]]
    B, F, D = emb.shape
    T = F - 1
    H = D
    lengths = jnp.sum((x[:, :-1] > 0).astype(jnp.int32), axis=1)
    mask = (jnp.arange(T)[:, None] < lengths[None, :]).astype(jnp.float32)[:, :, None]
    emb_t = jnp.transpose(emb[:, :T, :], (1, 0, 2))
    q = emb[:, -1, :]

    wih3, whh3, bih3, bhh3 = (params[k] for k in ["wih3", "whh3", "bih3", "bhh3"])
    h = jnp.zeros((B, H), jnp.float32)
    gru_out = []
    for t in range(T):
        xt, m = emb_t[t], mask[t]
        r = jax.nn.sigmoid(xt @ wih3[0] + bih3[0] + h @ whh3[0] + bhh3[0])
        z = jax.nn.sigmoid(xt @ wih3[1] + bih3[1] + h @ whh3[1] + bhh3[1])
        n = jnp.tanh(xt @ wih3[2] + bih3[2] + r * (h @ whh3[2] + bhh3[2]))
        h_new = (1.0 - z) * n + z * h
        gru_out.append(h_new)
        h = m * h_new + (1.0 - m) * h
    gru_out = jnp.stack(gru_out)                                   # [T, B, H]

    # attention: explicit flattened outer product, as in the PyTorch code
    p = (gru_out[:, :, :, None] * q[None, :, None, :]).reshape(T, B, H * D)
    a1 = (gru_out @ params["w1x"] + p @ params["w1p"].reshape(H * D, -1)
          + q @ params["w1q"] + params["b1"])
    nv = jnp.sum(mask)
    mean_a = jnp.sum(a1 * mask, axis=(0, 1)) / nv
    diff = (a1 - mean_a) * mask
    var_a = jnp.sum(diff * diff, axis=(0, 1)) / (nv - 1.0)
    inv_a = jax.lax.rsqrt(var_a + EPS)

    h2 = jnp.zeros((B, H), jnp.float32)
    for t in range(T):
        gh, m, a = gru_out[t], mask[t], a1[t]
        pg = jax.nn.sigmoid((a - mean_a) * inv_a)
        d = pg * a + (1.0 - pg) * params["aatt"] * a
        att = d @ params["w2"] + params["b2"]
        xh = jnp.concatenate([gh, h2], axis=1)
        u = att * jax.nn.sigmoid(xh @ params["wu"] + params["bu"])
        r = jax.nn.sigmoid(xh @ params["wr"] + params["br"])
        th = jnp.tanh(jnp.concatenate([gh, h2 * r], axis=1) @ params["wc"] + params["bc"])
        h_new = (1.0 - u) * h2 + u * th
        h2 = m * h_new + (1.0 - m) * h2

    def dice(xv, alpha):
        mean = jnp.mean(xv, axis=0, keepdims=True)
        var = jnp.sum((xv - mean) ** 2, axis=0, keepdims=True) / float(xv.shape[0] - 1)
        pr = jax.nn.sigmoid((xv - mean) * jax.lax.rsqrt(var + EPS))
        return pr * xv + (1.0 - pr) * alpha * xv

    cat = jnp.concatenate([h2, q], axis=1)
    l1 = dice(cat @ params["wm1"] + params["bm1"], params["am1"])
    l2 = dice(l1 @ params["wm2"] + params["bm2"], params["am2"])
    l3 = l2 @ params["wm3"] + params["bm3"]
    return jax.nn.sigmoid(l3)


# ----------------------------------------------------------------------------
# Deterministic parameter init
# ----------------------------------------------------------------------------
def init_params(key, field_dims, D, A, mlp_dims):
    H = D
    M1, M2 = mlp_dims
    vocab = int(sum(field_dims))
    ks = jax.random.split(key, 24)
    rnd = lambda k, shp, s=0.15: (jax.random.normal(k, shp, jnp.float32) * s)
    return {
        "embed_table": rnd(ks[0], (vocab, D), 0.3),
        # GRU (gate order r, z, n)
        "wih3": rnd(ks[1], (3, D, H)), "whh3": rnd(ks[2], (3, H, H)),
        "bih3": rnd(ks[3], (3, 1, H)), "bhh3": rnd(ks[4], (3, 1, H)),
        # attention MLP: Linear(H + H*D + D -> A), Dice, Linear(A -> 1)
        "w1x": rnd(ks[5], (H, A)), "w1p": rnd(ks[6], (H, D, A)),
        "w1q": rnd(ks[7], (D, A)), "b1": rnd(ks[8], (1, A)),
        "aatt": jnp.full((1, A), 0.25, jnp.float32),
        "w2": rnd(ks[9], (A, 1)), "b2": rnd(ks[10], (1, 1)),
        # AUGRU cell
        "wu": rnd(ks[11], (2 * H, 1)), "bu": rnd(ks[12], (1, 1)),
        "wr": rnd(ks[13], (2 * H, 1)), "br": rnd(ks[14], (1, 1)),
        "wc": rnd(ks[15], (2 * H, H)), "bc": rnd(ks[16], (1, H)),
        # final MLP
        "wm1": rnd(ks[17], (H + D, M1)), "bm1": rnd(ks[18], (1, M1)),
        "am1": jnp.full((1, M1), 0.25, jnp.float32),
        "wm2": rnd(ks[19], (M1, M2)), "bm2": rnd(ks[20], (1, M2)),
        "am2": jnp.full((1, M2), 0.25, jnp.float32),
        "wm3": rnd(ks[21], (M2, 1)), "bm3": rnd(ks[22], (1, 1)),
    }


if __name__ == "__main__":
    B, F = 4, 8                       # batch, num_fields  (T = 7 behavior steps)
    D = 16                            # embed_dim == hidden_size
    A = 16                            # attention_dim
    mlp_dims = (32, 16)
    field_dims = [12] * F

    key = jax.random.PRNGKey(0)
    kp, kx = jax.random.split(key)
    params = init_params(kp, field_dims, D, A, mlp_dims)

    # categorical feature ids; zero-suffix rows give variable behavior lengths
    x = jax.random.randint(kx, (B, F), 1, field_dims[0], dtype=jnp.int32)
    x = x.at[1, 5:F - 1].set(0)       # length 5
    x = x.at[2, 3:F - 1].set(0)       # length 3
    x = x.at[3, 1:F - 1].set(0)       # length 1

    out = dien_forward(x, params, field_dims)
    out = jax.block_until_ready(out)

    ref = dien_reference(x, params, field_dims)
    err = float(jnp.max(jnp.abs(out - ref)))
    assert out.shape == (B, 1), out.shape
    assert err < 1e-3, f"kernel/reference mismatch: {err}"
    print("KERNEL_OK")
</pallas_src>

<mosaic_0001>
module attributes {stable_mosaic.version = 11 : i64} {
  func.func @dien_kernel(%arg0: memref<7x8x16xf32, #tpu.memory_space<vmem>>, %arg1: memref<7x8x1xf32, #tpu.memory_space<vmem>>, %arg2: memref<8x1xf32, #tpu.memory_space<vmem>>, %arg3: memref<1x1xf32, #tpu.memory_space<vmem>>, %arg4: memref<8x16xf32, #tpu.memory_space<vmem>>, %arg5: memref<16x48xf32, #tpu.memory_space<vmem>>, %arg6: memref<1x48xf32, #tpu.memory_space<vmem>>, %arg7: memref<3x16x16xf32, #tpu.memory_space<vmem>>, %arg8: memref<1x16xf32, #tpu.memory_space<vmem>>, %arg9: memref<16x16xf32, #tpu.memory_space<vmem>>, %arg10: memref<16x256xf32, #tpu.memory_space<vmem>>, %arg11: memref<16x16xf32, #tpu.memory_space<vmem>>, %arg12: memref<1x16xf32, #tpu.memory_space<vmem>>, %arg13: memref<1x16xf32, #tpu.memory_space<vmem>>, %arg14: memref<16x1xf32, #tpu.memory_space<vmem>>, %arg15: memref<1x1xf32, #tpu.memory_space<vmem>>, %arg16: memref<16x256xf32, #tpu.memory_space<vmem>>, %arg17: memref<256x16xf32, #tpu.memory_space<vmem>>, %arg18: memref<16x18xf32, #tpu.memory_space<vmem>>, %arg19: memref<1x18xf32, #tpu.memory_space<vmem>>, %arg20: memref<16x2xf32, #tpu.memory_space<vmem>>, %arg21: memref<16x16xf32, #tpu.memory_space<vmem>>, %arg22: memref<16x32xf32, #tpu.memory_space<vmem>>, %arg23: memref<16x32xf32, #tpu.memory_space<vmem>>, %arg24: memref<1x32xf32, #tpu.memory_space<vmem>>, %arg25: memref<1x32xf32, #tpu.memory_space<vmem>>, %arg26: memref<32x16xf32, #tpu.memory_space<vmem>>, %arg27: memref<1x16xf32, #tpu.memory_space<vmem>>, %arg28: memref<1x16xf32, #tpu.memory_space<vmem>>, %arg29: memref<16x1xf32, #tpu.memory_space<vmem>>, %arg30: memref<1x1xf32, #tpu.memory_space<vmem>>, %arg31: memref<8x1xf32, #tpu.memory_space<vmem>>, %arg32: memref<7x8x16xf32, #tpu.memory_space<vmem>>) attributes {dimension_semantics = [], scalar_prefetch = 0 : i64, scratch_operands = 1 : i64, tpu.core_type = #tpu.core_type<tc>} {
    %c0 = arith.constant 0 : index
    %c0_0 = arith.constant 0 : index
    %c0_1 = arith.constant 0 : index
    %0 = vector.load %arg0[%c0, %c0_0, %c0_1] : memref<7x8x16xf32, #tpu.memory_space<vmem>>, vector<7x8x16xf32>
    %1 = vector.shape_cast %0 : vector<7x8x16xf32> to vector<56x16xf32>
    %c0_2 = arith.constant 0 : index
    %c0_3 = arith.constant 0 : index
    %2 = vector.load %arg5[%c0_2, %c0_3] : memref<16x48xf32, #tpu.memory_space<vmem>>, vector<16x48xf32>
    %cst = arith.constant dense<0.000000e+00> : vector<56x48xf32>
    %3 = tpu.matmul %1, %2, %cst {dimension_numbers = #tpu.dot_dimension_numbers<[1], [0], [0], [1], [0, 0, 1, 1], [], []>} : vector<56x16xf32>, vector<16x48xf32>, vector<56x48xf32> -> vector<56x48xf32>
    %c0_4 = arith.constant 0 : index
    %c0_5 = arith.constant 0 : index
    %4 = vector.load %arg6[%c0_4, %c0_5] : memref<1x48xf32, #tpu.memory_space<vmem>>, vector<1x48xf32>
    %5 = vector.broadcast %4 : vector<1x48xf32> to vector<56x48xf32>
    %6 = arith.addf %3, %5 : vector<56x48xf32>
    %7 = vector.extract_strided_slice %6 {offsets = [0, 0], sizes = [56, 16], strides = [1, 1]} : vector<56x48xf32> to vector<56x16xf32>
    %8 = vector.shape_cast %7 : vector<56x16xf32> to vector<7x8x16xf32>
    %9 = vector.extract_strided_slice %6 {offsets = [0, 16], sizes = [56, 16], strides = [1, 1]} : vector<56x48xf32> to vector<56x16xf32>
    %10 = vector.shape_cast %9 : vector<56x16xf32> to vector<7x8x16xf32>
    %11 = vector.extract_strided_slice %6 {offsets = [0, 32], sizes = [56, 16], strides = [1, 1]} : vector<56x48xf32> to vector<56x16xf32>
    %12 = vector.shape_cast %11 : vector<56x16xf32> to vector<7x8x16xf32>
    %c0_6 = arith.constant 0 : index
    %c0_7 = arith.constant 0 : index
    %c0_8 = arith.constant 0 : index
    %13 = vector.load %arg7[%c0_6, %c0_7, %c0_8] : memref<3x16x16xf32, #tpu.memory_space<vmem>>, vector<1x16x16xf32>
    %14 = vector.shape_cast %13 : vector<1x16x16xf32> to vector<16x16xf32>
    %c1 = arith.constant 1 : index
    %c0_9 = arith.constant 0 : index
    %c0_10 = arith.constant 0 : index
    %15 = vector.load %arg7[%c1, %c0_9, %c0_10] : memref<3x16x16xf32, #tpu.memory_space<vmem>>, vector<1x16x16xf32>
    %16 = vector.shape_cast %15 : vector<1x16x16xf32> to vector<16x16xf32>
    %c2 = arith.constant 2 : index
    %c0_11 = arith.constant 0 : index
    %c0_12 = arith.constant 0 : index
    %17 = vector.load %arg7[%c2, %c0_11, %c0_12] : memref<3x16x16xf32, #tpu.memory_space<vmem>>, vector<1x16x16xf32>
    %18 = vector.shape_cast %17 : vector<1x16x16xf32> to vector<16x16xf32>
    %c0_13 = arith.constant 0 : index
    %c0_14 = arith.constant 0 : index
    %19 = vector.load %arg8[%c0_13, %c0_14] : memref<1x16xf32, #tpu.memory_space<vmem>>, vector<1x16xf32>
    %c0_15 = arith.constant 0 : index
    %c0_16 = arith.constant 0 : index
    %c0_17 = arith.constant 0 : index
    %20 = vector.load %arg1[%c0_15, %c0_16, %c0_17] : memref<7x8x1xf32, #tpu.memory_space<vmem>>, vector<7x8x1xf32>
    %cst_18 = arith.constant 0.000000e+00 : f32
    %21 = vector.broadcast %cst_18 : f32 to vector<8x16xf32>
    %22 = vector.extract_strided_slice %20 {offsets = [0, 0, 0], sizes = [1, 8, 1], strides = [1, 1, 1]} : vector<7x8x1xf32> to vector<1x8x1xf32>
    %23 = vector.shape_cast %22 : vector<1x8x1xf32> to vector<8x1xf32>
    %cst_19 = arith.constant dense<0.000000e+00> : vector<8x16xf32>
    %24 = tpu.matmul %21, %14, %cst_19 {dimension_numbers = #tpu.dot_dimension_numbers<[1], [0], [0], [1], [0, 0, 1, 1], [], []>} : vector<8x16xf32>, vector<16x16xf32>, vector<8x16xf32> -> vector<8x16xf32>
    %cst_20 = arith.constant dense<0.000000e+00> : vector<8x16xf32>
    %25 = tpu.matmul %21, %16, %cst_20 {dimension_numbers = #tpu.dot_dimension_numbers<[1], [0], [0], [1], [0, 0, 1, 1], [], []>} : vector<8x16xf32>, vector<16x16xf32>, vector<8x16xf32> -> vector<8x16xf32>
    %cst_21 = arith.constant dense<0.000000e+00> : vector<8x16xf32>
    %26 = tpu.matmul %21, %18, %cst_21 {dimension_numbers = #tpu.dot_dimension_numbers<[1], [0], [0], [1], [0, 0, 1, 1], [], []>} : vector<8x16xf32>, vector<16x16xf32>, vector<8x16xf32> -> vector<8x16xf32>
    %27 = vector.extract_strided_slice %8 {offsets = [0, 0, 0], sizes = [1, 8, 16], strides = [1, 1, 1]} : vector<7x8x16xf32> to vector<1x8x16xf32>
    %28 = vector.shape_cast %27 : vector<1x8x16xf32> to vector<8x16xf32>
    %29 = arith.addf %28, %24 : vector<8x16xf32>
    %30 = arith.negf %29 : vector<8x16xf32>
    %31 = math.exp %30 : vector<8x16xf32>
    %cst_22 = arith.constant 1.000000e+00 : f32
    %32 = vector.broadcast %cst_22 : f32 to vector<8x16xf32>
    %33 = arith.addf %32, %31 : vector<8x16xf32>
    %34 = arith.divf %32, %33 : vector<8x16xf32>
    %35 = vector.extract_strided_slice %10 {offsets = [0, 0, 0], sizes = [1, 8, 16], strides = [1, 1, 1]} : vector<7x8x16xf32> to vector<1x8x16xf32>
    %36 = vector.shape_cast %35 : vector<1x8x16xf32> to vector<8x16xf32>
    %37 = arith.addf %36, %25 : vector<8x16xf32>
    %38 = arith.negf %37 : vector<8x16xf32>
    %39 = math.exp %38 : vector<8x16xf32>
    %cst_23 = arith.constant 1.000000e+00 : f32
    %40 = vector.broadcast %cst_23 : f32 to vector<8x16xf32>
    %41 = arith.addf %40, %39 : vector<8x16xf32>
    %42 = arith.divf %40, %41 : vector<8x16xf32>
    %43 = vector.extract_strided_slice %12 {offsets = [0, 0, 0], sizes = [1, 8, 16], strides = [1, 1, 1]} : vector<7x8x16xf32> to vector<1x8x16xf32>
    %44 = vector.shape_cast %43 : vector<1x8x16xf32> to vector<8x16xf32>
    %45 = vector.broadcast %19 : vector<1x16xf32> to vector<8x16xf32>
    %46 = arith.addf %26, %45 : vector<8x16xf32>
    %47 = arith.mulf %34, %46 : vector<8x16xf32>
    %48 = arith.addf %44, %47 : vector<8x16xf32>
    %49 = math.tanh %48 : vector<8x16xf32>
    %cst_24 = arith.constant 1.000000e+00 : f32
    %50 = vector.broadcast %cst_24 : f32 to vector<8x16xf32>
    %51 = arith.subf %50, %42 : vector<8x16xf32>
    %52 = arith.mulf %51, %49 : vector<8x16xf32>
    %53 = arith.mulf %42, %21 : vector<8x16xf32>
    %54 = arith.addf %52, %53 : vector<8x16xf32>
    %c0_25 = arith.constant 0 : index
    %c0_26 = arith.constant 0 : index
    %c0_27 = arith.constant 0 : index
    %55 = vector.load %arg32[%c0_25, %c0_26, %c0_27] : memref<7x8x16xf32, #tpu.memory_space<vmem>>, vector<1x8x16xf32>
    %56 = vector.shape_cast %55 : vector<1x8x16xf32> to vector<8x16xf32>
    %57 = vector.shape_cast %54 : vector<8x16xf32> to vector<1x8x16xf32>
    tpu.vector_store %arg32[%c0_25, %c0_26, %c0_27], %57 {strides = array<i32>} : memref<7x8x16xf32, #tpu.memory_space<vmem>>, vector<1x8x16xf32>,
    %58 = vector.broadcast %23 : vector<8x1xf32> to vector<8x16xf32>
    %59 = arith.mulf %58, %54 : vector<8x16xf32>
    %cst_28 = arith.constant 1.000000e+00 : f32
    %60 = vector.broadcast %cst_28 : f32 to vector<8x1xf32>
    %61 = arith.subf %60, %23 : vector<8x1xf32>
    %62 = vector.broadcast %61 : vector<8x1xf32> to vector<8x16xf32>
    %63 = arith.mulf %62, %21 : vector<8x16xf32>
    %64 = arith.addf %59, %63 : vector<8x16xf32>
    %65 = vector.extract_strided_slice %20 {offsets = [1, 0, 0], sizes = [1, 8, 1], strides = [1, 1, 1]} : vector<7x8x1xf32> to vector<1x8x1xf32>
    %66 = vector.shape_cast %65 : vector<1x8x1xf32> to vector<8x1xf32>
    %cst_29 = arith.constant dense<0.000000e+00> : vector<8x16xf32>
    %67 = tpu.matmul %64, %14, %cst_29 {dimension_numbers = #tpu.dot_dimension_numbers<[1], [0], [0], [1], [0, 0, 1, 1], [], []>} : vector<8x16xf32>, vector<16x16xf32>, vector<8x16xf32> -> vector<8x16xf32>
    %cst_30 = arith.constant dense<0.000000e+00> : vector<8x16xf32>
    %68 = tpu.matmul %64, %16, %cst_30 {dimension_numbers = #tpu.dot_dimension_numbers<[1], [0], [0], [1], [0, 0, 1, 1], [], []>} : vector<8x16xf32>, vector<16x16xf32>, vector<8x16xf32> -> vector<8x16xf32>
    %cst_31 = arith.constant dense<0.000000e+00> : vector<8x16xf32>
    %69 = tpu.matmul %64, %18, %cst_31 {dimension_numbers = #tpu.dot_dimension_numbers<[1], [0], [0], [1], [0, 0, 1, 1], [], []>} : vector<8x16xf32>, vector<16x16xf32>, vector<8x16xf32> -> vector<8x16xf32>
    %70 = vector.extract_strided_slice %8 {offsets = [1, 0, 0], sizes = [1, 8, 16], strides = [1, 1, 1]} : vector<7x8x16xf32> to vector<1x8x16xf32>
    %71 = vector.shape_cast %70 : vector<1x8x16xf32> to vector<8x16xf32>
    %72 = arith.addf %71, %67 : vector<8x16xf32>
    %73 = arith.negf %72 : vector<8x16xf32>
    %74 = math.exp %73 : vector<8x16xf32>
    %cst_32 = arith.constant 1.000000e+00 : f32
    %75 = vector.broadcast %cst_32 : f32 to vector<8x16xf32>
    %76 = arith.addf %75, %74 : vector<8x16xf32>
    %77 = arith.divf %75, %76 : vector<8x16xf32>
    %78 = vector.extract_strided_slice %10 {offsets = [1, 0, 0], sizes = [1, 8, 16], strides = [1, 1, 1]} : vector<7x8x16xf32> to vector<1x8x16xf32>
    %79 = vector.shape_cast %78 : vector<1x8x16xf32> to vector<8x16xf32>
    %80 = arith.addf %79, %68 : vector<8x16xf32>
    %81 = arith.negf %80 : vector<8x16xf32>
    %82 = math.exp %81 : vector<8x16xf32>
    %cst_33 = arith.constant 1.000000e+00 : f32
    %83 = vector.broadcast %cst_33 : f32 to vector<8x16xf32>
    %84 = arith.addf %83, %82 : vector<8x16xf32>
    %85 = arith.divf %83, %84 : vector<8x16xf32>
    %86 = vector.extract_strided_slice %12 {offsets = [1, 0, 0], sizes = [1, 8, 16], strides = [1, 1, 1]} : vector<7x8x16xf32> to vector<1x8x16xf32>
    %87 = vector.shape_cast %86 : vector<1x8x16xf32> to vector<8x16xf32>
    %88 = vector.broadcast %19 : vector<1x16xf32> to vector<8x16xf32>
    %89 = arith.addf %69, %88 : vector<8x16xf32>
    %90 = arith.mulf %77, %89 : vector<8x16xf32>
    %91 = arith.addf %87, %90 : vector<8x16xf32>
    %92 = math.tanh %91 : vector<8x16xf32>
    %cst_34 = arith.constant 1.000000e+00 : f32
    %93 = vector.broadcast %cst_34 : f32 to vector<8x16xf32>
    %94 = arith.subf %93, %85 : vector<8x16xf32>
    %95 = arith.mulf %94, %92 : vector<8x16xf32>
    %96 = arith.mulf %85, %64 : vector<8x16xf32>
    %97 = arith.addf %95, %96 : vector<8x16xf32>
    %c1_35 = arith.constant 1 : index
    %c0_36 = arith.constant 0 : index
    %c0_37 = arith.constant 0 : index
    %98 = vector.load %arg32[%c1_35, %c0_36, %c0_37] : memref<7x8x16xf32, #tpu.memory_space<vmem>>, vector<1x8x16xf32>
    %99 = vector.shape_cast %98 : vector<1x8x16xf32> to vector<8x16xf32>
    %100 = vector.shape_cast %97 : vector<8x16xf32> to vector<1x8x16xf32>
    tpu.vector_store %arg32[%c1_35, %c0_36, %c0_37], %100 {strides = array<i32>} : memref<7x8x16xf32, #tpu.memory_space<vmem>>, vector<1x8x16xf32>,
    %101 = vector.broadcast %66 : vector<8x1xf32> to vector<8x16xf32>
    %102 = arith.mulf %101, %97 : vector<8x16xf32>
    %cst_38 = arith.constant 1.000000e+00 : f32
    %103 = vector.broadcast %cst_38 : f32 to vector<8x1xf32>
    %104 = arith.subf %103, %66 : vector<8x1xf32>
    %105 = vector.broadcast %104 : vector<8x1xf32> to vector<8x16xf32>
    %106 = arith.mulf %105, %64 : vector<8x16xf32>
    %107 = arith.addf %102, %106 : vector<8x16xf32>
    %108 = vector.extract_strided_slice %20 {offsets = [2, 0, 0], sizes = [1, 8, 1], strides = [1, 1, 1]} : vector<7x8x1xf32> to vector<1x8x1xf32>
    %109 = vector.shape_cast %108 : vector<1x8x1xf32> to vector<8x1xf32>
    %cst_39 = arith.constant dense<0.000000e+00> : vector<8x16xf32>
    %110 = tpu.matmul %107, %14, %cst_39 {dimension_numbers = #tpu.dot_dimension_numbers<[1], [0], [0], [1], [0, 0, 1, 1], [], []>} : vector<8x16xf32>, vector<16x16xf32>, vector<8x16xf32> -> vector<8x16xf32>
    %cst_40 = arith.constant dense<0.000000e+00> : vector<8x16xf32>
    %111 = tpu.matmul %107, %16, %cst_40 {dimension_numbers = #tpu.dot_dimension_numbers<[1], [0], [0], [1], [0, 0, 1, 1], [], []>} : vector<8x16xf32>, vector<16x16xf32>, vector<8x16xf32> -> vector<8x16xf32>
    %cst_41 = arith.constant dense<0.000000e+00> : vector<8x16xf32>
    %112 = tpu.matmul %107, %18, %cst_41 {dimension_numbers = #tpu.dot_dimension_numbers<[1], [0], [0], [1], [0, 0, 1, 1], [], []>} : vector<8x16xf32>, vector<16x16xf32>, vector<8x16xf32> -> vector<8x16xf32>
    %113 = vector.extract_strided_slice %8 {offsets = [2, 0, 0], sizes = [1, 8, 16], strides = [1, 1, 1]} : vector<7x8x16xf32> to vector<1x8x16xf32>
    %114 = vector.shape_cast %113 : vector<1x8x16xf32> to vector<8x16xf32>
    %115 = arith.addf %114, %110 : vector<8x16xf32>
    %116 = arith.negf %115 : vector<8x16xf32>
    %117 = math.exp %116 : vector<8x16xf32>
    %cst_42 = arith.constant 1.000000e+00 : f32
    %118 = vector.broadcast %cst_42 : f32 to vector<8x16xf32>
    %119 = arith.addf %118, %117 : vector<8x16xf32>
    %120 = arith.divf %118, %119 : vector<8x16xf32>
    %121 = vector.extract_strided_slice %10 {offsets = [2, 0, 0], sizes = [1, 8, 16], strides = [1, 1, 1]} : vector<7x8x16xf32> to vector<1x8x16xf32>
    %122 = vector.shape_cast %121 : vector<1x8x16xf32> to vector<8x16xf32>
    %123 = arith.addf %122, %111 : vector<8x16xf32>
    %124 = arith.negf %123 : vector<8x16xf32>
    %125 = math.exp %124 : vector<8x16xf32>
    %cst_43 = arith.constant 1.000000e+00 : f32
    %126 = vector.broadcast %cst_43 : f32 to vector<8x16xf32>
    %127 = arith.addf %126, %125 : vector<8x16xf32>
    %128 = arith.divf %126, %127 : vector<8x16xf32>
    %129 = vector.extract_strided_slice %12 {offsets = [2, 0, 0], sizes = [1, 8, 16], strides = [1, 1, 1]} : vector<7x8x16xf32> to vector<1x8x16xf32>
    %130 = vector.shape_cast %129 : vector<1x8x16xf32> to vector<8x16xf32>
    %131 = vector.broadcast %19 : vector<1x16xf32> to vector<8x16xf32>
    %132 = arith.addf %112, %131 : vector<8x16xf32>
    %133 = arith.mulf %120, %132 : vector<8x16xf32>
    %134 = arith.addf %130, %133 : vector<8x16xf32>
    %135 = math.tanh %134 : vector<8x16xf32>
    %cst_44 = arith.constant 1.000000e+00 : f32
    %136 = vector.broadcast %cst_44 : f32 to vector<8x16xf32>
    %137 = arith.subf %136, %128 : vector<8x16xf32>
    %138 = arith.mulf %137, %135 : vector<8x16xf32>
    %139 = arith.mulf %128, %107 : vector<8x16xf32>
    %140 = arith.addf %138, %139 : vector<8x16xf32>
    %c2_45 = arith.constant 2 : index
    %c0_46 = arith.constant 0 : index
    %c0_47 = arith.constant 0 : index
    %141 = vector.load %arg32[%c2_45, %c0_46, %c0_47] : memref<7x8x16xf32, #tpu.memory_space<vmem>>, vector<1x8x16xf32>
    %142 = vector.shape_cast %141 : vector<1x8x16xf32> to vector<8x16xf32>
    %143 = vector.shape_cast %140 : vector<8x16xf32> to vector<1x8x16xf32>
    tpu.vector_store %arg32[%c2_45, %c0_46, %c0_47], %143 {strides = array<i32>} : memref<7x8x16xf32, #tpu.memory_space<vmem>>, vector<1x8x16xf32>,
    %144 = vector.broadcast %109 : vector<8x1xf32> to vector<8x16xf32>
    %145 = arith.mulf %144, %140 : vector<8x16xf32>
    %cst_48 = arith.constant 1.000000e+00 : f32
    %146 = vector.broadcast %cst_48 : f32 to vector<8x1xf32>
    %147 = arith.subf %146, %109 : vector<8x1xf32>
    %148 = vector.broadcast %147 : vector<8x1xf32> to vector<8x16xf32>
    %149 = arith.mulf %148, %107 : vector<8x16xf32>
    %150 = arith.addf %145, %149 : vector<8x16xf32>
    %151 = vector.extract_strided_slice %20 {offsets = [3, 0, 0], sizes = [1, 8, 1], strides = [1, 1, 1]} : vector<7x8x1xf32> to vector<1x8x1xf32>
    %152 = vector.shape_cast %151 : vector<1x8x1xf32> to vector<8x1xf32>
    %cst_49 = arith.constant dense<0.000000e+00> : vector<8x16xf32>
    %153 = tpu.matmul %150, %14, %cst_49 {dimension_numbers = #tpu.dot_dimension_numbers<[1], [0], [0], [1], [0, 0, 1, 1], [], []>} : vector<8x16xf32>, vector<16x16xf32>, vector<8x16xf32> -> vector<8x16xf32>
    %cst_50 = arith.constant dense<0.000000e+00> : vector<8x16xf32>
    %154 = tpu.matmul %150, %16, %cst_50 {dimension_numbers = #tpu.dot_dimension_numbers<[1], [0], [0], [1], [0, 0, 1, 1], [], []>} : vector<8x16xf32>, vector<16x16xf32>, vector<8x16xf32> -> vector<8x16xf32>
    %cst_51 = arith.constant dense<0.000000e+00> : vector<8x16xf32>
    %155 = tpu.matmul %150, %18, %cst_51 {dimension_numbers = #tpu.dot_dimension_numbers<[1], [0], [0], [1], [0, 0, 1, 1], [], []>} : vector<8x16xf32>, vector<16x16xf32>, vector<8x16xf32> -> vector<8x16xf32>
    %156 = vector.extract_strided_slice %8 {offsets = [3, 0, 0], sizes = [1, 8, 16], strides = [1, 1, 1]} : vector<7x8x16xf32> to vector<1x8x16xf32>
    %157 = vector.shape_cast %156 : vector<1x8x16xf32> to vector<8x16xf32>
    %158 = arith.addf %157, %153 : vector<8x16xf32>
    %159 = arith.negf %158 : vector<8x16xf32>
    %160 = math.exp %159 : vector<8x16xf32>
    %cst_52 = arith.constant 1.000000e+00 : f32
    %161 = vector.broadcast %cst_52 : f32 to vector<8x16xf32>
    %162 = arith.addf %161, %160 : vector<8x16xf32>
    %163 = arith.divf %161, %162 : vector<8x16xf32>
    %164 = vector.extract_strided_slice %10 {offsets = [3, 0, 0], sizes = [1, 8, 16], strides = [1, 1, 1]} : vector<7x8x16xf32> to vector<1x8x16xf32>
    %165 = vector.shape_cast %164 : vector<1x8x16xf32> to vector<8x16xf32>
    %166 = arith.addf %165, %154 : vector<8x16xf32>
    %167 = arith.negf %166 : vector<8x16xf32>
    %168 = math.exp %167 : vector<8x16xf32>
    %cst_53 = arith.constant 1.000000e+00 : f32
    %169 = vector.broadcast %cst_53 : f32 to vector<8x16xf32>
    %170 = arith.addf %169, %168 : vector<8x16xf32>
    %171 = arith.divf %169, %170 : vector<8x16xf32>
    %172 = vector.extract_strided_slice %12 {offsets = [3, 0, 0], sizes = [1, 8, 16], strides = [1, 1, 1]} : vector<7x8x16xf32> to vector<1x8x16xf32>
    %173 = vector.shape_cast %172 : vector<1x8x16xf32> to vector<8x16xf32>
    %174 = vector.broadcast %19 : vector<1x16xf32> to vector<8x16xf32>
    %175 = arith.addf %155, %174 : vector<8x16xf32>
    %176 = arith.mulf %163, %175 : vector<8x16xf32>
    %177 = arith.addf %173, %176 : vector<8x16xf32>
    %178 = math.tanh %177 : vector<8x16xf32>
    %cst_54 = arith.constant 1.000000e+00 : f32
    %179 = vector.broadcast %cst_54 : f32 to vector<8x16xf32>
    %180 = arith.subf %179, %171 : vector<8x16xf32>
    %181 = arith.mulf %180, %178 : vector<8x16xf32>
    %182 = arith.mulf %171, %150 : vector<8x16xf32>
    %183 = arith.addf %181, %182 : vector<8x16xf32>
    %c3 = arith.constant 3 : index
    %c0_55 = arith.constant 0 : index
    %c0_56 = arith.constant 0 : index
    %184 = vector.load %arg32[%c3, %c0_55, %c0_56] : memref<7x8x16xf32, #tpu.memory_space<vmem>>, vector<1x8x16xf32>
    %185 = vector.shape_cast %184 : vector<1x8x16xf32> to vector<8x16xf32>
    %186 = vector.shape_cast %183 : vector<8x16xf32> to vector<1x8x16xf32>
    tpu.vector_store %arg32[%c3, %c0_55, %c0_56], %186 {strides = array<i32>} : memref<7x8x16xf32, #tpu.memory_space<vmem>>, vector<1x8x16xf32>,
    %187 = vector.broadcast %152 : vector<8x1xf32> to vector<8x16xf32>
    %188 = arith.mulf %187, %183 : vector<8x16xf32>
    %cst_57 = arith.constant 1.000000e+00 : f32
    %189 = vector.broadcast %cst_57 : f32 to vector<8x1xf32>
    %190 = arith.subf %189, %152 : vector<8x1xf32>
    %191 = vector.broadcast %190 : vector<8x1xf32> to vector<8x16xf32>
    %192 = arith.mulf %191, %150 : vector<8x16xf32>
    %193 = arith.addf %188, %192 : vector<8x16xf32>
    %194 = vector.extract_strided_slice %20 {offsets = [4, 0, 0], sizes = [1, 8, 1], strides = [1, 1, 1]} : vector<7x8x1xf32> to vector<1x8x1xf32>
    %195 = vector.shape_cast %194 : vector<1x8x1xf32> to vector<8x1xf32>
    %cst_58 = arith.constant dense<0.000000e+00> : vector<8x16xf32>
    %196 = tpu.matmul %193, %14, %cst_58 {dimension_numbers = #tpu.dot_dimension_numbers<[1], [0], [0], [1], [0, 0, 1, 1], [], []>} : vector<8x16xf32>, vector<16x16xf32>, vector<8x16xf32> -> vector<8x16xf32>
    %cst_59 = arith.constant dense<0.000000e+00> : vector<8x16xf32>
    %197 = tpu.matmul %193, %16, %cst_59 {dimension_numbers = #tpu.dot_dimension_numbers<[1], [0], [0], [1], [0, 0, 1, 1], [], []>} : vector<8x16xf32>, vector<16x16xf32>, vector<8x16xf32> -> vector<8x16xf32>
    %cst_60 = arith.constant dense<0.000000e+00> : vector<8x16xf32>
    %198 = tpu.matmul %193, %18, %cst_60 {dimension_numbers = #tpu.dot_dimension_numbers<[1], [0], [0], [1], [0, 0, 1, 1], [], []>} : vector<8x16xf32>, vector<16x16xf32>, vector<8x16xf32> -> vector<8x16xf32>
    %199 = vector.extract_strided_slice %8 {offsets = [4, 0, 0], sizes = [1, 8, 16], strides = [1, 1, 1]} : vector<7x8x16xf32> to vector<1x8x16xf32>
    %200 = vector.shape_cast %199 : vector<1x8x16xf32> to vector<8x16xf32>
    %201 = arith.addf %200, %196 : vector<8x16xf32>
    %202 = arith.negf %201 : vector<8x16xf32>
    %203 = math.exp %202 : vector<8x16xf32>
    %cst_61 = arith.constant 1.000000e+00 : f32
    %204 = vector.broadcast %cst_61 : f32 to vector<8x16xf32>
    %205 = arith.addf %204, %203 : vector<8x16xf32>
    %206 = arith.divf %204, %205 : vector<8x16xf32>
    %207 = vector.extract_strided_slice %10 {offsets = [4, 0, 0], sizes = [1, 8, 16], strides = [1, 1, 1]} : vector<7x8x16xf32> to vector<1x8x16xf32>
    %208 = vector.shape_cast %207 : vector<1x8x16xf32> to vector<8x16xf32>
    %209 = arith.addf %208, %197 : vector<8x16xf32>
    %210 = arith.negf %209 : vector<8x16xf32>
    %211 = math.exp %210 : vector<8x16xf32>
    %cst_62 = arith.constant 1.000000e+00 : f32
    %212 = vector.broadcast %cst_62 : f32 to vector<8x16xf32>
    %213 = arith.addf %212, %211 : vector<8x16xf32>
    %214 = arith.divf %212, %213 : vector<8x16xf32>
    %215 = vector.extract_strided_slice %12 {offsets = [4, 0, 0], sizes = [1, 8, 16], strides = [1, 1, 1]} : vector<7x8x16xf32> to vector<1x8x16xf32>
    %216 = vector.shape_cast %215 : vector<1x8x16xf32> to vector<8x16xf32>
    %217 = vector.broadcast %19 : vector<1x16xf32> to vector<8x16xf32>
    %218 = arith.addf %198, %217 : vector<8x16xf32>
    %219 = arith.mulf %206, %218 : vector<8x16xf32>
    %220 = arith.addf %216, %219 : vector<8x16xf32>
    %221 = math.tanh %220 : vector<8x16xf32>
    %cst_63 = arith.constant 1.000000e+00 : f32
    %222 = vector.broadcast %cst_63 : f32 to vector<8x16xf32>
    %223 = arith.subf %222, %214 : vector<8x16xf32>
    %224 = arith.mulf %223, %221 : vector<8x16xf32>
    %225 = arith.mulf %214, %193 : vector<8x16xf32>
    %226 = arith.addf %224, %225 : vector<8x16xf32>
    %c4 = arith.constant 4 : index
    %c0_64 = arith.constant 0 : index
    %c0_65 = arith.constant 0 : index
    %227 = vector.load %arg32[%c4, %c0_64, %c0_65] : memref<7x8x16xf32, #tpu.memory_space<vmem>>, vector<1x8x16xf32>
    %228 = vector.shape_cast %227 : vector<1x8x16xf32> to vector<8x16xf32>
    %229 = vector.shape_cast %226 : vector<8x16xf32> to vector<1x8x16xf32>
    tpu.vector_store %arg32[%c4, %c0_64, %c0_65], %229 {strides = array<i32>} : memref<7x8x16xf32, #tpu.memory_space<vmem>>, vector<1x8x16xf32>,
    %230 = vector.broadcast %195 : vector<8x1xf32> to vector<8x16xf32>
    %231 = arith.mulf %230, %226 : vector<8x16xf32>
    %cst_66 = arith.constant 1.000000e+00 : f32
    %232 = vector.broadcast %cst_66 : f32 to vector<8x1xf32>
    %233 = arith.subf %232, %195 : vector<8x1xf32>
    %234 = vector.broadcast %233 : vector<8x1xf32> to vector<8x16xf32>
    %235 = arith.mulf %234, %193 : vector<8x16xf32>
    %236 = arith.addf %231, %235 : vector<8x16xf32>
    %237 = vector.extract_strided_slice %20 {offsets = [5, 0, 0], sizes = [1, 8, 1], strides = [1, 1, 1]} : vector<7x8x1xf32> to vector<1x8x1xf32>
    %238 = vector.shape_cast %237 : vector<1x8x1xf32> to vector<8x1xf32>
    %cst_67 = arith.constant dense<0.000000e+00> : vector<8x16xf32>
    %239 = tpu.matmul %236, %14, %cst_67 {dimension_numbers = #tpu.dot_dimension_numbers<[1], [0], [0], [1], [0, 0, 1, 1], [], []>} : vector<8x16xf32>, vector<16x16xf32>, vector<8x16xf32> -> vector<8x16xf32>
    %cst_68 = arith.constant dense<0.000000e+00> : vector<8x16xf32>
    %240 = tpu.matmul %236, %16, %cst_68 {dimension_numbers = #tpu.dot_dimension_numbers<[1], [0], [0], [1], [0, 0, 1, 1], [], []>} : vector<8x16xf32>, vector<16x16xf32>, vector<8x16xf32> -> vector<8x16xf32>
    %cst_69 = arith.constant dense<0.000000e+00> : vector<8x16xf32>
    %241 = tpu.matmul %236, %18, %cst_69 {dimension_numbers = #tpu.dot_dimension_numbers<[1], [0], [0], [1], [0, 0, 1, 1], [], []>} : vector<8x16xf32>, vector<16x16xf32>, vector<8x16xf32> -> vector<8x16xf32>
    %242 = vector.extract_strided_slice %8 {offsets = [5, 0, 0], sizes = [1, 8, 16], strides = [1, 1, 1]} : vector<7x8x16xf32> to vector<1x8x16xf32>
    %243 = vector.shape_cast %242 : vector<1x8x16xf32> to vector<8x16xf32>
    %244 = arith.addf %243, %239 : vector<8x16xf32>
    %245 = arith.negf %244 : vector<8x16xf32>
    %246 = math.exp %245 : vector<8x16xf32>
    %cst_70 = arith.constant 1.000000e+00 : f32
    %247 = vector.broadcast %cst_70 : f32 to vector<8x16xf32>
    %248 = arith.addf %247, %246 : vector<8x16xf32>
    %249 = arith.divf %247, %248 : vector<8x16xf32>
    %250 = vector.extract_strided_slice %10 {offsets = [5, 0, 0], sizes = [1, 8, 16], strides = [1, 1, 1]} : vector<7x8x16xf32> to vector<1x8x16xf32>
    %251 = vector.shape_cast %250 : vector<1x8x16xf32> to vector<8x16xf32>
    %252 = arith.addf %251, %240 : vector<8x16xf32>
    %253 = arith.negf %252 : vector<8x16xf32>
    %254 = math.exp %253 : vector<8x16xf32>
    %cst_71 = arith.constant 1.000000e+00 : f32
    %255 = vector.broadcast %cst_71 : f32 to vector<8x16xf32>
    %256 = arith.addf %255, %254 : vector<8x16xf32>
    %257 = arith.divf %255, %256 : vector<8x16xf32>
    %258 = vector.extract_strided_slice %12 {offsets = [5, 0, 0], sizes = [1, 8, 16], strides = [1, 1, 1]} : vector<7x8x16xf32> to vector<1x8x16xf32>
    %259 = vector.shape_cast %258 : vector<1x8x16xf32> to vector<8x16xf32>
    %260 = vector.broadcast %19 : vector<1x16xf32> to vector<8x16xf32>
    %261 = arith.addf %241, %260 : vector<8x16xf32>
    %262 = arith.mulf %249, %261 : vector<8x16xf32>
    %263 = arith.addf %259, %262 : vector<8x16xf32>
    %264 = math.tanh %263 : vector<8x16xf32>
    %cst_72 = arith.constant 1.000000e+00 : f32
    %265 = vector.broadcast %cst_72 : f32 to vector<8x16xf32>
    %266 = arith.subf %265, %257 : vector<8x16xf32>
    %267 = arith.mulf %266, %264 : vector<8x16xf32>
    %268 = arith.mulf %257, %236 : vector<8x16xf32>
    %269 = arith.addf %267, %268 : vector<8x16xf32>
    %c5 = arith.constant 5 : index
    %c0_73 = arith.constant 0 : index
    %c0_74 = arith.constant 0 : index
    %270 = vector.load %arg32[%c5, %c0_73, %c0_74] : memref<7x8x16xf32, #tpu.memory_space<vmem>>, vector<1x8x16xf32>
    %271 = vector.shape_cast %270 : vector<1x8x16xf32> to vector<8x16xf32>
    %272 = vector.shape_cast %269 : vector<8x16xf32> to vector<1x8x16xf32>
    tpu.vector_store %arg32[%c5, %c0_73, %c0_74], %272 {strides = array<i32>} : memref<7x8x16xf32, #tpu.memory_space<vmem>>, vector<1x8x16xf32>,
    %273 = vector.broadcast %238 : vector<8x1xf32> to vector<8x16xf32>
    %274 = arith.mulf %273, %269 : vector<8x16xf32>
    %cst_75 = arith.constant 1.000000e+00 : f32
    %275 = vector.broadcast %cst_75 : f32 to vector<8x1xf32>
    %276 = arith.subf %275, %238 : vector<8x1xf32>
    %277 = vector.broadcast %276 : vector<8x1xf32> to vector<8x16xf32>
    %278 = arith.mulf %277, %236 : vector<8x16xf32>
    %279 = arith.addf %274, %278 : vector<8x16xf32>
    %cst_76 = arith.constant dense<0.000000e+00> : vector<8x16xf32>
    %280 = tpu.matmul %279, %14, %cst_76 {dimension_numbers = #tpu.dot_dimension_numbers<[1], [0], [0], [1], [0, 0, 1, 1], [], []>} : vector<8x16xf32>, vector<16x16xf32>, vector<8x16xf32> -> vector<8x16xf32>
    %cst_77 = arith.constant dense<0.000000e+00> : vector<8x16xf32>
    %281 = tpu.matmul %279, %16, %cst_77 {dimension_numbers = #tpu.dot_dimension_numbers<[1], [0], [0], [1], [0, 0, 1, 1], [], []>} : vector<8x16xf32>, vector<16x16xf32>, vector<8x16xf32> -> vector<8x16xf32>
    %cst_78 = arith.constant dense<0.000000e+00> : vector<8x16xf32>
    %282 = tpu.matmul %279, %18, %cst_78 {dimension_numbers = #tpu.dot_dimension_numbers<[1], [0], [0], [1], [0, 0, 1, 1], [], []>} : vector<8x16xf32>, vector<16x16xf32>, vector<8x16xf32> -> vector<8x16xf32>
    %283 = vector.extract_strided_slice %8 {offsets = [6, 0, 0], sizes = [1, 8, 16], strides = [1, 1, 1]} : vector<7x8x16xf32> to vector<1x8x16xf32>
    %284 = vector.shape_cast %283 : vector<1x8x16xf32> to vector<8x16xf32>
    %285 = arith.addf %284, %280 : vector<8x16xf32>
    %286 = arith.negf %285 : vector<8x16xf32>
    %287 = math.exp %286 : vector<8x16xf32>
    %cst_79 = arith.constant 1.000000e+00 : f32
    %288 = vector.broadcast %cst_79 : f32 to vector<8x16xf32>
    %289 = arith.addf %288, %287 : vector<8x16xf32>
    %290 = arith.divf %288, %289 : vector<8x16xf32>
    %291 = vector.extract_strided_slice %10 {offsets = [6, 0, 0], sizes = [1, 8, 16], strides = [1, 1, 1]} : vector<7x8x16xf32> to vector<1x8x16xf32>
    %292 = vector.shape_cast %291 : vector<1x8x16xf32> to vector<8x16xf32>
    %293 = arith.addf %292, %281 : vector<8x16xf32>
    %294 = arith.negf %293 : vector<8x16xf32>
    %295 = math.exp %294 : vector<8x16xf32>
    %cst_80 = arith.constant 1.000000e+00 : f32
    %296 = vector.broadcast %cst_80 : f32 to vector<8x16xf32>
    %297 = arith.addf %296, %295 : vector<8x16xf32>
    %298 = arith.divf %296, %297 : vector<8x16xf32>
    %299 = vector.extract_strided_slice %12 {offsets = [6, 0, 0], sizes = [1, 8, 16], strides = [1, 1, 1]} : vector<7x8x16xf32> to vector<1x8x16xf32>
    %300 = vector.shape_cast %299 : vector<1x8x16xf32> to vector<8x16xf32>
    %301 = vector.broadcast %19 : vector<1x16xf32> to vector<8x16xf32>
    %302 = arith.addf %282, %301 : vector<8x16xf32>
    %303 = arith.mulf %290, %302 : vector<8x16xf32>
    %304 = arith.addf %300, %303 : vector<8x16xf32>
    %305 = math.tanh %304 : vector<8x16xf32>
    %cst_81 = arith.constant 1.000000e+00 : f32
    %306 = vector.broadcast %cst_81 : f32 to vector<8x16xf32>
    %307 = arith.subf %306, %298 : vector<8x16xf32>
    %308 = arith.mulf %307, %305 : vector<8x16xf32>
    %309 = arith.mulf %298, %279 : vector<8x16xf32>
    %310 = arith.addf %308, %309 : vector<8x16xf32>
    %c6 = arith.constant 6 : index
    %c0_82 = arith.constant 0 : index
    %c0_83 = arith.constant 0 : index
    %311 = vector.load %arg32[%c6, %c0_82, %c0_83] : memref<7x8x16xf32, #tpu.memory_space<vmem>>, vector<1x8x16xf32>
    %312 = vector.shape_cast %311 : vector<1x8x16xf32> to vector<8x16xf32>
    %313 = vector.shape_cast %310 : vector<8x16xf32> to vector<1x8x16xf32>
    tpu.vector_store %arg32[%c6, %c0_82, %c0_83], %313 {strides = array<i32>} : memref<7x8x16xf32, #tpu.memory_space<vmem>>, vector<1x8x16xf32>,
    %c0_84 = arith.constant 0 : index
    %c0_85 = arith.constant 0 : index
    %c0_86 = arith.constant 0 : index
    %314 = vector.load %arg32[%c0_84, %c0_85, %c0_86] : memref<7x8x16xf32, #tpu.memory_space<vmem>>, vector<7x8x16xf32>
    %315 = vector.shape_cast %314 : vector<7x8x16xf32> to vector<56x16xf32>
    %c0_87 = arith.constant 0 : index
    %c0_88 = arith.constant 0 : index
    %316 = vector.load %arg4[%c0_87, %c0_88] : memref<8x16xf32, #tpu.memory_space<vmem>>, vector<8x16xf32>
    %c0_89 = arith.constant 0 : index
    %c0_90 = arith.constant 0 : index
    %317 = vector.load %arg11[%c0_89, %c0_90] : memref<16x16xf32, #tpu.memory_space<vmem>>, vector<16x16xf32>
    %cst_91 = arith.constant dense<0.000000e+00> : vector<8x16xf32>
    %318 = tpu.matmul %316, %317, %cst_91 {dimension_numbers = #tpu.dot_dimension_numbers<[1], [0], [0], [1], [0, 0, 1, 1], [], []>} : vector<8x16xf32>, vector<16x16xf32>, vector<8x16xf32> -> vector<8x16xf32>
    %c0_92 = arith.constant 0 : index
    %c0_93 = arith.constant 0 : index
    %319 = vector.load %arg12[%c0_92, %c0_93] : memref<1x16xf32, #tpu.memory_space<vmem>>, vector<1x16xf32>
    %320 = vector.broadcast %319 : vector<1x16xf32> to vector<8x16xf32>
    %321 = arith.addf %318, %320 : vector<8x16xf32>
    %c0_94 = arith.constant 0 : index
    %c0_95 = arith.constant 0 : index
    %322 = vector.load %arg10[%c0_94, %c0_95] : memref<16x256xf32, #tpu.memory_space<vmem>>, vector<16x256xf32>
    %cst_96 = arith.constant dense<0.000000e+00> : vector<8x256xf32>
    %323 = tpu.matmul %316, %322, %cst_96 {dimension_numbers = #tpu.dot_dimension_numbers<[1], [0], [0], [1], [0, 0, 1, 1], [], []>} : vector<8x16xf32>, vector<16x256xf32>, vector<8x256xf32> -> vector<8x256xf32>
    %c0_97 = arith.constant 0 : index
    %c0_98 = arith.constant 0 : index
    %324 = vector.load %arg16[%c0_97, %c0_98] : memref<16x256xf32, #tpu.memory_space<vmem>>, vector<16x256xf32>
    %cst_99 = arith.constant dense<0.000000e+00> : vector<56x256xf32>
    %325 = tpu.matmul %315, %324, %cst_99 {dimension_numbers = #tpu.dot_dimension_numbers<[1], [0], [0], [1], [0, 0, 1, 1], [], []>} : vector<56x16xf32>, vector<16x256xf32>, vector<56x256xf32> -> vector<56x256xf32>
    %326 = vector.shape_cast %325 : vector<56x256xf32> to vector<7x8x256xf32>
    %327 = vector.shape_cast %323 : vector<8x256xf32> to vector<1x8x256xf32>
    %328 = vector.broadcast %327 : vector<1x8x256xf32> to vector<7x8x256xf32>
    %329 = arith.mulf %326, %328 : vector<7x8x256xf32>
    %330 = vector.shape_cast %329 : vector<7x8x256xf32> to vector<56x256xf32>
    %c0_100 = arith.constant 0 : index
    %c0_101 = arith.constant 0 : index
    %331 = vector.load %arg17[%c0_100, %c0_101] : memref<256x16xf32, #tpu.memory_space<vmem>>, vector<256x16xf32>
    %cst_102 = arith.constant dense<0.000000e+00> : vector<56x16xf32>
    %332 = tpu.matmul %330, %331, %cst_102 {dimension_numbers = #tpu.dot_dimension_numbers<[1], [0], [0], [1], [0, 0, 1, 1], [], []>} : vector<56x256xf32>, vector<256x16xf32>, vector<56x16xf32> -> vector<56x16xf32>
    %c0_103 = arith.constant 0 : index
    %c0_104 = arith.constant 0 : index
    %333 = vector.load %arg9[%c0_103, %c0_104] : memref<16x16xf32, #tpu.memory_space<vmem>>, vector<16x16xf32>
    %cst_105 = arith.constant dense<0.000000e+00> : vector<56x16xf32>
    %334 = tpu.matmul %315, %333, %cst_105 {dimension_numbers = #tpu.dot_dimension_numbers<[1], [0], [0], [1], [0, 0, 1, 1], [], []>} : vector<56x16xf32>, vector<16x16xf32>, vector<56x16xf32> -> vector<56x16xf32>
    %335 = arith.addf %334, %332 : vector<56x16xf32>
    %336 = vector.shape_cast %335 : vector<56x16xf32> to vector<7x8x16xf32>
    %337 = vector.shape_cast %321 : vector<8x16xf32> to vector<1x8x16xf32>
    %338 = vector.broadcast %337 : vector<1x8x16xf32> to vector<7x8x16xf32>
    %339 = arith.addf %336, %338 : vector<7x8x16xf32>
    %c0_106 = arith.constant 0 : index
    %c0_107 = arith.constant 0 : index
    %340 = vector.load %arg3[%c0_106, %c0_107] : memref<1x1xf32, #tpu.memory_space<vmem>>, vector<1x1xf32>
    %cst_108 = arith.constant 1.000000e+00 : f32
    %341 = vector.broadcast %cst_108 : f32 to vector<1x1xf32>
    %342 = arith.maximumf %340, %341 : vector<1x1xf32>
    %c0_109 = arith.constant 0 : index
    %c0_110 = arith.constant 0 : index
    %343 = vector.load %arg3[%c0_109, %c0_110] : memref<1x1xf32, #tpu.memory_space<vmem>>, vector<1x1xf32>
    %cst_111 = arith.constant 1.000000e+00 : f32
    %344 = vector.broadcast %cst_111 : f32 to vector<1x1xf32>
    %345 = arith.subf %343, %344 : vector<1x1xf32>
    %cst_112 = arith.constant 1.000000e+00 : f32
    %346 = vector.broadcast %cst_112 : f32 to vector<1x1xf32>
    %347 = arith.maximumf %345, %346 : vector<1x1xf32>
    %348 = vector.broadcast %20 : vector<7x8x1xf32> to vector<7x8x16xf32>
    %349 = arith.mulf %339, %348 : vector<7x8x16xf32>
    %350 = vector.shape_cast %349 : vector<7x8x16xf32> to vector<56x16xf32>
    %cst_113 = arith.constant dense<0.000000e+00> : vector<16xf32>
    %351 = vector.multi_reduction <add>, %350, %cst_113 [0] : vector<56x16xf32> to vector<16xf32>
    %352 = vector.shape_cast %351 : vector<16xf32> to vector<1x16xf32>
    %353 = vector.broadcast %342 : vector<1x1xf32> to vector<1x16xf32>
    %354 = arith.divf %352, %353 : vector<1x16xf32>
    %355 = vector.shape_cast %354 : vector<1x16xf32> to vector<1x1x16xf32>
    %356 = vector.broadcast %355 : vector<1x1x16xf32> to vector<7x8x16xf32>
    %357 = arith.subf %339, %356 : vector<7x8x16xf32>
    %358 = vector.broadcast %20 : vector<7x8x1xf32> to vector<7x8x16xf32>
    %359 = arith.mulf %357, %358 : vector<7x8x16xf32>
    %360 = vector.shape_cast %359 : vector<7x8x16xf32> to vector<56x16xf32>
    %361 = arith.mulf %360, %360 : vector<56x16xf32>
    %cst_114 = arith.constant dense<0.000000e+00> : vector<16xf32>
    %362 = vector.multi_reduction <add>, %361, %cst_114 [0] : vector<56x16xf32> to vector<16xf32>
    %363 = vector.shape_cast %362 : vector<16xf32> to vector<1x16xf32>
    %364 = vector.broadcast %347 : vector<1x1xf32> to vector<1x16xf32>
    %365 = arith.divf %363, %364 : vector<1x16xf32>
    %366 = vector.shape_cast %354 : vector<1x16xf32> to vector<1x1x16xf32>
    %367 = vector.broadcast %366 : vector<1x1x16xf32> to vector<7x8x16xf32>
    %368 = arith.subf %339, %367 : vector<7x8x16xf32>
    %cst_115 = arith.constant 9.99999993E-9 : f32
    %369 = vector.broadcast %cst_115 : f32 to vector<1x16xf32>
    %370 = arith.addf %365, %369 : vector<1x16xf32>
    %371 = math.rsqrt %370 : vector<1x16xf32>
    %372 = vector.shape_cast %371 : vector<1x16xf32> to vector<1x1x16xf32>
    %373 = vector.broadcast %372 : vector<1x1x16xf32> to vector<7x8x16xf32>
    %374 = arith.mulf %368, %373 : vector<7x8x16xf32>
    %375 = arith.negf %374 : vector<7x8x16xf32>
    %376 = math.exp %375 : vector<7x8x16xf32>
    %cst_116 = arith.constant 1.000000e+00 : f32
    %377 = vector.broadcast %cst_116 : f32 to vector<7x8x16xf32>
    %378 = arith.addf %377, %376 : vector<7x8x16xf32>
    %379 = arith.divf %377, %378 : vector<7x8x16xf32>
    %c0_117 = arith.constant 0 : index
    %c0_118 = arith.constant 0 : index
    %380 = vector.load %arg13[%c0_117, %c0_118] : memref<1x16xf32, #tpu.memory_space<vmem>>, vector<1x16xf32>
    %cst_119 = arith.constant 1.000000e+00 : f32
    %381 = vector.broadcast %cst_119 : f32 to vector<1x16xf32>
    %382 = arith.subf %381, %380 : vector<1x16xf32>
    %383 = vector.shape_cast %382 : vector<1x16xf32> to vector<1x1x16xf32>
    %384 = vector.broadcast %383 : vector<1x1x16xf32> to vector<7x8x16xf32>
    %385 = arith.mulf %379, %384 : vector<7x8x16xf32>
    %386 = vector.shape_cast %380 : vector<1x16xf32> to vector<1x1x16xf32>
    %387 = vector.broadcast %386 : vector<1x1x16xf32> to vector<7x8x16xf32>
    %388 = arith.addf %387, %385 : vector<7x8x16xf32>
    %389 = arith.mulf %339, %388 : vector<7x8x16xf32>
    %390 = vector.shape_cast %389 : vector<7x8x16xf32> to vector<56x16xf32>
    %c0_120 = arith.constant 0 : index
    %c0_121 = arith.constant 0 : index
    %391 = vector.load %arg14[%c0_120, %c0_121] : memref<16x1xf32, #tpu.memory_space<vmem>>, vector<16x1xf32>
    %cst_122 = arith.constant dense<0.000000e+00> : vector<56x1xf32>
    %392 = tpu.matmul %390, %391, %cst_122 {dimension_numbers = #tpu.dot_dimension_numbers<[1], [0], [0], [1], [0, 0, 1, 1], [], []>} : vector<56x16xf32>, vector<16x1xf32>, vector<56x1xf32> -> vector<56x1xf32>
    %c0_123 = arith.constant 0 : index
    %c0_124 = arith.constant 0 : index
    %393 = vector.load %arg15[%c0_123, %c0_124] : memref<1x1xf32, #tpu.memory_space<vmem>>, vector<1x1xf32>
    %394 = vector.broadcast %393 : vector<1x1xf32> to vector<56x1xf32>
    %395 = arith.addf %392, %394 : vector<56x1xf32>
    %396 = vector.shape_cast %395 : vector<56x1xf32> to vector<7x8x1xf32>
    %c0_125 = arith.constant 0 : index
    %c0_126 = arith.constant 0 : index
    %397 = vector.load %arg18[%c0_125, %c0_126] : memref<16x18xf32, #tpu.memory_space<vmem>>, vector<16x18xf32>
    %cst_127 = arith.constant dense<0.000000e+00> : vector<56x18xf32>
    %398 = tpu.matmul %315, %397, %cst_127 {dimension_numbers = #tpu.dot_dimension_numbers<[1], [0], [0], [1], [0, 0, 1, 1], [], []>} : vector<56x16xf32>, vector<16x18xf32>, vector<56x18xf32> -> vector<56x18xf32>
    %c0_128 = arith.constant 0 : index
    %c0_129 = arith.constant 0 : index
    %399 = vector.load %arg19[%c0_128, %c0_129] : memref<1x18xf32, #tpu.memory_space<vmem>>, vector<1x18xf32>
    %400 = vector.broadcast %399 : vector<1x18xf32> to vector<56x18xf32>
    %401 = arith.addf %398, %400 : vector<56x18xf32>
    %402 = vector.extract_strided_slice %401 {offsets = [0, 0], sizes = [56, 16], strides = [1, 1]} : vector<56x18xf32> to vector<56x16xf32>
    %403 = vector.shape_cast %402 : vector<56x16xf32> to vector<7x8x16xf32>
    %404 = vector.extract_strided_slice %401 {offsets = [0, 16], sizes = [56, 1], strides = [1, 1]} : vector<56x18xf32> to vector<56x1xf32>
    %405 = vector.shape_cast %404 : vector<56x1xf32> to vector<7x8x1xf32>
    %406 = vector.extract_strided_slice %401 {offsets = [0, 17], sizes = [56, 1], strides = [1, 1]} : vector<56x18xf32> to vector<56x1xf32>
    %407 = vector.shape_cast %406 : vector<56x1xf32> to vector<7x8x1xf32>
    %c0_130 = arith.constant 0 : index
    %c0_131 = arith.constant 0 : index
    %408 = vector.load %arg20[%c0_130, %c0_131] : memref<16x2xf32, #tpu.memory_space<vmem>>, vector<16x1xf32>
    %c0_132 = arith.constant 0 : index
    %c1_133 = arith.constant 1 : index
    %409 = vector.load %arg20[%c0_132, %c1_133] : memref<16x2xf32, #tpu.memory_space<vmem>>, vector<16x1xf32>
    %c0_134 = arith.constant 0 : index
    %c0_135 = arith.constant 0 : index
    %410 = vector.load %arg21[%c0_134, %c0_135] : memref<16x16xf32, #tpu.memory_space<vmem>>, vector<16x16xf32>
    %cst_136 = arith.constant 0.000000e+00 : f32
    %411 = vector.broadcast %cst_136 : f32 to vector<8x16xf32>
    %412 = vector.extract_strided_slice %20 {offsets = [0, 0, 0], sizes = [1, 8, 1], strides = [1, 1, 1]} : vector<7x8x1xf32> to vector<1x8x1xf32>
    %413 = vector.shape_cast %412 : vector<1x8x1xf32> to vector<8x1xf32>
    %cst_137 = arith.constant dense<0.000000e+00> : vector<8x1xf32>
    %414 = tpu.matmul %411, %408, %cst_137 {dimension_numbers = #tpu.dot_dimension_numbers<[1], [0], [0], [1], [0, 0, 1, 1], [], []>} : vector<8x16xf32>, vector<16x1xf32>, vector<8x1xf32> -> vector<8x1xf32>
    %cst_138 = arith.constant dense<0.000000e+00> : vector<8x1xf32>
    %415 = tpu.matmul %411, %409, %cst_138 {dimension_numbers = #tpu.dot_dimension_numbers<[1], [0], [0], [1], [0, 0, 1, 1], [], []>} : vector<8x16xf32>, vector<16x1xf32>, vector<8x1xf32> -> vector<8x1xf32>
    %416 = vector.extract_strided_slice %396 {offsets = [0, 0, 0], sizes = [1, 8, 1], strides = [1, 1, 1]} : vector<7x8x1xf32> to vector<1x8x1xf32>
    %417 = vector.shape_cast %416 : vector<1x8x1xf32> to vector<8x1xf32>
    %418 = vector.extract_strided_slice %405 {offsets = [0, 0, 0], sizes = [1, 8, 1], strides = [1, 1, 1]} : vector<7x8x1xf32> to vector<1x8x1xf32>
    %419 = vector.shape_cast %418 : vector<1x8x1xf32> to vector<8x1xf32>
    %420 = arith.addf %419, %414 : vector<8x1xf32>
    %421 = arith.negf %420 : vector<8x1xf32>
    %422 = math.exp %421 : vector<8x1xf32>
    %cst_139 = arith.constant 1.000000e+00 : f32
    %423 = vector.broadcast %cst_139 : f32 to vector<8x1xf32>
    %424 = arith.addf %423, %422 : vector<8x1xf32>
    %425 = arith.divf %423, %424 : vector<8x1xf32>
    %426 = arith.mulf %417, %425 : vector<8x1xf32>
    %427 = vector.extract_strided_slice %407 {offsets = [0, 0, 0], sizes = [1, 8, 1], strides = [1, 1, 1]} : vector<7x8x1xf32> to vector<1x8x1xf32>
    %428 = vector.shape_cast %427 : vector<1x8x1xf32> to vector<8x1xf32>
    %429 = arith.addf %428, %415 : vector<8x1xf32>
    %430 = arith.negf %429 : vector<8x1xf32>
    %431 = math.exp %430 : vector<8x1xf32>
    %cst_140 = arith.constant 1.000000e+00 : f32
    %432 = vector.broadcast %cst_140 : f32 to vector<8x1xf32>
    %433 = arith.addf %432, %431 : vector<8x1xf32>
    %434 = arith.divf %432, %433 : vector<8x1xf32>
    %435 = vector.extract_strided_slice %403 {offsets = [0, 0, 0], sizes = [1, 8, 16], strides = [1, 1, 1]} : vector<7x8x16xf32> to vector<1x8x16xf32>
    %436 = vector.shape_cast %435 : vector<1x8x16xf32> to vector<8x16xf32>
    %437 = vector.broadcast %434 : vector<8x1xf32> to vector<8x16xf32>
    %438 = arith.mulf %411, %437 : vector<8x16xf32>
    %cst_141 = arith.constant dense<0.000000e+00> : vector<8x16xf32>
    %439 = tpu.matmul %438, %410, %cst_141 {dimension_numbers = #tpu.dot_dimension_numbers<[1], [0], [0], [1], [0, 0, 1, 1], [], []>} : vector<8x16xf32>, vector<16x16xf32>, vector<8x16xf32> -> vector<8x16xf32>
    %440 = arith.addf %436, %439 : vector<8x16xf32>
    %441 = math.tanh %440 : vector<8x16xf32>
    %cst_142 = arith.constant 1.000000e+00 : f32
    %442 = vector.broadcast %cst_142 : f32 to vector<8x1xf32>
    %443 = arith.subf %442, %426 : vector<8x1xf32>
    %444 = vector.broadcast %443 : vector<8x1xf32> to vector<8x16xf32>
    %445 = arith.mulf %444, %411 : vector<8x16xf32>
    %446 = vector.broadcast %426 : vector<8x1xf32> to vector<8x16xf32>
    %447 = arith.mulf %446, %441 : vector<8x16xf32>
    %448 = arith.addf %445, %447 : vector<8x16xf32>
    %449 = vector.broadcast %413 : vector<8x1xf32> to vector<8x16xf32>
    %450 = arith.mulf %449, %448 : vector<8x16xf32>
    %cst_143 = arith.constant 1.000000e+00 : f32
    %451 = vector.broadcast %cst_143 : f32 to vector<8x1xf32>
    %452 = arith.subf %451, %413 : vector<8x1xf32>
    %453 = vector.broadcast %452 : vector<8x1xf32> to vector<8x16xf32>
    %454 = arith.mulf %453, %411 : vector<8x16xf32>
    %455 = arith.addf %450, %454 : vector<8x16xf32>
    %456 = vector.extract_strided_slice %20 {offsets = [1, 0, 0], sizes = [1, 8, 1], strides = [1, 1, 1]} : vector<7x8x1xf32> to vector<1x8x1xf32>
    %457 = vector.shape_cast %456 : vector<1x8x1xf32> to vector<8x1xf32>
    %cst_144 = arith.constant dense<0.000000e+00> : vector<8x1xf32>
    %458 = tpu.matmul %455, %408, %cst_144 {dimension_numbers = #tpu.dot_dimension_numbers<[1], [0], [0], [1], [0, 0, 1, 1], [], []>} : vector<8x16xf32>, vector<16x1xf32>, vector<8x1xf32> -> vector<8x1xf32>
    %cst_145 = arith.constant dense<0.000000e+00> : vector<8x1xf32>
    %459 = tpu.matmul %455, %409, %cst_145 {dimension_numbers = #tpu.dot_dimension_numbers<[1], [0], [0], [1], [0, 0, 1, 1], [], []>} : vector<8x16xf32>, vector<16x1xf32>, vector<8x1xf32> -> vector<8x1xf32>
    %460 = vector.extract_strided_slice %396 {offsets = [1, 0, 0], sizes = [1, 8, 1], strides = [1, 1, 1]} : vector<7x8x1xf32> to vector<1x8x1xf32>
    %461 = vector.shape_cast %460 : vector<1x8x1xf32> to vector<8x1xf32>
    %462 = vector.extract_strided_slice %405 {offsets = [1, 0, 0], sizes = [1, 8, 1], strides = [1, 1, 1]} : vector<7x8x1xf32> to vector<1x8x1xf32>
    %463 = vector.shape_cast %462 : vector<1x8x1xf32> to vector<8x1xf32>
    %464 = arith.addf %463, %458 : vector<8x1xf32>
    %465 = arith.negf %464 : vector<8x1xf32>
    %466 = math.exp %465 : vector<8x1xf32>
    %cst_146 = arith.constant 1.000000e+00 : f32
    %467 = vector.broadcast %cst_146 : f32 to vector<8x1xf32>
    %468 = arith.addf %467, %466 : vector<8x1xf32>
    %469 = arith.divf %467, %468 : vector<8x1xf32>
    %470 = arith.mulf %461, %469 : vector<8x1xf32>
    %471 = vector.extract_strided_slice %407 {offsets = [1, 0, 0], sizes = [1, 8, 1], strides = [1, 1, 1]} : vector<7x8x1xf32> to vector<1x8x1xf32>
    %472 = vector.shape_cast %471 : vector<1x8x1xf32> to vector<8x1xf32>
    %473 = arith.addf %472, %459 : vector<8x1xf32>
    %474 = arith.negf %473 : vector<8x1xf32>
    %475 = math.exp %474 : vector<8x1xf32>
    %cst_147 = arith.constant 1.000000e+00 : f32
    %476 = vector.broadcast %cst_147 : f32 to vector<8x1xf32>
    %477 = arith.addf %476, %475 : vector<8x1xf32>
    %478 = arith.divf %476, %477 : vector<8x1xf32>
    %479 = vector.extract_strided_slice %403 {offsets = [1, 0, 0], sizes = [1, 8, 16], strides = [1, 1, 1]} : vector<7x8x16xf32> to vector<1x8x16xf32>
    %480 = vector.shape_cast %479 : vector<1x8x16xf32> to vector<8x16xf32>
    %481 = vector.broadcast %478 : vector<8x1xf32> to vector<8x16xf32>
    %482 = arith.mulf %455, %481 : vector<8x16xf32>
    %cst_148 = arith.constant dense<0.000000e+00> : vector<8x16xf32>
    %483 = tpu.matmul %482, %410, %cst_148 {dimension_numbers = #tpu.dot_dimension_numbers<[1], [0], [0], [1], [0, 0, 1, 1], [], []>} : vector<8x16xf32>, vector<16x16xf32>, vector<8x16xf32> -> vector<8x16xf32>
    %484 = arith.addf %480, %483 : vector<8x16xf32>
    %485 = math.tanh %484 : vector<8x16xf32>
    %cst_149 = arith.constant 1.000000e+00 : f32
    %486 = vector.broadcast %cst_149 : f32 to vector<8x1xf32>
    %487 = arith.subf %486, %470 : vector<8x1xf32>
    %488 = vector.broadcast %487 : vector<8x1xf32> to vector<8x16xf32>
    %489 = arith.mulf %488, %455 : vector<8x16xf32>
    %490 = vector.broadcast %470 : vector<8x1xf32> to vector<8x16xf32>
    %491 = arith.mulf %490, %485 : vector<8x16xf32>
    %492 = arith.addf %489, %491 : vector<8x16xf32>
    %493 = vector.broadcast %457 : vector<8x1xf32> to vector<8x16xf32>
    %494 = arith.mulf %493, %492 : vector<8x16xf32>
    %cst_150 = arith.constant 1.000000e+00 : f32
    %495 = vector.broadcast %cst_150 : f32 to vector<8x1xf32>
    %496 = arith.subf %495, %457 : vector<8x1xf32>
    %497 = vector.broadcast %496 : vector<8x1xf32> to vector<8x16xf32>
    %498 = arith.mulf %497, %455 : vector<8x16xf32>
    %499 = arith.addf %494, %498 : vector<8x16xf32>
    %500 = vector.extract_strided_slice %20 {offsets = [2, 0, 0], sizes = [1, 8, 1], strides = [1, 1, 1]} : vector<7x8x1xf32> to vector<1x8x1xf32>
    %501 = vector.shape_cast %500 : vector<1x8x1xf32> to vector<8x1xf32>
    %cst_151 = arith.constant dense<0.000000e+00> : vector<8x1xf32>
    %502 = tpu.matmul %499, %408, %cst_151 {dimension_numbers = #tpu.dot_dimension_numbers<[1], [0], [0], [1], [0, 0, 1, 1], [], []>} : vector<8x16xf32>, vector<16x1xf32>, vector<8x1xf32> -> vector<8x1xf32>
    %cst_152 = arith.constant dense<0.000000e+00> : vector<8x1xf32>
    %503 = tpu.matmul %499, %409, %cst_152 {dimension_numbers = #tpu.dot_dimension_numbers<[1], [0], [0], [1], [0, 0, 1, 1], [], []>} : vector<8x16xf32>, vector<16x1xf32>, vector<8x1xf32> -> vector<8x1xf32>
    %504 = vector.extract_strided_slice %396 {offsets = [2, 0, 0], sizes = [1, 8, 1], strides = [1, 1, 1]} : vector<7x8x1xf32> to vector<1x8x1xf32>
    %505 = vector.shape_cast %504 : vector<1x8x1xf32> to vector<8x1xf32>
    %506 = vector.extract_strided_slice %405 {offsets = [2, 0, 0], sizes = [1, 8, 1], strides = [1, 1, 1]} : vector<7x8x1xf32> to vector<1x8x1xf32>
    %507 = vector.shape_cast %506 : vector<1x8x1xf32> to vector<8x1xf32>
    %508 = arith.addf %507, %502 : vector<8x1xf32>
    %509 = arith.negf %508 : vector<8x1xf32>
    %510 = math.exp %509 : vector<8x1xf32>
    %cst_153 = arith.constant 1.000000e+00 : f32
    %511 = vector.broadcast %cst_153 : f32 to vector<8x1xf32>
    %512 = arith.addf %511, %510 : vector<8x1xf32>
    %513 = arith.divf %511, %512 : vector<8x1xf32>
    %514 = arith.mulf %505, %513 : vector<8x1xf32>
    %515 = vector.extract_strided_slice %407 {offsets = [2, 0, 0], sizes = [1, 8, 1], strides = [1, 1, 1]} : vector<7x8x1xf32> to vector<1x8x1xf32>
    %516 = vector.shape_cast %515 : vector<1x8x1xf32> to vector<8x1xf32>
    %517 = arith.addf %516, %503 : vector<8x1xf32>
    %518 = arith.negf %517 : vector<8x1xf32>
    %519 = math.exp %518 : vector<8x1xf32>
    %cst_154 = arith.constant 1.000000e+00 : f32
    %520 = vector.broadcast %cst_154 : f32 to vector<8x1xf32>
    %521 = arith.addf %520, %519 : vector<8x1xf32>
    %522 = arith.divf %520, %521 : vector<8x1xf32>
    %523 = vector.extract_strided_slice %403 {offsets = [2, 0, 0], sizes = [1, 8, 16], strides = [1, 1, 1]} : vector<7x8x16xf32> to vector<1x8x16xf32>
    %524 = vector.shape_cast %523 : vector<1x8x16xf32> to vector<8x16xf32>
    %525 = vector.broadcast %522 : vector<8x1xf32> to vector<8x16xf32>
    %526 = arith.mulf %499, %525 : vector<8x16xf32>
    %cst_155 = arith.constant dense<0.000000e+00> : vector<8x16xf32>
    %527 = tpu.matmul %526, %410, %cst_155 {dimension_numbers = #tpu.dot_dimension_numbers<[1], [0], [0], [1], [0, 0, 1, 1], [], []>} : vector<8x16xf32>, vector<16x16xf32>, vector<8x16xf32> -> vector<8x16xf32>
    %528 = arith.addf %524, %527 : vector<8x16xf32>
    %529 = math.tanh %528 : vector<8x16xf32>
    %cst_156 = arith.constant 1.000000e+00 : f32
    %530 = vector.broadcast %cst_156 : f32 to vector<8x1xf32>
    %531 = arith.subf %530, %514 : vector<8x1xf32>
    %532 = vector.broadcast %531 : vector<8x1xf32> to vector<8x16xf32>
    %533 = arith.mulf %532, %499 : vector<8x16xf32>
    %534 = vector.broadcast %514 : vector<8x1xf32> to vector<8x16xf32>
    %535 = arith.mulf %534, %529 : vector<8x16xf32>
    %536 = arith.addf %533, %535 : vector<8x16xf32>
    %537 = vector.broadcast %501 : vector<8x1xf32> to vector<8x16xf32>
    %538 = arith.mulf %537, %536 : vector<8x16xf32>
    %cst_157 = arith.constant 1.000000e+00 : f32
    %539 = vector.broadcast %cst_157 : f32 to vector<8x1xf32>
    %540 = arith.subf %539, %501 : vector<8x1xf32>
    %541 = vector.broadcast %540 : vector<8x1xf32> to vector<8x16xf32>
    %542 = arith.mulf %541, %499 : vector<8x16xf32>
    %543 = arith.addf %538, %542 : vector<8x16xf32>
    %544 = vector.extract_strided_slice %20 {offsets = [3, 0, 0], sizes = [1, 8, 1], strides = [1, 1, 1]} : vector<7x8x1xf32> to vector<1x8x1xf32>
    %545 = vector.shape_cast %544 : vector<1x8x1xf32> to vector<8x1xf32>
    %cst_158 = arith.constant dense<0.000000e+00> : vector<8x1xf32>
    %546 = tpu.matmul %543, %408, %cst_158 {dimension_numbers = #tpu.dot_dimension_numbers<[1], [0], [0], [1], [0, 0, 1, 1], [], []>} : vector<8x16xf32>, vector<16x1xf32>, vector<8x1xf32> -> vector<8x1xf32>
    %cst_159 = arith.constant dense<0.000000e+00> : vector<8x1xf32>
    %547 = tpu.matmul %543, %409, %cst_159 {dimension_numbers = #tpu.dot_dimension_numbers<[1], [0], [0], [1], [0, 0, 1, 1], [], []>} : vector<8x16xf32>, vector<16x1xf32>, vector<8x1xf32> -> vector<8x1xf32>
    %548 = vector.extract_strided_slice %396 {offsets = [3, 0, 0], sizes = [1, 8, 1], strides = [1, 1, 1]} : vector<7x8x1xf32> to vector<1x8x1xf32>
    %549 = vector.shape_cast %548 : vector<1x8x1xf32> to vector<8x1xf32>
    %550 = vector.extract_strided_slice %405 {offsets = [3, 0, 0], sizes = [1, 8, 1], strides = [1, 1, 1]} : vector<7x8x1xf32> to vector<1x8x1xf32>
    %551 = vector.shape_cast %550 : vector<1x8x1xf32> to vector<8x1xf32>
    %552 = arith.addf %551, %546 : vector<8x1xf32>
    %553 = arith.negf %552 : vector<8x1xf32>
    %554 = math.exp %553 : vector<8x1xf32>
    %cst_160 = arith.constant 1.000000e+00 : f32
    %555 = vector.broadcast %cst_160 : f32 to vector<8x1xf32>
    %556 = arith.addf %555, %554 : vector<8x1xf32>
    %557 = arith.divf %555, %556 : vector<8x1xf32>
    %558 = arith.mulf %549, %557 : vector<8x1xf32>
    %559 = vector.extract_strided_slice %407 {offsets = [3, 0, 0], sizes = [1, 8, 1], strides = [1, 1, 1]} : vector<7x8x1xf32> to vector<1x8x1xf32>
    %560 = vector.shape_cast %559 : vector<1x8x1xf32> to vector<8x1xf32>
    %561 = arith.addf %560, %547 : vector<8x1xf32>
    %562 = arith.negf %561 : vector<8x1xf32>
    %563 = math.exp %562 : vector<8x1xf32>
    %cst_161 = arith.constant 1.000000e+00 : f32
    %564 = vector.broadcast %cst_161 : f32 to vector<8x1xf32>
    %565 = arith.addf %564, %563 : vector<8x1xf32>
    %566 = arith.divf %564, %565 : vector<8x1xf32>
    %567 = vector.extract_strided_slice %403 {offsets = [3, 0, 0], sizes = [1, 8, 16], strides = [1, 1, 1]} : vector<7x8x16xf32> to vector<1x8x16xf32>
    %568 = vector.shape_cast %567 : vector<1x8x16xf32> to vector<8x16xf32>
    %569 = vector.broadcast %566 : vector<8x1xf32> to vector<8x16xf32>
    %570 = arith.mulf %543, %569 : vector<8x16xf32>
    %cst_162 = arith.constant dense<0.000000e+00> : vector<8x16xf32>
    %571 = tpu.matmul %570, %410, %cst_162 {dimension_numbers = #tpu.dot_dimension_numbers<[1], [0], [0], [1], [0, 0, 1, 1], [], []>} : vector<8x16xf32>, vector<16x16xf32>, vector<8x16xf32> -> vector<8x16xf32>
    %572 = arith.addf %568, %571 : vector<8x16xf32>
    %573 = math.tanh %572 : vector<8x16xf32>
    %cst_163 = arith.constant 1.000000e+00 : f32
    %574 = vector.broadcast %cst_163 : f32 to vector<8x1xf32>
    %575 = arith.subf %574, %558 : vector<8x1xf32>
    %576 = vector.broadcast %575 : vector<8x1xf32> to vector<8x16xf32>
    %577 = arith.mulf %576, %543 : vector<8x16xf32>
    %578 = vector.broadcast %558 : vector<8x1xf32> to vector<8x16xf32>
    %579 = arith.mulf %578, %573 : vector<8x16xf32>
    %580 = arith.addf %577, %579 : vector<8x16xf32>
    %581 = vector.broadcast %545 : vector<8x1xf32> to vector<8x16xf32>
    %582 = arith.mulf %581, %580 : vector<8x16xf32>
    %cst_164 = arith.constant 1.000000e+00 : f32
    %583 = vector.broadcast %cst_164 : f32 to vector<8x1xf32>
    %584 = arith.subf %583, %545 : vector<8x1xf32>
    %585 = vector.broadcast %584 : vector<8x1xf32> to vector<8x16xf32>
    %586 = arith.mulf %585, %543 : vector<8x16xf32>
    %587 = arith.addf %582, %586 : vector<8x16xf32>
    %588 = vector.extract_strided_slice %20 {offsets = [4, 0, 0], sizes = [1, 8, 1], strides = [1, 1, 1]} : vector<7x8x1xf32> to vector<1x8x1xf32>
    %589 = vector.shape_cast %588 : vector<1x8x1xf32> to vector<8x1xf32>
    %cst_165 = arith.constant dense<0.000000e+00> : vector<8x1xf32>
    %590 = tpu.matmul %587, %408, %cst_165 {dimension_numbers = #tpu.dot_dimension_numbers<[1], [0], [0], [1], [0, 0, 1, 1], [], []>} : vector<8x16xf32>, vector<16x1xf32>, vector<8x1xf32> -> vector<8x1xf32>
    %cst_166 = arith.constant dense<0.000000e+00> : vector<8x1xf32>
    %591 = tpu.matmul %587, %409, %cst_166 {dimension_numbers = #tpu.dot_dimension_numbers<[1], [0], [0], [1], [0, 0, 1, 1], [], []>} : vector<8x16xf32>, vector<16x1xf32>, vector<8x1xf32> -> vector<8x1xf32>
    %592 = vector.extract_strided_slice %396 {offsets = [4, 0, 0], sizes = [1, 8, 1], strides = [1, 1, 1]} : vector<7x8x1xf32> to vector<1x8x1xf32>
    %593 = vector.shape_cast %592 : vector<1x8x1xf32> to vector<8x1xf32>
    %594 = vector.extract_strided_slice %405 {offsets = [4, 0, 0], sizes = [1, 8, 1], strides = [1, 1, 1]} : vector<7x8x1xf32> to vector<1x8x1xf32>
    %595 = vector.shape_cast %594 : vector<1x8x1xf32> to vector<8x1xf32>
    %596 = arith.addf %595, %590 : vector<8x1xf32>
    %597 = arith.negf %596 : vector<8x1xf32>
    %598 = math.exp %597 : vector<8x1xf32>
    %cst_167 = arith.constant 1.000000e+00 : f32
    %599 = vector.broadcast %cst_167 : f32 to vector<8x1xf32>
    %600 = arith.addf %599, %598 : vector<8x1xf32>
    %601 = arith.divf %599, %600 : vector<8x1xf32>
    %602 = arith.mulf %593, %601 : vector<8x1xf32>
    %603 = vector.extract_strided_slice %407 {offsets = [4, 0, 0], sizes = [1, 8, 1], strides = [1, 1, 1]} : vector<7x8x1xf32> to vector<1x8x1xf32>
    %604 = vector.shape_cast %603 : vector<1x8x1xf32> to vector<8x1xf32>
    %605 = arith.addf %604, %591 : vector<8x1xf32>
    %606 = arith.negf %605 : vector<8x1xf32>
    %607 = math.exp %606 : vector<8x1xf32>
    %cst_168 = arith.constant 1.000000e+00 : f32
    %608 = vector.broadcast %cst_168 : f32 to vector<8x1xf32>
    %609 = arith.addf %608, %607 : vector<8x1xf32>
    %610 = arith.divf %608, %609 : vector<8x1xf32>
    %611 = vector.extract_strided_slice %403 {offsets = [4, 0, 0], sizes = [1, 8, 16], strides = [1, 1, 1]} : vector<7x8x16xf32> to vector<1x8x16xf32>
    %612 = vector.shape_cast %611 : vector<1x8x16xf32> to vector<8x16xf32>
    %613 = vector.broadcast %610 : vector<8x1xf32> to vector<8x16xf32>
    %614 = arith.mulf %587, %613 : vector<8x16xf32>
    %cst_169 = arith.constant dense<0.000000e+00> : vector<8x16xf32>
    %615 = tpu.matmul %614, %410, %cst_169 {dimension_numbers = #tpu.dot_dimension_numbers<[1], [0], [0], [1], [0, 0, 1, 1], [], []>} : vector<8x16xf32>, vector<16x16xf32>, vector<8x16xf32> -> vector<8x16xf32>
    %616 = arith.addf %612, %615 : vector<8x16xf32>
    %617 = math.tanh %616 : vector<8x16xf32>
    %cst_170 = arith.constant 1.000000e+00 : f32
    %618 = vector.broadcast %cst_170 : f32 to vector<8x1xf32>
    %619 = arith.subf %618, %602 : vector<8x1xf32>
    %620 = vector.broadcast %619 : vector<8x1xf32> to vector<8x16xf32>
    %621 = arith.mulf %620, %587 : vector<8x16xf32>
    %622 = vector.broadcast %602 : vector<8x1xf32> to vector<8x16xf32>
    %623 = arith.mulf %622, %617 : vector<8x16xf32>
    %624 = arith.addf %621, %623 : vector<8x16xf32>
    %625 = vector.broadcast %589 : vector<8x1xf32> to vector<8x16xf32>
    %626 = arith.mulf %625, %624 : vector<8x16xf32>
    %cst_171 = arith.constant 1.000000e+00 : f32
    %627 = vector.broadcast %cst_171 : f32 to vector<8x1xf32>
    %628 = arith.subf %627, %589 : vector<8x1xf32>
    %629 = vector.broadcast %628 : vector<8x1xf32> to vector<8x16xf32>
    %630 = arith.mulf %629, %587 : vector<8x16xf32>
    %631 = arith.addf %626, %630 : vector<8x16xf32>
    %632 = vector.extract_strided_slice %20 {offsets = [5, 0, 0], sizes = [1, 8, 1], strides = [1, 1, 1]} : vector<7x8x1xf32> to vector<1x8x1xf32>
    %633 = vector.shape_cast %632 : vector<1x8x1xf32> to vector<8x1xf32>
    %cst_172 = arith.constant dense<0.000000e+00> : vector<8x1xf32>
    %634 = tpu.matmul %631, %408, %cst_172 {dimension_numbers = #tpu.dot_dimension_numbers<[1], [0], [0], [1], [0, 0, 1, 1], [], []>} : vector<8x16xf32>, vector<16x1xf32>, vector<8x1xf32> -> vector<8x1xf32>
    %cst_173 = arith.constant dense<0.000000e+00> : vector<8x1xf32>
    %635 = tpu.matmul %631, %409, %cst_173 {dimension_numbers = #tpu.dot_dimension_numbers<[1], [0], [0], [1], [0, 0, 1, 1], [], []>} : vector<8x16xf32>, vector<16x1xf32>, vector<8x1xf32> -> vector<8x1xf32>
    %636 = vector.extract_strided_slice %396 {offsets = [5, 0, 0], sizes = [1, 8, 1], strides = [1, 1, 1]} : vector<7x8x1xf32> to vector<1x8x1xf32>
    %637 = vector.shape_cast %636 : vector<1x8x1xf32> to vector<8x1xf32>
    %638 = vector.extract_strided_slice %405 {offsets = [5, 0, 0], sizes = [1, 8, 1], strides = [1, 1, 1]} : vector<7x8x1xf32> to vector<1x8x1xf32>
    %639 = vector.shape_cast %638 : vector<1x8x1xf32> to vector<8x1xf32>
    %640 = arith.addf %639, %634 : vector<8x1xf32>
    %641 = arith.negf %640 : vector<8x1xf32>
    %642 = math.exp %641 : vector<8x1xf32>
    %cst_174 = arith.constant 1.000000e+00 : f32
    %643 = vector.broadcast %cst_174 : f32 to vector<8x1xf32>
    %644 = arith.addf %643, %642 : vector<8x1xf32>
    %645 = arith.divf %643, %644 : vector<8x1xf32>
    %646 = arith.mulf %637, %645 : vector<8x1xf32>
    %647 = vector.extract_strided_slice %407 {offsets = [5, 0, 0], sizes = [1, 8, 1], strides = [1, 1, 1]} : vector<7x8x1xf32> to vector<1x8x1xf32>
    %648 = vector.shape_cast %647 : vector<1x8x1xf32> to vector<8x1xf32>
    %649 = arith.addf %648, %635 : vector<8x1xf32>
    %650 = arith.negf %649 : vector<8x1xf32>
    %651 = math.exp %650 : vector<8x1xf32>
    %cst_175 = arith.constant 1.000000e+00 : f32
    %652 = vector.broadcast %cst_175 : f32 to vector<8x1xf32>
    %653 = arith.addf %652, %651 : vector<8x1xf32>
    %654 = arith.divf %652, %653 : vector<8x1xf32>
    %655 = vector.extract_strided_slice %403 {offsets = [5, 0, 0], sizes = [1, 8, 16], strides = [1, 1, 1]} : vector<7x8x16xf32> to vector<1x8x16xf32>
    %656 = vector.shape_cast %655 : vector<1x8x16xf32> to vector<8x16xf32>
    %657 = vector.broadcast %654 : vector<8x1xf32> to vector<8x16xf32>
    %658 = arith.mulf %631, %657 : vector<8x16xf32>
    %cst_176 = arith.constant dense<0.000000e+00> : vector<8x16xf32>
    %659 = tpu.matmul %658, %410, %cst_176 {dimension_numbers = #tpu.dot_dimension_numbers<[1], [0], [0], [1], [0, 0, 1, 1], [], []>} : vector<8x16xf32>, vector<16x16xf32>, vector<8x16xf32> -> vector<8x16xf32>
    %660 = arith.addf %656, %659 : vector<8x16xf32>
    %661 = math.tanh %660 : vector<8x16xf32>
    %cst_177 = arith.constant 1.000000e+00 : f32
    %662 = vector.broadcast %cst_177 : f32 to vector<8x1xf32>
    %663 = arith.subf %662, %646 : vector<8x1xf32>
    %664 = vector.broadcast %663 : vector<8x1xf32> to vector<8x16xf32>
    %665 = arith.mulf %664, %631 : vector<8x16xf32>
    %666 = vector.broadcast %646 : vector<8x1xf32> to vector<8x16xf32>
    %667 = arith.mulf %666, %661 : vector<8x16xf32>
    %668 = arith.addf %665, %667 : vector<8x16xf32>
    %669 = vector.broadcast %633 : vector<8x1xf32> to vector<8x16xf32>
    %670 = arith.mulf %669, %668 : vector<8x16xf32>
    %cst_178 = arith.constant 1.000000e+00 : f32
    %671 = vector.broadcast %cst_178 : f32 to vector<8x1xf32>
    %672 = arith.subf %671, %633 : vector<8x1xf32>
    %673 = vector.broadcast %672 : vector<8x1xf32> to vector<8x16xf32>
    %674 = arith.mulf %673, %631 : vector<8x16xf32>
    %675 = arith.addf %670, %674 : vector<8x16xf32>
    %676 = vector.extract_strided_slice %20 {offsets = [6, 0, 0], sizes = [1, 8, 1], strides = [1, 1, 1]} : vector<7x8x1xf32> to vector<1x8x1xf32>
    %677 = vector.shape_cast %676 : vector<1x8x1xf32> to vector<8x1xf32>
    %cst_179 = arith.constant dense<0.000000e+00> : vector<8x1xf32>
    %678 = tpu.matmul %675, %408, %cst_179 {dimension_numbers = #tpu.dot_dimension_numbers<[1], [0], [0], [1], [0, 0, 1, 1], [], []>} : vector<8x16xf32>, vector<16x1xf32>, vector<8x1xf32> -> vector<8x1xf32>
    %cst_180 = arith.constant dense<0.000000e+00> : vector<8x1xf32>
    %679 = tpu.matmul %675, %409, %cst_180 {dimension_numbers = #tpu.dot_dimension_numbers<[1], [0], [0], [1], [0, 0, 1, 1], [], []>} : vector<8x16xf32>, vector<16x1xf32>, vector<8x1xf32> -> vector<8x1xf32>
    %680 = vector.extract_strided_slice %396 {offsets = [6, 0, 0], sizes = [1, 8, 1], strides = [1, 1, 1]} : vector<7x8x1xf32> to vector<1x8x1xf32>
    %681 = vector.shape_cast %680 : vector<1x8x1xf32> to vector<8x1xf32>
    %682 = vector.extract_strided_slice %405 {offsets = [6, 0, 0], sizes = [1, 8, 1], strides = [1, 1, 1]} : vector<7x8x1xf32> to vector<1x8x1xf32>
    %683 = vector.shape_cast %682 : vector<1x8x1xf32> to vector<8x1xf32>
    %684 = arith.addf %683, %678 : vector<8x1xf32>
    %685 = arith.negf %684 : vector<8x1xf32>
    %686 = math.exp %685 : vector<8x1xf32>
    %cst_181 = arith.constant 1.000000e+00 : f32
    %687 = vector.broadcast %cst_181 : f32 to vector<8x1xf32>
    %688 = arith.addf %687, %686 : vector<8x1xf32>
    %689 = arith.divf %687, %688 : vector<8x1xf32>
    %690 = arith.mulf %681, %689 : vector<8x1xf32>
    %691 = vector.extract_strided_slice %407 {offsets = [6, 0, 0], sizes = [1, 8, 1], strides = [1, 1, 1]} : vector<7x8x1xf32> to vector<1x8x1xf32>
    %692 = vector.shape_cast %691 : vector<1x8x1xf32> to vector<8x1xf32>
    %693 = arith.addf %692, %679 : vector<8x1xf32>
    %694 = arith.negf %693 : vector<8x1xf32>
    %695 = math.exp %694 : vector<8x1xf32>
    %cst_182 = arith.constant 1.000000e+00 : f32
    %696 = vector.broadcast %cst_182 : f32 to vector<8x1xf32>
    %697 = arith.addf %696, %695 : vector<8x1xf32>
    %698 = arith.divf %696, %697 : vector<8x1xf32>
    %699 = vector.extract_strided_slice %403 {offsets = [6, 0, 0], sizes = [1, 8, 16], strides = [1, 1, 1]} : vector<7x8x16xf32> to vector<1x8x16xf32>
    %700 = vector.shape_cast %699 : vector<1x8x16xf32> to vector<8x16xf32>
    %701 = vector.broadcast %698 : vector<8x1xf32> to vector<8x16xf32>
    %702 = arith.mulf %675, %701 : vector<8x16xf32>
    %cst_183 = arith.constant dense<0.000000e+00> : vector<8x16xf32>
    %703 = tpu.matmul %702, %410, %cst_183 {dimension_numbers = #tpu.dot_dimension_numbers<[1], [0], [0], [1], [0, 0, 1, 1], [], []>} : vector<8x16xf32>, vector<16x16xf32>, vector<8x16xf32> -> vector<8x16xf32>
    %704 = arith.addf %700, %703 : vector<8x16xf32>
    %705 = math.tanh %704 : vector<8x16xf32>
    %cst_184 = arith.constant 1.000000e+00 : f32
    %706 = vector.broadcast %cst_184 : f32 to vector<8x1xf32>
    %707 = arith.subf %706, %690 : vector<8x1xf32>
    %708 = vector.broadcast %707 : vector<8x1xf32> to vector<8x16xf32>
    %709 = arith.mulf %708, %675 : vector<8x16xf32>
    %710 = vector.broadcast %690 : vector<8x1xf32> to vector<8x16xf32>
    %711 = arith.mulf %710, %705 : vector<8x16xf32>
    %712 = arith.addf %709, %711 : vector<8x16xf32>
    %713 = vector.broadcast %677 : vector<8x1xf32> to vector<8x16xf32>
    %714 = arith.mulf %713, %712 : vector<8x16xf32>
    %cst_185 = arith.constant 1.000000e+00 : f32
    %715 = vector.broadcast %cst_185 : f32 to vector<8x1xf32>
    %716 = arith.subf %715, %677 : vector<8x1xf32>
    %717 = vector.broadcast %716 : vector<8x1xf32> to vector<8x16xf32>
    %718 = arith.mulf %717, %675 : vector<8x16xf32>
    %719 = arith.addf %714, %718 : vector<8x16xf32>
    %c0_186 = arith.constant 0 : index
    %c0_187 = arith.constant 0 : index
    %720 = vector.load %arg2[%c0_186, %c0_187] : memref<8x1xf32, #tpu.memory_space<vmem>>, vector<8x1xf32>
    %c0_188 = arith.constant 0 : index
    %c0_189 = arith.constant 0 : index
    %721 = vector.load %arg22[%c0_188, %c0_189] : memref<16x32xf32, #tpu.memory_space<vmem>>, vector<16x32xf32>
    %cst_190 = arith.constant dense<0.000000e+00> : vector<8x32xf32>
    %722 = tpu.matmul %719, %721, %cst_190 {dimension_numbers = #tpu.dot_dimension_numbers<[1], [0], [0], [1], [0, 0, 1, 1], [], []>} : vector<8x16xf32>, vector<16x32xf32>, vector<8x32xf32> -> vector<8x32xf32>
    %c0_191 = arith.constant 0 : index
    %c0_192 = arith.constant 0 : index
    %723 = vector.load %arg23[%c0_191, %c0_192] : memref<16x32xf32, #tpu.memory_space<vmem>>, vector<16x32xf32>
    %cst_193 = arith.constant dense<0.000000e+00> : vector<8x32xf32>
    %724 = tpu.matmul %316, %723, %cst_193 {dimension_numbers = #tpu.dot_dimension_numbers<[1], [0], [0], [1], [0, 0, 1, 1], [], []>} : vector<8x16xf32>, vector<16x32xf32>, vector<8x32xf32> -> vector<8x32xf32>
    %725 = arith.addf %722, %724 : vector<8x32xf32>
    %c0_194 = arith.constant 0 : index
    %c0_195 = arith.constant 0 : index
    %726 = vector.load %arg24[%c0_194, %c0_195] : memref<1x32xf32, #tpu.memory_space<vmem>>, vector<1x32xf32>
    %727 = vector.broadcast %726 : vector<1x32xf32> to vector<8x32xf32>
    %728 = arith.addf %725, %727 : vector<8x32xf32>
    %c0_196 = arith.constant 0 : index
    %c0_197 = arith.constant 0 : index
    %729 = vector.load %arg25[%c0_196, %c0_197] : memref<1x32xf32, #tpu.memory_space<vmem>>, vector<1x32xf32>
    %730 = vector.broadcast %720 : vector<8x1xf32> to vector<8x32xf32>
    %731 = arith.mulf %728, %730 : vector<8x32xf32>
    %cst_198 = arith.constant dense<0.000000e+00> : vector<32xf32>
    %732 = vector.multi_reduction <add>, %731, %cst_198 [0] : vector<8x32xf32> to vector<32xf32>
    %733 = vector.shape_cast %732 : vector<32xf32> to vector<1x32xf32>
    %cst_199 = arith.constant 4.000000e+00 : f32
    %734 = vector.broadcast %cst_199 : f32 to vector<1x32xf32>
    %735 = arith.divf %733, %734 : vector<1x32xf32>
    %736 = vector.broadcast %735 : vector<1x32xf32> to vector<8x32xf32>
    %737 = arith.subf %728, %736 : vector<8x32xf32>
    %738 = vector.broadcast %720 : vector<8x1xf32> to vector<8x32xf32>
    %739 = arith.mulf %737, %738 : vector<8x32xf32>
    %740 = arith.mulf %739, %739 : vector<8x32xf32>
    %cst_200 = arith.constant dense<0.000000e+00> : vector<32xf32>
    %741 = vector.multi_reduction <add>, %740, %cst_200 [0] : vector<8x32xf32> to vector<32xf32>
    %742 = vector.shape_cast %741 : vector<32xf32> to vector<1x32xf32>
    %cst_201 = arith.constant 3.000000e+00 : f32
    %743 = vector.broadcast %cst_201 : f32 to vector<1x32xf32>
    %744 = arith.divf %742, %743 : vector<1x32xf32>
    %745 = vector.broadcast %735 : vector<1x32xf32> to vector<8x32xf32>
    %746 = arith.subf %728, %745 : vector<8x32xf32>
    %cst_202 = arith.constant 9.99999993E-9 : f32
    %747 = vector.broadcast %cst_202 : f32 to vector<1x32xf32>
    %748 = arith.addf %744, %747 : vector<1x32xf32>
    %749 = math.rsqrt %748 : vector<1x32xf32>
    %750 = vector.broadcast %749 : vector<1x32xf32> to vector<8x32xf32>
    %751 = arith.mulf %746, %750 : vector<8x32xf32>
    %752 = arith.negf %751 : vector<8x32xf32>
    %753 = math.exp %752 : vector<8x32xf32>
    %cst_203 = arith.constant 1.000000e+00 : f32
    %754 = vector.broadcast %cst_203 : f32 to vector<8x32xf32>
    %755 = arith.addf %754, %753 : vector<8x32xf32>
    %756 = arith.divf %754, %755 : vector<8x32xf32>
    %cst_204 = arith.constant 1.000000e+00 : f32
    %757 = vector.broadcast %cst_204 : f32 to vector<1x32xf32>
    %758 = arith.subf %757, %729 : vector<1x32xf32>
    %759 = vector.broadcast %758 : vector<1x32xf32> to vector<8x32xf32>
    %760 = arith.mulf %756, %759 : vector<8x32xf32>
    %761 = vector.broadcast %729 : vector<1x32xf32> to vector<8x32xf32>
    %762 = arith.addf %761, %760 : vector<8x32xf32>
    %763 = arith.mulf %728, %762 : vector<8x32xf32>
    %c0_205 = arith.constant 0 : index
    %c0_206 = arith.constant 0 : index
    %764 = vector.load %arg26[%c0_205, %c0_206] : memref<32x16xf32, #tpu.memory_space<vmem>>, vector<32x16xf32>
    %cst_207 = arith.constant dense<0.000000e+00> : vector<8x16xf32>
    %765 = tpu.matmul %763, %764, %cst_207 {dimension_numbers = #tpu.dot_dimension_numbers<[1], [0], [0], [1], [0, 0, 1, 1], [], []>} : vector<8x32xf32>, vector<32x16xf32>, vector<8x16xf32> -> vector<8x16xf32>
    %c0_208 = arith.constant 0 : index
    %c0_209 = arith.constant 0 : index
    %766 = vector.load %arg27[%c0_208, %c0_209] : memref<1x16xf32, #tpu.memory_space<vmem>>, vector<1x16xf32>
    %767 = vector.broadcast %766 : vector<1x16xf32> to vector<8x16xf32>
    %768 = arith.addf %765, %767 : vector<8x16xf32>
    %c0_210 = arith.constant 0 : index
    %c0_211 = arith.constant 0 : index
    %769 = vector.load %arg28[%c0_210, %c0_211] : memref<1x16xf32, #tpu.memory_space<vmem>>, vector<1x16xf32>
    %770 = vector.broadcast %720 : vector<8x1xf32> to vector<8x16xf32>
    %771 = arith.mulf %768, %770 : vector<8x16xf32>
    %cst_212 = arith.constant dense<0.000000e+00> : vector<16xf32>
    %772 = vector.multi_reduction <add>, %771, %cst_212 [0] : vector<8x16xf32> to vector<16xf32>
    %773 = vector.shape_cast %772 : vector<16xf32> to vector<1x16xf32>
    %cst_213 = arith.constant 4.000000e+00 : f32
    %774 = vector.broadcast %cst_213 : f32 to vector<1x16xf32>
    %775 = arith.divf %773, %774 : vector<1x16xf32>
    %776 = vector.broadcast %775 : vector<1x16xf32> to vector<8x16xf32>
    %777 = arith.subf %768, %776 : vector<8x16xf32>
    %778 = vector.broadcast %720 : vector<8x1xf32> to vector<8x16xf32>
    %779 = arith.mulf %777, %778 : vector<8x16xf32>
    %780 = arith.mulf %779, %779 : vector<8x16xf32>
    %cst_214 = arith.constant dense<0.000000e+00> : vector<16xf32>
    %781 = vector.multi_reduction <add>, %780, %cst_214 [0] : vector<8x16xf32> to vector<16xf32>
    %782 = vector.shape_cast %781 : vector<16xf32> to vector<1x16xf32>
    %cst_215 = arith.constant 3.000000e+00 : f32
    %783 = vector.broadcast %cst_215 : f32 to vector<1x16xf32>
    %784 = arith.divf %782, %783 : vector<1x16xf32>
    %785 = vector.broadcast %775 : vector<1x16xf32> to vector<8x16xf32>
    %786 = arith.subf %768, %785 : vector<8x16xf32>
    %cst_216 = arith.constant 9.99999993E-9 : f32
    %787 = vector.broadcast %cst_216 : f32 to vector<1x16xf32>
    %788 = arith.addf %784, %787 : vector<1x16xf32>
    %789 = math.rsqrt %788 : vector<1x16xf32>
    %790 = vector.broadcast %789 : vector<1x16xf32> to vector<8x16xf32>
    %791 = arith.mulf %786, %790 : vector<8x16xf32>
    %792 = arith.negf %791 : vector<8x16xf32>
    %793 = math.exp %792 : vector<8x16xf32>
    %cst_217 = arith.constant 1.000000e+00 : f32
    %794 = vector.broadcast %cst_217 : f32 to vector<8x16xf32>
    %795 = arith.addf %794, %793 : vector<8x16xf32>
    %796 = arith.divf %794, %795 : vector<8x16xf32>
    %cst_218 = arith.constant 1.000000e+00 : f32
    %797 = vector.broadcast %cst_218 : f32 to vector<1x16xf32>
    %798 = arith.subf %797, %769 : vector<1x16xf32>
    %799 = vector.broadcast %798 : vector<1x16xf32> to vector<8x16xf32>
    %800 = arith.mulf %796, %799 : vector<8x16xf32>
    %801 = vector.broadcast %769 : vector<1x16xf32> to vector<8x16xf32>
    %802 = arith.addf %801, %800 : vector<8x16xf32>
    %803 = arith.mulf %768, %802 : vector<8x16xf32>
    %c0_219 = arith.constant 0 : index
    %c0_220 = arith.constant 0 : index
    %804 = vector.load %arg29[%c0_219, %c0_220] : memref<16x1xf32, #tpu.memory_space<vmem>>, vector<16x1xf32>
    %cst_221 = arith.constant dense<0.000000e+00> : vector<8x1xf32>
    %805 = tpu.matmul %803, %804, %cst_221 {dimension_numbers = #tpu.dot_dimension_numbers<[1], [0], [0], [1], [0, 0, 1, 1], [], []>} : vector<8x16xf32>, vector<16x1xf32>, vector<8x1xf32> -> vector<8x1xf32>
    %c0_222 = arith.constant 0 : index
    %c0_223 = arith.constant 0 : index
    %806 = vector.load %arg30[%c0_222, %c0_223] : memref<1x1xf32, #tpu.memory_space<vmem>>, vector<1x1xf32>
    %807 = vector.broadcast %806 : vector<1x1xf32> to vector<8x1xf32>
    %808 = arith.addf %805, %807 : vector<8x1xf32>
    %809 = arith.negf %808 : vector<8x1xf32>
    %810 = math.exp %809 : vector<8x1xf32>
    %cst_224 = arith.constant 1.000000e+00 : f32
    %811 = vector.broadcast %cst_224 : f32 to vector<8x1xf32>
    %812 = arith.addf %811, %810 : vector<8x1xf32>
    %813 = arith.divf %811, %812 : vector<8x1xf32>
    %c0_225 = arith.constant 0 : index
    %c0_226 = arith.constant 0 : index
    %814 = vector.load %arg31[%c0_225, %c0_226] : memref<8x1xf32, #tpu.memory_space<vmem>>, vector<8x1xf32>
    tpu.vector_store %arg31[%c0_225, %c0_226], %813 {strides = array<i32>} : memref<8x1xf32, #tpu.memory_space<vmem>>, vector<8x1xf32>,
    return
  }
}

</mosaic_0001>

<bundles_post_ra>
// kernel: tpu_custom_call.1
= control target key start
LH: loop header
LB: loop body
LE: loop exit
PB: predicated region body
PF: predicated region fallthrough
CT: control target
= control target key end

     0   :  { %s3713_s3 = smov 5   ;;  %s3714_s7 = smov 7   ;;  %vm149_vm0 = vcmask 130048   ;;  %v3716_v9 = vmov 0.0   ;;  %v3721_v33 = vmov 0   ;;  %s4735_s0 = inlined_call_operand.smem [shape: u32[32], index: -1, kind: input, shape index: {}] }
   0x1   :  { %s3284_s6 = sld [smem:[%s4735_s0 + %s3713_s3]]   ;;  %s3715_s14 = smov 6   ;;  %3479 = vset.pattern.permute.xlu1 %v3721_v33  ;;  %3480 = vset.pattern.permute.xlu2 %v3721_v33 }
   0x2   :  { %s3286_s10 = sld [smem:[%s4735_s0 + %s3714_s7]]   ;;  %s3717_s18 = smov 8   ;;  %3481 = vset.pattern.permute.xlu0 %v3721_v33 }
   0x3   :  { %s3766_s13 = sld [smem:[%s4735_s0]]   ;;  %s3718_s22 = smov 32  }
   0x4   :  { %s3771_s17 = sld [smem:[%s4735_s0 + %s3715_s14]]   ;;  %s3719_s23 = smov 16  }
   0x5   :  { %s3811_s21 = sld [smem:[%s4735_s0 + %s3717_s18]]   ;;  %s3720_s24 = smov 1  }
   0x6   :  { %s3826_s27 = sld [smem:[%s4735_s0 + %s3720_s24]]   ;;  %s3722_s28 = smov 112  }
   0x7   :  { %v144_v0 = vld [vmem:[%s3284_s6 + $0x8] sm:$0xff]  ;;  %v143_v1 = vld [vmem:[%s3284_s6] sm:$0xff]  ;;  %s3723_s29 = smov 3   ;;  %s3724_s3 = smov 11  }
   0x8   :  { %185 = vmatpush.msra.mxu0 %v144_v0  ;;  %v3773_v2 = vld [vmem:[%s3286_s10 + $0x8] sm:$0xff]  ;;  %v3775_v3 = vld [vmem:[%s3286_s10] sm:$0xff]  ;;  %v3784_v7 = vld [vmem:[%s3286_s10 + $0x18] sm:$0xff]  ;;  %s3282_s2 = sld [smem:[%s4735_s0 + %s3723_s29]]   ;;  %s3725_s7 = smov 10  }
   0x9   :  { %v3777_v4 = vld [vmem:[%s3286_s10 + $0x28] sm:$0xff]  ;;  %242 = vmatpush.msra.mxu1 %v3773_v2  ;;  %v136_v5 = vld [vmem:[%s3766_s13] sm:$0xff]  ;;  %262 = vmatpush.msra.mxu2 %v3784_v7  ;;  %v3787_v8 = vld [vmem:[%s3286_s10 + $0x10] sm:$0xff]  ;;  %s3290_s6 = sld [smem:[%s4735_s0 + %s3724_s3]]   ;;  %s3726_s11 = smov 4  }
   0xa   :  { %329 = vmatpush.msra.mxu3 %v3777_v4  ;;  %v3782_v6 = vld [vmem:[%s3286_s10 + $0x20] sm:$0xff]  ;;  %186 = vmatpush.msra.mxu0 %v143_v1  ;;  %v137_v46 = vld [vmem:[%s3766_s13 + $0x8] sm:$0xff]  ;;  %s3289_s10 = sld [smem:[%s4735_s0 + %s3725_s7]]   ;;  %s3727_s19 = smov 17  }
   0xb   :  { %3311 = vmatmul.msk.f32.vlgmr.msra.gmra.mxu0 %vm149_vm0, %v136_v5  ;;  %243 = vmatpush.msra.mxu1 %v3775_v3  ;;  %v3814_v10 = vld [vmem:[%s3771_s17] ss:$0 sm:$0xff]  ;;  %s4019_s14 = sld [smem:[%s4735_s0 + %s3726_s11]]   ;;  %s3728_s26 = smov 12  }
   0xc   :  { %244 = vmatmul.f32.vlgmr.msra.gmra.mxu1 %v3716_v9  ;;  %330 = vmatpush.msra.mxu3 %v3782_v6  ;;  %v3818_v20 = vld [vmem:[%s3811_s21] ss:$0 sm:$0xff]  ;;  %s3295_s18 = sld [smem:[%s4735_s0 + %s3719_s23]]   ;;  %s3732_s8 = smov 18  }
   0xd   :  { %331 = vmatmul.f32.vlgmr.msra.gmra.mxu3 %v3716_v9  ;;  %263 = vmatpush.msra.mxu2 %v3787_v8  ;;  %v218_v34 = vld [vmem:[%s3826_s27] sm:$0xff]  ;;  %s4037_s25 = sld [smem:[%s4735_s0 + %s3727_s19]]   ;;  %s3733_s12 = smov 19  }
   0xe   :  { %264 = vmatmul.f32.vlgmr.msra.gmra.mxu2 %v3716_v9  ;;  %388 = vmatpush.msrb.mxu1 %v3773_v2  ;;  %v361_v35 = vsub.f32 1.0, %v218_v34  ;;  %s4059_s1 = sld [smem:[%s4735_s0 + %s3728_s26]]   ;;  %s3735_s26 = smov 13  }
   0xf   :  { %408 = vmatpush.msrb.mxu2 %v3784_v7  ;;  %472 = vmatpush.msrb.mxu3 %v3777_v4  ;;  %s3297_s11 = sld [smem:[%s4735_s0 + %s3732_s8]]   ;;  %s3746_s30 = smov 26  }
  0x10   :  { %389 = vmatpush.msrb.mxu1 %v3775_v3  ;;  %364 = vperm.xlu2 %3480, %v361_v35   ;;  %s4209_s16 = sld [smem:[%s4735_s0 + %s3733_s12]]   ;;  %s3747_s4 = smov 25  }
  0x11   :  { %409 = vmatpush.msrb.mxu2 %v3787_v8  ;;  %473 = vmatpush.msrb.mxu3 %v3782_v6  ;;  %s3305_s3 = sld [smem:[%s4735_s0 + %s3746_s30]]   ;;  %s3750_s9 = smov 28  }
  0x12   :  { %532 = vmatpush.msra.mxu1 %v3773_v2  ;;  %s3307_s12 = sld [smem:[%s4735_s0 + %s3750_s9]]  }
  0x13   :  { %552 = vmatpush.msra.mxu2 %v3784_v7  ;;  %616 = vmatpush.msra.mxu3 %v3777_v4 }
  0x14   :  { %533 = vmatpush.msra.mxu1 %v3775_v3  ;;  %3312 = vmatmul.msk.f32.gmra.mxu0 %vm149_vm0, %v137_v46 }
  0x15   :  { %553 = vmatpush.msra.mxu2 %v3787_v8  ;;  %617 = vmatpush.msra.mxu3 %v3782_v6 }
  0x6a   :  { %v365_v58 = vpop.permute.xlu2 %364 }
  0x6b   :  { %v3837_v61 = vmul.f32 0.0, %v365_v58 }
  0x88   :  { %v188_v11 = vpop.f32.mrf.mxu0 }
  0x89   :  { %v189_v12 = vadd.f32 %v3814_v10, %v188_v11  ;;  %v245_v13 = vpop.f32.mrf.mxu1 }
  0x8b   :  { %v268_v14 = vadd.f32 %v245_v13, %v189_v12 }
  0x8d   :  { %v3322_v15 = vmul.f32 -1.442695, %v268_v14 }
  0x8f   :  { %3512 = vpow2.f32 %v3322_v15 }
  0x90   :  { %v332_v22 = vpop.f32.mrf.mxu3 }
  0x91   :  { %v333_v26 = vadd.f32 %v3818_v20, %v332_v22  ;;  %v265_v32 = vpop.f32.mrf.mxu2  ;;  %v191_v5 = vpop.f32.mrf.mxu0 }
  0x92   :  { %v192_v11 = vadd.f32 %v3814_v10, %v191_v5 }
  0x95   :  { %v3513_v16 = vpop.eup %3512 }
  0x96   :  { %v272_v17 = vadd.f32 1.0, %v3513_v16  ;;  %v219_v16 = vld [vmem:[%s3826_s27 + $0x8] sm:$0xff] }
  0x98   :  { %3514 = vrcp.f32 %v272_v17  ;;  %v284_v23 = vand.u32 2147483648, %v272_v17  ;;  %v282_v25 = vand.u32 2147483647, %v272_v17  ;;  %vm278_vm2 = vweird.f32 %v272_v17 }
  0x9a   :  { %v285_v28 = vor.u32 1.1754944e-38, %v284_v23  ;;  %vm283_vm4 = vcmp.eq.f32.partialorder %v282_v25, 8.507059e+37 }
  0x9e   :  { %v3515_v18 = vpop.eup %3514 }
  0x9f   :  { %v274_v19 = vmul.f32 %v3515_v18, %v272_v17  ;;  %vm279_vm1 = vweird.f32 %v3515_v18 }
  0xa0   :  { %vm280_vm3 = vmor %vm278_vm2, %vm279_vm1 }
  0xa1   :  { %v275_v21 = vsub.f32 1.0, %v274_v19 }
  0xa3   :  { %v276_v24 = vmul.f32 %v3515_v18, %v275_v21 }
  0xa5   :  { %v277_v27 = vadd.f32 %v3515_v18, %v276_v24 }
  0xa7   :  { %v281_v29 = vsel %vm280_vm3, %v3515_v18, %v277_v27  ;;  %v505_v18 = vsub.f32 1.0, %v219_v16 }
  0xa8   :  { %v286_v30 = vsel %vm283_vm4, %v285_v28, %v281_v29 }
  0xa9   :  { %v335_v31 = vmul.f32 %v333_v26, %v286_v30 }
  0xab   :  { %337 = vrot.lane.b32.xlu0 %v335_v31, %s3718_s22 }
  0xb3   :  { %289 = vrot.lane.b32.xlu0 %v265_v32, %s3719_s23 }
 0x11d   :  { %v338_v36 = vpop.permute.xlu0 %337 }
 0x11e   :  { %v340_v37 = vadd.f32 %v338_v36, %v189_v12 }
 0x120   :  { %3516 = vtanh.f32 %v340_v37 }
 0x125   :  { %v290_v39 = vpop.permute.xlu0 %289 }
 0x126   :  { %v3517_v38 = vpop.eup %3516  ;;  %v292_v40 = vadd.f32 %v290_v39, %v189_v12 }
 0x127   :  { %344 = vrot.lane.b32.xlu1 %v3517_v38, %s3722_s28 }
 0x128   :  { %v3323_v41 = vmul.f32 -1.442695, %v292_v40 }
 0x12a   :  { %3518 = vpow2.f32 %v3323_v41 }
 0x12f   :  { %357 = vperm.xlu1 %3479, %v218_v34  }
 0x130   :  { %v3519_v42 = vpop.eup %3518 }
 0x131   :  { %v296_v43 = vadd.f32 1.0, %v3519_v42 }
 0x133   :  { %3520 = vrcp.f32 %v296_v43  ;;  %v308_v50 = vand.u32 2147483648, %v296_v43  ;;  %vm302_vm6 = vweird.f32 %v296_v43  ;;  %v306_v51 = vand.u32 2147483647, %v296_v43 }
 0x135   :  { %v309_v53 = vor.u32 1.1754944e-38, %v308_v50  ;;  %vm307_vm8 = vcmp.eq.f32.partialorder %v306_v51, 8.507059e+37 }
 0x139   :  { %v3521_v44 = vpop.eup %3520 }
 0x13a   :  { %v298_v45 = vmul.f32 %v3521_v44, %v296_v43  ;;  %vm303_vm5 = vweird.f32 %v3521_v44 }
 0x13b   :  { %vm304_vm7 = vmor %vm302_vm6, %vm303_vm5 }
 0x13c   :  { %v299_v47 = vsub.f32 1.0, %v298_v45  ;;  %v138_v45 = vld [vmem:[%s3766_s13 + $0x10] sm:$0xff] }
 0x13d   :  { %3313 = vmatmul.msk.f32.gmra.mxu0 %vm149_vm0, %v138_v45 }
 0x13e   :  { %v300_v48 = vmul.f32 %v3521_v44, %v299_v47 }
 0x140   :  { %v301_v49 = vadd.f32 %v3521_v44, %v300_v48 }
 0x142   :  { %v305_v52 = vsel %vm304_vm7, %v3521_v44, %v301_v49 }
 0x143   :  { %v310_v54 = vsel %vm307_vm8, %v309_v53, %v305_v52 }
 0x144   :  { %v342_v56 = vsub.f32 1.0, %v310_v54  ;;  %v348_v59 = vmul.f32 0.0, %v310_v54 }
 0x199   :  { %v345_v55 = vpop.permute.xlu1 %344 }
 0x19a   :  { %v347_v57 = vmul.f32 %v345_v55, %v342_v56 }
 0x19c   :  { %v3835_v60 = vadd.f32 %v348_v59, %v347_v57 }
 0x1a1   :  { %v3839_v62 = vpop.permute.xlu1 %357 }
 0x1a2   :  { %v360_v63 = vmul.f32 %v3839_v62, %v3835_v60 }
 0x1a4   :  { %v3844_v0 = vadd.f32 %v3837_v61, %v360_v63 }
 0x1a6   :  { %370 = vrot.lane.b32.xlu2 %v3844_v0, %s3722_s28 }
 0x200   :  { %v371_v1 = vpop.permute.xlu2 %370 }
 0x201   :  { %3324 = vmatmul.msk.f32.vlgmr.msrb.gmra.mxu1 %vm149_vm0, %v371_v1  ;;  %3325 = vmatmul.msk.f32.vlgmr.msrb.gmra.mxu2 %vm149_vm0, %v371_v1 }
 0x202   :  { %3328 = vmatmul.msk.f32.vlgmr.msrb.gmra.mxu3 %vm149_vm0, %v371_v1  ;;  %676 = vmatpush.msrb.mxu1 %v3773_v2 }
 0x203   :  { %696 = vmatpush.msrb.mxu2 %v3784_v7  ;;  %760 = vmatpush.msrb.mxu3 %v3777_v4 }
 0x204   :  { %677 = vmatpush.msrb.mxu1 %v3775_v3 }
 0x205   :  { %697 = vmatpush.msrb.mxu2 %v3787_v8  ;;  %761 = vmatpush.msrb.mxu3 %v3782_v6 }
 0x27e   :  { %v391_v12 = vpop.f32.mrf.mxu1 }
 0x27f   :  { %v414_v13 = vadd.f32 %v391_v12, %v192_v11 }
 0x281   :  { %v3326_v14 = vmul.f32 -1.442695, %v414_v13 }
 0x283   :  { %3522 = vpow2.f32 %v3326_v14 }
 0x284   :  { %v411_v15 = vpop.f32.mrf.mxu2 }
 0x285   :  { %435 = vrot.lane.b32.xlu1 %v411_v15, %s3719_s23  ;;  %v475_v27 = vpop.f32.mrf.mxu3 }
 0x286   :  { %v476_v31 = vadd.f32 %v3818_v20, %v475_v27 }
 0x289   :  { %v3523_v17 = vpop.eup %3522 }
 0x28a   :  { %v418_v19 = vadd.f32 1.0, %v3523_v17 }
 0x28c   :  { %3524 = vrcp.f32 %v418_v19  ;;  %v430_v24 = vand.u32 2147483648, %v418_v19  ;;  %v428_v26 = vand.u32 2147483647, %v418_v19  ;;  %vm424_vm10 = vweird.f32 %v418_v19 }
 0x28d   :  { %508 = vperm.xlu1 %3479, %v505_v18   ;;  %v220_v18 = vld [vmem:[%s3826_s27 + $0x10] sm:$0xff] }
 0x28e   :  { %v431_v29 = vor.u32 1.1754944e-38, %v430_v24  ;;  %vm429_vm12 = vcmp.eq.f32.partialorder %v428_v26, 8.507059e+37 }
 0x292   :  { %v3525_v21 = vpop.eup %3524 }
 0x293   :  { %v420_v22 = vmul.f32 %v3525_v21, %v418_v19  ;;  %vm425_vm9 = vweird.f32 %v3525_v21 }
 0x294   :  { %vm426_vm11 = vmor %vm424_vm10, %vm425_vm9 }
 0x295   :  { %v421_v23 = vsub.f32 1.0, %v420_v22 }
 0x297   :  { %v422_v25 = vmul.f32 %v3525_v21, %v421_v23 }
 0x299   :  { %v423_v28 = vadd.f32 %v3525_v21, %v422_v25 }
 0x29b   :  { %v427_v30 = vsel %vm426_vm11, %v3525_v21, %v423_v28  ;;  %v649_v21 = vsub.f32 1.0, %v220_v18 }
 0x29c   :  { %v432_v32 = vsel %vm429_vm12, %v431_v29, %v427_v30 }
 0x29d   :  { %v478_v34 = vmul.f32 %v476_v31, %v432_v32 }
 0x29f   :  { %480 = vrot.lane.b32.xlu0 %v478_v34, %s3718_s22 }
 0x2a7   :  { %501 = vperm.xlu0 %3481, %v219_v16  }
 0x2f7   :  { %v436_v38 = vpop.permute.xlu1 %435 }
 0x2f8   :  { %v438_v39 = vadd.f32 %v436_v38, %v192_v11 }
 0x2fa   :  { %v3327_v40 = vmul.f32 -1.442695, %v438_v39 }
 0x2ff   :  { %v3866_v58 = vpop.permute.xlu1 %508 }
 0x300   :  { %v511_v1 = vmul.f32 %v3866_v58, %v3844_v0 }
 0x311   :  { %v481_v35 = vpop.permute.xlu0 %480 }
 0x312   :  { %v483_v36 = vadd.f32 %v481_v35, %v192_v11 }
 0x314   :  { %3526 = vtanh.f32 %v483_v36 }
 0x315   :  { %3528 = vpow2.f32 %v3327_v40 }
 0x319   :  { %v3868_v59 = vpop.permute.xlu0 %501 }
 0x31a   :  { %v3527_v37 = vpop.eup %3526 }
 0x31b   :  { %487 = vrot.lane.b32.xlu2 %v3527_v37, %s3722_s28  ;;  %v3529_v41 = vpop.eup %3528 }
 0x31c   :  { %v442_v42 = vadd.f32 1.0, %v3529_v41 }
 0x31e   :  { %3530 = vrcp.f32 %v442_v42  ;;  %v454_v49 = vand.u32 2147483648, %v442_v42  ;;  %vm448_vm14 = vweird.f32 %v442_v42  ;;  %v452_v50 = vand.u32 2147483647, %v442_v42 }
 0x320   :  { %v455_v52 = vor.u32 1.1754944e-38, %v454_v49  ;;  %vm453_vm1 = vcmp.eq.f32.partialorder %v452_v50, 8.507059e+37 }
 0x324   :  { %v3531_v43 = vpop.eup %3530 }
 0x325   :  { %v444_v44 = vmul.f32 %v3531_v43, %v442_v42  ;;  %vm449_vm13 = vweird.f32 %v3531_v43 }
 0x326   :  { %vm450_vm15 = vmor %vm448_vm14, %vm449_vm13 }
 0x327   :  { %v445_v46 = vsub.f32 1.0, %v444_v44 }
 0x329   :  { %v446_v47 = vmul.f32 %v3531_v43, %v445_v46 }
 0x32b   :  { %v447_v48 = vadd.f32 %v3531_v43, %v446_v47  ;;  %v139_v47 = vld [vmem:[%s3766_s13 + $0x18] sm:$0xff] }
 0x32c   :  { %3314 = vmatmul.msk.f32.gmra.mxu0 %vm149_vm0, %v139_v47 }
 0x32d   :  { %v451_v51 = vsel %vm450_vm15, %v3531_v43, %v447_v48 }
 0x32e   :  { %v456_v53 = vsel %vm453_vm1, %v455_v52, %v451_v51 }
 0x32f   :  { %v485_v54 = vsub.f32 1.0, %v456_v53  ;;  %v491_v56 = vmul.f32 %v456_v53, %v3844_v0  ;;  %v194_v0 = vpop.f32.mrf.mxu0 }
 0x330   :  { %v195_v13 = vadd.f32 %v3814_v10, %v194_v0 }
 0x375   :  { %v488_v55 = vpop.permute.xlu2 %487 }
 0x376   :  { %v490_v57 = vmul.f32 %v488_v55, %v485_v54 }
 0x378   :  { %v3870_v63 = vadd.f32 %v491_v56, %v490_v57 }
 0x37a   :  { %v504_v5 = vmul.f32 %v3868_v59, %v3870_v63 }
 0x37c   :  { %v3876_v11 = vadd.f32 %v511_v1, %v504_v5 }
 0x37e   :  { %514 = vrot.lane.b32.xlu2 %v3876_v11, %s3722_s28 }
 0x3d8   :  { %v515_v12 = vpop.permute.xlu2 %514 }
 0x3d9   :  { %3329 = vmatmul.msk.f32.vlgmr.msra.gmra.mxu1 %vm149_vm0, %v515_v12  ;;  %3330 = vmatmul.msk.f32.vlgmr.msra.gmra.mxu2 %vm149_vm0, %v515_v12 }
 0x3da   :  { %3333 = vmatmul.msk.f32.vlgmr.msra.gmra.mxu3 %vm149_vm0, %v515_v12  ;;  %820 = vmatpush.msra.mxu1 %v3773_v2 }
 0x3db   :  { %840 = vmatpush.msra.mxu2 %v3784_v7  ;;  %904 = vmatpush.msra.mxu3 %v3777_v4 }
 0x3dc   :  { %821 = vmatpush.msra.mxu1 %v3775_v3 }
 0x3dd   :  { %841 = vmatpush.msra.mxu2 %v3787_v8  ;;  %905 = vmatpush.msra.mxu3 %v3782_v6 }
 0x456   :  { %v535_v14 = vpop.f32.mrf.mxu1 }
 0x457   :  { %v558_v15 = vadd.f32 %v535_v14, %v195_v13 }
 0x459   :  { %v3331_v16 = vmul.f32 -1.442695, %v558_v15 }
 0x45b   :  { %3532 = vpow2.f32 %v3331_v16 }
 0x45c   :  { %v555_v17 = vpop.f32.mrf.mxu2 }
 0x45d   :  { %579 = vrot.lane.b32.xlu2 %v555_v17, %s3719_s23  ;;  %v619_v29 = vpop.f32.mrf.mxu3 }
 0x45e   :  { %v620_v34 = vadd.f32 %v3818_v20, %v619_v29 }
 0x461   :  { %v3533_v19 = vpop.eup %3532 }
 0x462   :  { %v562_v22 = vadd.f32 1.0, %v3533_v19 }
 0x464   :  { %3534 = vrcp.f32 %v562_v22  ;;  %v574_v26 = vand.u32 2147483648, %v562_v22  ;;  %v572_v28 = vand.u32 2147483647, %v562_v22  ;;  %vm568_vm3 = vweird.f32 %v562_v22 }
 0x465   :  { %652 = vperm.xlu2 %3480, %v649_v21  }
 0x466   :  { %v575_v31 = vor.u32 1.1754944e-38, %v574_v26  ;;  %vm573_vm5 = vcmp.eq.f32.partialorder %v572_v28, 8.507059e+37 }
 0x46a   :  { %v3535_v23 = vpop.eup %3534 }
 0x46b   :  { %v564_v24 = vmul.f32 %v3535_v23, %v562_v22  ;;  %vm569_vm2 = vweird.f32 %v3535_v23 }
 0x46c   :  { %vm570_vm4 = vmor %vm568_vm3, %vm569_vm2 }
 0x46d   :  { %v565_v25 = vsub.f32 1.0, %v564_v24  ;;  %v221_v24 = vld [vmem:[%s3826_s27 + $0x18] sm:$0xff] }
 0x46e   :  { %v793_v26 = vsub.f32 1.0, %v221_v24 }
 0x46f   :  { %v566_v27 = vmul.f32 %v3535_v23, %v565_v25 }
 0x471   :  { %v567_v30 = vadd.f32 %v3535_v23, %v566_v27 }
 0x473   :  { %v571_v32 = vsel %vm570_vm4, %v3535_v23, %v567_v30 }
 0x474   :  { %v576_v35 = vsel %vm573_vm5, %v575_v31, %v571_v32 }
 0x475   :  { %v622_v36 = vmul.f32 %v620_v34, %v576_v35 }
 0x477   :  { %624 = vrot.lane.b32.xlu1 %v622_v36, %s3718_s22 }
 0x47f   :  { %645 = vperm.xlu1 %3479, %v220_v18  }
 0x4b7   :  { %v580_v40 = vpop.permute.xlu2 %579 }
 0x4b8   :  { %v582_v41 = vadd.f32 %v580_v40, %v195_v13 }
 0x4ba   :  { %v3332_v42 = vmul.f32 -1.442695, %v582_v41 }
 0x4bf   :  { %v3898_v12 = vpop.permute.xlu2 %652 }
 0x4c0   :  { %v655_v14 = vmul.f32 %v3898_v12, %v3876_v11 }
 0x4e9   :  { %v625_v37 = vpop.permute.xlu1 %624 }
 0x4ea   :  { %v627_v38 = vadd.f32 %v625_v37, %v195_v13 }
 0x4ec   :  { %3536 = vtanh.f32 %v627_v38 }
 0x4ed   :  { %3538 = vpow2.f32 %v3332_v42 }
 0x4f1   :  { %v3902_v13 = vpop.permute.xlu1 %645 }
 0x4f2   :  { %v3537_v39 = vpop.eup %3536 }
 0x4f3   :  { %631 = vrot.lane.b32.xlu0 %v3537_v39, %s3722_s28  ;;  %v3539_v43 = vpop.eup %3538 }
 0x4f4   :  { %v586_v44 = vadd.f32 1.0, %v3539_v43 }
 0x4f6   :  { %3540 = vrcp.f32 %v586_v44  ;;  %v598_v51 = vand.u32 2147483648, %v586_v44  ;;  %vm592_vm7 = vweird.f32 %v586_v44  ;;  %v596_v52 = vand.u32 2147483647, %v586_v44 }
 0x4f8   :  { %v599_v54 = vor.u32 1.1754944e-38, %v598_v51  ;;  %vm597_vm9 = vcmp.eq.f32.partialorder %v596_v52, 8.507059e+37  ;;  %v140_v52 = vld [vmem:[%s3766_s13 + $0x20] sm:$0xff] }
 0x4f9   :  { %3315 = vmatmul.msk.f32.gmra.mxu0 %vm149_vm0, %v140_v52 }
 0x4fc   :  { %v3541_v45 = vpop.eup %3540 }
 0x4fd   :  { %v588_v46 = vmul.f32 %v3541_v45, %v586_v44  ;;  %vm593_vm6 = vweird.f32 %v3541_v45 }
 0x4fe   :  { %vm594_vm8 = vmor %vm592_vm7, %vm593_vm6 }
 0x4ff   :  { %v589_v48 = vsub.f32 1.0, %v588_v46 }
 0x501   :  { %v590_v49 = vmul.f32 %v3541_v45, %v589_v48 }
 0x503   :  { %v591_v50 = vadd.f32 %v3541_v45, %v590_v49 }
 0x505   :  { %v595_v53 = vsel %vm594_vm8, %v3541_v45, %v591_v50 }
 0x506   :  { %v600_v55 = vsel %vm597_vm9, %v599_v54, %v595_v53 }
 0x507   :  { %v629_v56 = vsub.f32 1.0, %v600_v55  ;;  %v635_v1 = vmul.f32 %v600_v55, %v3876_v11  ;;  %v197_v11 = vpop.f32.mrf.mxu0 }
 0x508   :  { %v198_v18 = vadd.f32 %v3814_v10, %v197_v11 }
 0x565   :  { %v632_v57 = vpop.permute.xlu0 %631 }
 0x566   :  { %v634_v5 = vmul.f32 %v632_v57, %v629_v56 }
 0x568   :  { %v3900_v0 = vadd.f32 %v635_v1, %v634_v5 }
 0x56a   :  { %v648_v15 = vmul.f32 %v3902_v13, %v3900_v0 }
 0x56c   :  { %v3908_v16 = vadd.f32 %v655_v14, %v648_v15 }
 0x56e   :  { %658 = vrot.lane.b32.xlu0 %v3908_v16, %s3722_s28 }
 0x5e0   :  { %v659_v17 = vpop.permute.xlu0 %658 }
 0x5e1   :  { %3334 = vmatmul.msk.f32.vlgmr.msrb.gmra.mxu1 %vm149_vm0, %v659_v17  ;;  %3335 = vmatmul.msk.f32.vlgmr.msrb.gmra.mxu2 %vm149_vm0, %v659_v17 }
 0x5e2   :  { %3338 = vmatmul.msk.f32.vlgmr.msrb.gmra.mxu3 %vm149_vm0, %v659_v17  ;;  %964 = vmatpush.msrb.mxu1 %v3773_v2 }
 0x5e3   :  { %984 = vmatpush.msrb.mxu2 %v3784_v7  ;;  %1048 = vmatpush.msrb.mxu3 %v3777_v4 }
 0x5e4   :  { %965 = vmatpush.msrb.mxu1 %v3775_v3 }
 0x5e5   :  { %985 = vmatpush.msrb.mxu2 %v3787_v8  ;;  %1049 = vmatpush.msrb.mxu3 %v3782_v6 }
 0x65e   :  { %v679_v19 = vpop.f32.mrf.mxu1 }
 0x65f   :  { %v702_v21 = vadd.f32 %v679_v19, %v198_v18 }
 0x661   :  { %v3336_v22 = vmul.f32 -1.442695, %v702_v21 }
 0x663   :  { %3542 = vpow2.f32 %v3336_v22 }
 0x664   :  { %v699_v23 = vpop.f32.mrf.mxu2 }
 0x665   :  { %723 = vrot.lane.b32.xlu2 %v699_v23, %s3719_s23  ;;  %v763_v35 = vpop.f32.mrf.mxu3 }
 0x666   :  { %v764_v39 = vadd.f32 %v3818_v20, %v763_v35 }
 0x669   :  { %v3543_v25 = vpop.eup %3542 }
 0x66a   :  { %v706_v27 = vadd.f32 1.0, %v3543_v25 }
 0x66c   :  { %3544 = vrcp.f32 %v706_v27  ;;  %v718_v31 = vand.u32 2147483648, %v706_v27  ;;  %v716_v34 = vand.u32 2147483647, %v706_v27  ;;  %vm712_vm11 = vweird.f32 %v706_v27 }
 0x66d   :  { %796 = vperm.xlu2 %3480, %v793_v26  }
 0x66e   :  { %v719_v37 = vor.u32 1.1754944e-38, %v718_v31  ;;  %vm717_vm13 = vcmp.eq.f32.partialorder %v716_v34, 8.507059e+37 }
 0x672   :  { %v3545_v28 = vpop.eup %3544 }
 0x673   :  { %v708_v29 = vmul.f32 %v3545_v28, %v706_v27  ;;  %vm713_vm10 = vweird.f32 %v3545_v28 }
 0x674   :  { %vm714_vm12 = vmor %vm712_vm11, %vm713_vm10 }
 0x675   :  { %v709_v30 = vsub.f32 1.0, %v708_v29 }
 0x677   :  { %v710_v32 = vmul.f32 %v3545_v28, %v709_v30 }
 0x679   :  { %v711_v36 = vadd.f32 %v3545_v28, %v710_v32 }
 0x67b   :  { %v715_v38 = vsel %vm714_vm12, %v3545_v28, %v711_v36 }
 0x67c   :  { %v720_v40 = vsel %vm717_vm13, %v719_v37, %v715_v38 }
 0x67d   :  { %v766_v41 = vmul.f32 %v764_v39, %v720_v40 }
 0x67f   :  { %768 = vrot.lane.b32.xlu1 %v766_v41, %s3718_s22 }
 0x687   :  { %789 = vperm.xlu1 %3479, %v221_v24  }
 0x6bf   :  { %v724_v45 = vpop.permute.xlu2 %723 }
 0x6c0   :  { %v726_v46 = vadd.f32 %v724_v45, %v198_v18 }
 0x6c2   :  { %v3337_v47 = vmul.f32 -1.442695, %v726_v46 }
 0x6c7   :  { %v3930_v19 = vpop.permute.xlu2 %796 }
 0x6c8   :  { %v799_v23 = vmul.f32 %v3930_v19, %v3908_v16 }
 0x6f1   :  { %v769_v42 = vpop.permute.xlu1 %768 }
 0x6f2   :  { %v771_v43 = vadd.f32 %v769_v42, %v198_v18 }
 0x6f4   :  { %3546 = vtanh.f32 %v771_v43 }
 0x6f5   :  { %3548 = vpow2.f32 %v3337_v47 }
 0x6f9   :  { %v3934_v22 = vpop.permute.xlu1 %789 }
 0x6fa   :  { %v3547_v44 = vpop.eup %3546 }
 0x6fb   :  { %775 = vrot.lane.b32.xlu0 %v3547_v44, %s3722_s28  ;;  %v3549_v48 = vpop.eup %3548 }
 0x6fc   :  { %v730_v49 = vadd.f32 1.0, %v3549_v48 }
 0x6fe   :  { %3550 = vrcp.f32 %v730_v49  ;;  %v742_v56 = vand.u32 2147483648, %v730_v49  ;;  %vm736_vm15 = vweird.f32 %v730_v49  ;;  %v740_v57 = vand.u32 2147483647, %v730_v49 }
 0x700   :  { %v743_v5 = vor.u32 1.1754944e-38, %v742_v56  ;;  %vm741_vm2 = vcmp.eq.f32.partialorder %v740_v57, 8.507059e+37 }
 0x704   :  { %v3551_v50 = vpop.eup %3550 }
 0x705   :  { %v732_v51 = vmul.f32 %v3551_v50, %v730_v49  ;;  %vm737_vm14 = vweird.f32 %v3551_v50 }
 0x706   :  { %vm738_vm1 = vmor %vm736_vm15, %vm737_vm14 }
 0x707   :  { %v733_v53 = vsub.f32 1.0, %v732_v51 }
 0x709   :  { %v734_v54 = vmul.f32 %v3551_v50, %v733_v53 }
 0x70b   :  { %v735_v55 = vadd.f32 %v3551_v50, %v734_v54  ;;  %v141_v54 = vld [vmem:[%s3766_s13 + $0x28] sm:$0xff] }
 0x70c   :  { %3316 = vmatmul.msk.f32.gmra.mxu0 %vm149_vm0, %v141_v54 }
 0x70d   :  { %v739_v1 = vsel %vm738_vm1, %v3551_v50, %v735_v55 }
 0x70e   :  { %v744_v14 = vsel %vm741_vm2, %v743_v5, %v739_v1 }
 0x70f   :  { %v773_v15 = vsub.f32 1.0, %v744_v14  ;;  %v779_v11 = vmul.f32 %v744_v14, %v3908_v16  ;;  %v200_v16 = vpop.f32.mrf.mxu0 }
 0x710   :  { %v201_v27 = vadd.f32 %v3814_v10, %v200_v16 }
 0x76d   :  { %v776_v17 = vpop.permute.xlu0 %775 }
 0x76e   :  { %v778_v18 = vmul.f32 %v776_v17, %v773_v15 }
 0x770   :  { %v3932_v21 = vadd.f32 %v779_v11, %v778_v18 }
 0x772   :  { %v792_v24 = vmul.f32 %v3934_v22, %v3932_v21 }
 0x774   :  { %v3940_v25 = vadd.f32 %v799_v23, %v792_v24 }
 0x776   :  { %802 = vrot.lane.b32.xlu0 %v3940_v25, %s3722_s28 }
 0x7e8   :  { %v803_v26 = vpop.permute.xlu0 %802 }
 0x7e9   :  { %3339 = vmatmul.msk.f32.vlgmr.msra.gmra.mxu1 %vm149_vm0, %v803_v26  ;;  %3340 = vmatmul.msk.f32.vlgmr.msra.gmra.mxu2 %vm149_vm0, %v803_v26 }
 0x7ea   :  { %3343 = vmatmul.msk.f32.vlgmr.msra.gmra.mxu3 %vm149_vm0, %v803_v26  ;;  %1108 = vmatpush.msra.mxu1 %v3773_v2  ;;  %v222_v2 = vld [vmem:[%s3826_s27 + $0x20] sm:$0xff] }
 0x7eb   :  { %1128 = vmatpush.msra.mxu2 %v3784_v7  ;;  %1192 = vmatpush.msra.mxu3 %v3777_v4  ;;  %v937_v32 = vsub.f32 1.0, %v222_v2 }
 0x7ec   :  { %1109 = vmatpush.msra.mxu1 %v3775_v3 }
 0x7ed   :  { %1129 = vmatpush.msra.mxu2 %v3787_v8  ;;  %1193 = vmatpush.msra.mxu3 %v3782_v6 }
 0x866   :  { %v823_v28 = vpop.f32.mrf.mxu1 }
 0x867   :  { %v846_v29 = vadd.f32 %v823_v28, %v201_v27 }
 0x869   :  { %v3341_v30 = vmul.f32 -1.442695, %v846_v29 }
 0x86b   :  { %3552 = vpow2.f32 %v3341_v30 }
 0x86c   :  { %v843_v31 = vpop.f32.mrf.mxu2 }
 0x86d   :  { %867 = vrot.lane.b32.xlu2 %v843_v31, %s3719_s23  ;;  %v907_v37 = vpop.f32.mrf.mxu3 }
 0x86e   :  { %v908_v41 = vadd.f32 %v3818_v20, %v907_v37 }
 0x871   :  { %v3553_v7 = vpop.eup %3552 }
 0x872   :  { %v850_v4 = vadd.f32 1.0, %v3553_v7 }
 0x874   :  { %3554 = vrcp.f32 %v850_v4  ;;  %v862_v6 = vand.u32 2147483648, %v850_v4  ;;  %v860_v36 = vand.u32 2147483647, %v850_v4  ;;  %vm856_vm4 = vweird.f32 %v850_v4 }
 0x875   :  { %940 = vperm.xlu2 %3480, %v937_v32  }
 0x876   :  { %v863_v39 = vor.u32 1.1754944e-38, %v862_v6  ;;  %vm861_vm6 = vcmp.eq.f32.partialorder %v860_v36, 8.507059e+37 }
 0x87a   :  { %v3555_v3 = vpop.eup %3554 }
 0x87b   :  { %v852_v8 = vmul.f32 %v3555_v3, %v850_v4  ;;  %vm857_vm3 = vweird.f32 %v3555_v3 }
 0x87c   :  { %vm858_vm5 = vmor %vm856_vm4, %vm857_vm3 }
 0x87d   :  { %v853_v34 = vsub.f32 1.0, %v852_v8  ;;  %v223_v8 = vld [vmem:[%s3826_s27 + $0x28] sm:$0xff] }
 0x87e   :  { %v1081_v6 = vsub.f32 1.0, %v223_v8 }
 0x87f   :  { %v854_v35 = vmul.f32 %v3555_v3, %v853_v34 }
 0x881   :  { %v855_v38 = vadd.f32 %v3555_v3, %v854_v35 }
 0x883   :  { %v859_v40 = vsel %vm858_vm5, %v3555_v3, %v855_v38 }
 0x884   :  { %v864_v42 = vsel %vm861_vm6, %v863_v39, %v859_v40 }
 0x885   :  { %v910_v43 = vmul.f32 %v908_v41, %v864_v42 }
 0x887   :  { %912 = vrot.lane.b32.xlu1 %v910_v43, %s3718_s22 }
 0x88f   :  { %933 = vperm.xlu1 %3479, %v222_v2   ;;  %v203_v2 = vpop.f32.mrf.mxu0 }
 0x890   :  { %v204_v7 = vadd.f32 %v3814_v10, %v203_v2 }
 0x8c7   :  { %v868_v47 = vpop.permute.xlu2 %867 }
 0x8c8   :  { %v870_v48 = vadd.f32 %v868_v47, %v201_v27 }
 0x8ca   :  { %v3342_v49 = vmul.f32 -1.442695, %v870_v48 }
 0x8cf   :  { %v3962_v26 = vpop.permute.xlu2 %940 }
 0x8d0   :  { %v943_v28 = vmul.f32 %v3962_v26, %v3940_v25 }
 0x8f9   :  { %v913_v44 = vpop.permute.xlu1 %912 }
 0x8fa   :  { %v915_v45 = vadd.f32 %v913_v44, %v201_v27 }
 0x8fc   :  { %3556 = vtanh.f32 %v915_v45 }
 0x8fd   :  { %3558 = vpow2.f32 %v3342_v49 }
 0x901   :  { %v3966_v27 = vpop.permute.xlu1 %933 }
 0x902   :  { %v3557_v46 = vpop.eup %3556 }
 0x903   :  { %919 = vrot.lane.b32.xlu0 %v3557_v46, %s3722_s28  ;;  %v3559_v50 = vpop.eup %3558 }
 0x904   :  { %v874_v51 = vadd.f32 1.0, %v3559_v50 }
 0x906   :  { %3560 = vrcp.f32 %v874_v51  ;;  %v886_v1 = vand.u32 2147483648, %v874_v51  ;;  %vm880_vm8 = vweird.f32 %v874_v51  ;;  %v884_v5 = vand.u32 2147483647, %v874_v51 }
 0x908   :  { %v887_v15 = vor.u32 1.1754944e-38, %v886_v1  ;;  %vm885_vm10 = vcmp.eq.f32.partialorder %v884_v5, 8.507059e+37 }
 0x90c   :  { %v3561_v52 = vpop.eup %3560 }
 0x90d   :  { %v876_v53 = vmul.f32 %v3561_v52, %v874_v51  ;;  %vm881_vm7 = vweird.f32 %v3561_v52 }
 0x90e   :  { %vm882_vm9 = vmor %vm880_vm8, %vm881_vm7 }
 0x90f   :  { %v877_v55 = vsub.f32 1.0, %v876_v53 }
 0x911   :  { %v878_v56 = vmul.f32 %v3561_v52, %v877_v55 }
 0x913   :  { %v879_v57 = vadd.f32 %v3561_v52, %v878_v56 }
 0x915   :  { %v883_v14 = vsel %vm882_vm9, %v3561_v52, %v879_v57 }
 0x916   :  { %v888_v17 = vsel %vm885_vm10, %v887_v15, %v883_v14 }
 0x917   :  { %v917_v11 = vsub.f32 1.0, %v888_v17  ;;  %v923_v23 = vmul.f32 %v888_v17, %v3940_v25 }
 0x975   :  { %v920_v18 = vpop.permute.xlu0 %919 }
 0x976   :  { %v922_v24 = vmul.f32 %v920_v18, %v917_v11 }
 0x978   :  { %v3964_v16 = vadd.f32 %v923_v23, %v922_v24  ;;  %v68_v24 = vstv %s3282_s2  ;;  %s3729_s2 = smov 20  }
 0x979   :  { %69 = vst [vmem:[#allocation3] sm:$0x1] %v68_v24  ;;  %v1435_v24 = vld [vmem:[%s4037_s25 + $0xa0] sm:$0xff]  ;;  %s4085_s5 = sld [smem:[%s4735_s0 + %s3729_s2]]   ;;  %s3736_s2 = smov 15  }
 0x97a   :  { %v936_v29 = vmul.f32 %v3966_v27, %v3964_v16 }
 0x97c   :  { %v3972_v30 = vadd.f32 %v943_v28, %v936_v29 }
 0x97e   :  { %946 = vrot.lane.b32.xlu0 %v3972_v30, %s3722_s28 }
 0x9f0   :  { %v947_v31 = vpop.permute.xlu0 %946 }
 0x9f1   :  { %3344 = vmatmul.msk.f32.vlgmr.msrb.gmra.mxu1 %vm149_vm0, %v947_v31  ;;  %3345 = vmatmul.msk.f32.vlgmr.msrb.gmra.mxu2 %vm149_vm0, %v947_v31 }
 0x9f2   :  { %3348 = vmatmul.msk.f32.vlgmr.msrb.gmra.mxu3 %vm149_vm0, %v947_v31 }
 0xa6e   :  { %v967_v25 = vpop.f32.mrf.mxu1 }
 0xa6f   :  { %v990_v32 = vadd.f32 %v967_v25, %v204_v7 }
 0xa71   :  { %v3346_v4 = vmul.f32 -1.442695, %v990_v32 }
 0xa73   :  { %3562 = vpow2.f32 %v3346_v4 }
 0xa74   :  { %v987_v3 = vpop.f32.mrf.mxu2 }
 0xa75   :  { %1011 = vrot.lane.b32.xlu2 %v987_v3, %s3719_s23  ;;  %v1051_v41 = vpop.f32.mrf.mxu3 }
 0xa76   :  { %v1052_v45 = vadd.f32 %v3818_v20, %v1051_v41  ;;  %v1256_v41 = vld [vmem:[%s3289_s10] sm:$0xff] }
 0xa79   :  { %v3563_v34 = vpop.eup %3562 }
 0xa7a   :  { %v994_v35 = vadd.f32 1.0, %v3563_v34  ;;  %v4007_v34 = vld [vmem:[#allocation3] sm:$0x1] }
 0xa7c   :  { %3564 = vrcp.f32 %v994_v35  ;;  %v1006_v39 = vand.u32 2147483648, %v994_v35  ;;  %v1004_v10 = vand.u32 2147483647, %v994_v35  ;;  %vm1000_vm12 = vweird.f32 %v994_v35 }
 0xa7d   :  { %1084 = vperm.xlu2 %3480, %v1081_v6   ;;  %v1259_v6 = vld [vmem:[%s3289_s10 + $0x18] sm:$0xff] }
 0xa7e   :  { %v1007_v43 = vor.u32 1.1754944e-38, %v1006_v39  ;;  %vm1005_vm14 = vcmp.eq.f32.partialorder %v1004_v10, 8.507059e+37  ;;  %1294 = vmatpush.msrb.mxu2 %v1259_v6  ;;  %v1300_v39 = vld [vmem:[%s3295_s18] sm:$0xff]  ;;  %v1258_v10 = vld [vmem:[%s3289_s10 + $0x10] sm:$0xff] }
 0xa7f   :  { %1274 = vmatpush.msrb.mxu1 %v1258_v10  ;;  %v1415_v6 = vld [vmem:[%s4037_s25] sm:$0xff] }
 0xa81   :  { %1275 = vmatpush.msrb.mxu1 %v1256_v41 }
 0xa82   :  { %v3565_v36 = vpop.eup %3564 }
 0xa83   :  { %v996_v37 = vmul.f32 %v3565_v36, %v994_v35  ;;  %vm1001_vm11 = vweird.f32 %v3565_v36  ;;  %v1226_v35 = vld [vmem:[%s4019_s14] sm:$0xff] }
 0xa84   :  { %vm1002_vm13 = vmor %vm1000_vm12, %vm1001_vm11 }
 0xa85   :  { %v997_v38 = vsub.f32 1.0, %v996_v37  ;;  %v1302_v37 = vld [vmem:[%s3295_s18 + $0x10] sm:$0xff] }
 0xa86   :  { %1339 = vmatpush.msrb.mxu3 %v1302_v37 }
 0xa87   :  { %v998_v40 = vmul.f32 %v3565_v36, %v997_v38  ;;  %v1303_v38 = vld [vmem:[%s3295_s18 + $0x18] sm:$0xff] }
 0xa88   :  { %1340 = vmatpush.msrb.mxu3 %v1300_v39  ;;  %v4097_v39 = vld [vmem:[%s4085_s5] sm:$0xff] }
 0xa89   :  { %v999_v42 = vadd.f32 %v3565_v36, %v998_v40  ;;  %v1301_v40 = vld [vmem:[%s3295_s18 + $0x8] sm:$0xff]  ;;  %s3734_s18 = smov 14  }
 0xa8b   :  { %v1003_v44 = vsel %vm1002_vm13, %v3565_v36, %v999_v42  ;;  %v1257_v36 = vld [vmem:[%s3289_s10 + $0x8] sm:$0xff] }
 0xa8c   :  { %v1008_v46 = vsel %vm1005_vm14, %v1007_v43, %v1003_v44  ;;  %1295 = vmatpush.msrb.mxu2 %v1257_v36  ;;  %v3706_v36 = vld [vmem:[%s3771_s17] ss:$0 sm:$0xff]  ;;  %s3730_s17 = smov 127  }
 0xa8d   :  { %v1054_v47 = vmul.f32 %v1052_v45, %v1008_v46  ;;  %v1446_v46 = vld [vmem:[%s4037_s25 + $0xf8] sm:$0xff] }
 0xa8f   :  { %1056 = vrot.lane.b32.xlu1 %v1054_v47, %s3718_s22  ;;  %v1445_v47 = vld [vmem:[%s4037_s25 + $0xf0] sm:$0xff] }
 0xa97   :  { %1077 = vperm.xlu1 %3479, %v223_v8   ;;  %v142_v8 = vld [vmem:[%s3766_s13 + $0x30] sm:$0xff]  ;;  %s3751_s13 = smov 31  }
 0xa98   :  { %3317 = vmatmul.msk.f32.gmra.mxu0 %vm149_vm0, %v142_v8  ;;  %v1418_v8 = vld [vmem:[%s4037_s25 + $0x18] sm:$0xff] }
 0xacf   :  { %v1012_v51 = vpop.permute.xlu2 %1011 }
 0xad0   :  { %v1014_v52 = vadd.f32 %v1012_v51, %v204_v7  ;;  %v1428_v51 = vld [vmem:[%s4037_s25 + $0x68] sm:$0xff] }
 0xad2   :  { %v3347_v53 = vmul.f32 -1.442695, %v1014_v52  ;;  %v1443_v52 = vld [vmem:[%s4037_s25 + $0xe0] sm:$0xff] }
 0xad7   :  { %v3989_v2 = vpop.permute.xlu2 %1084 }
 0xad8   :  { %v1087_v32 = vmul.f32 %v3989_v2, %v3972_v30 }
 0xb01   :  { %v1057_v48 = vpop.permute.xlu1 %1056 }
 0xb02   :  { %v1059_v49 = vadd.f32 %v1057_v48, %v204_v7  ;;  %v1430_v48 = vld [vmem:[%s4037_s25 + $0x78] sm:$0xff] }
 0xb04   :  { %3566 = vtanh.f32 %v1059_v49  ;;  %v1429_v49 = vld [vmem:[%s4037_s25 + $0x70] sm:$0xff] }
 0xb05   :  { %3568 = vpow2.f32 %v3347_v53 }
 0xb09   :  { %v3991_v25 = vpop.permute.xlu1 %1077 }
 0xb0a   :  { %v3567_v50 = vpop.eup %3566 }
 0xb0b   :  { %1063 = vrot.lane.b32.xlu0 %v3567_v50, %s3722_s28  ;;  %v3569_v54 = vpop.eup %3568  ;;  %v1444_v50 = vld [vmem:[%s4037_s25 + $0xe8] sm:$0xff] }
 0xb0c   :  { %v1018_v55 = vadd.f32 1.0, %v3569_v54  ;;  %v1442_v54 = vld [vmem:[%s4037_s25 + $0xd8] sm:$0xff] }
 0xb0e   :  { %3570 = vrcp.f32 %v1018_v55  ;;  %v1030_v14 = vand.u32 2147483648, %v1018_v55  ;;  %vm1024_vm1 = vweird.f32 %v1018_v55  ;;  %v1028_v15 = vand.u32 2147483647, %v1018_v55 }
 0xb10   :  { %v1031_v11 = vor.u32 1.1754944e-38, %v1030_v14  ;;  %vm1029_vm3 = vcmp.eq.f32.partialorder %v1028_v15, 8.507059e+37  ;;  %v1438_v14 = vld [vmem:[%s4037_s25 + $0xb8] sm:$0xff]  ;;  %v1424_v15 = vld [vmem:[%s4037_s25 + $0x48] sm:$0xff] }
 0xb14   :  { %v3571_v56 = vpop.eup %3570 }
 0xb15   :  { %v1020_v20 = vmul.f32 %v3571_v56, %v1018_v55  ;;  %vm1025_vm15 = vweird.f32 %v3571_v56  ;;  %v1441_v55 = vld [vmem:[%s4037_s25 + $0xd0] sm:$0xff] }
 0xb16   :  { %vm1026_vm2 = vmor %vm1024_vm1, %vm1025_vm15 }
 0xb17   :  { %v1021_v57 = vsub.f32 1.0, %v1020_v20  ;;  %v1440_v20 = vld [vmem:[%s4037_s25 + $0xc8] sm:$0xff] }
 0xb19   :  { %v1022_v1 = vmul.f32 %v3571_v56, %v1021_v57  ;;  %v1426_v57 = vld [vmem:[%s4037_s25 + $0x58] sm:$0xff] }
 0xb1b   :  { %v1023_v5 = vadd.f32 %v3571_v56, %v1022_v1  ;;  %v1439_v1 = vld [vmem:[%s4037_s25 + $0xc0] sm:$0xff] }
 0xb1d   :  { %v1027_v17 = vsel %vm1026_vm2, %v3571_v56, %v1023_v5  ;;  %v1427_v56 = vld [vmem:[%s4037_s25 + $0x60] sm:$0xff]  ;;  %v1425_v5 = vld [vmem:[%s4037_s25 + $0x50] sm:$0xff] }
 0xb1e   :  { %v1032_v18 = vsel %vm1029_vm3, %v1031_v11, %v1027_v17  ;;  %v1437_v17 = vld [vmem:[%s4037_s25 + $0xb0] sm:$0xff]  ;;  %v1423_v11 = vld [vmem:[%s4037_s25 + $0x40] sm:$0xff] }
 0xb1f   :  { %v1061_v23 = vsub.f32 1.0, %v1032_v18  ;;  %v1067_v29 = vmul.f32 %v1032_v18, %v3972_v30  ;;  %v1571_v30 = vmax.f32 %v4007_v34, 1.0  ;;  %v1436_v18 = vld [vmem:[%s4037_s25 + $0xa8] sm:$0xff] }
 0xb7d   :  { %v1064_v28 = vpop.permute.xlu0 %1063 }
 0xb7e   :  { %v1066_v31 = vmul.f32 %v1064_v28, %v1061_v23  ;;  %v1422_v23 = vld [vmem:[%s4037_s25 + $0x38] sm:$0xff]  ;;  %v1421_v28 = vld [vmem:[%s4037_s25 + $0x30] sm:$0xff] }
 0xb80   :  { %v1068_v7 = vadd.f32 %v1067_v29, %v1066_v31  ;;  %v1434_v29 = vld [vmem:[%s4037_s25 + $0x98] sm:$0xff]  ;;  %v1420_v31 = vld [vmem:[%s4037_s25 + $0x28] sm:$0xff] }
 0xb82   :  { %v1080_v4 = vmul.f32 %v3991_v25, %v1068_v7 }
 0xb84   :  { %v3996_v3 = vadd.f32 %v1087_v32, %v1080_v4  ;;  %v1419_v32 = vld [vmem:[%s4037_s25 + $0x20] sm:$0xff]  ;;  %v1432_v4 = vld [vmem:[%s4037_s25 + $0x88] sm:$0xff] }
 0xb86   :  { %1090 = vrot.lane.b32.xlu0 %v3996_v3, %s3722_s28 }
 0xb8e   :  { %351 = vrot.lane.b32.xlu0 %v3835_v60, %s3722_s28  ;;  %v1228_v60 = vld [vmem:[%s3290_s6 + $0x8] sm:$0xff] }
 0xb8f   :  { %1250 = vmatpush.msrb.mxu0 %v1228_v60  ;;  %v1417_v60 = vld [vmem:[%s4037_s25 + $0x10] sm:$0xff] }
 0xb96   :  { %638 = vrot.lane.b32.xlu0 %v3900_v0, %s3722_s28  ;;  %v1227_v0 = vld [vmem:[%s3290_s6] sm:$0xff]  ;;  %s3748_s6 = smov 29  }
 0xb97   :  { %1251 = vmatpush.msrb.mxu0 %v1227_v0  ;;  %v1416_v0 = vld [vmem:[%s4037_s25 + $0x8] sm:$0xff] }
 0xb98   :  { %3354 = vmatmul.msk.f32.vlgmr.msrb.gmra.mxu0 %vm149_vm0, %v1226_v35 }
 0xb99   :  { %1377 = vmatpush.msra.mxu0 %v1303_v38  ;;  %v4093_v38 = vld [vmem:[%s4085_s5 + $0x8] sm:$0xff] }
 0xb9b   :  { %1378 = vmatpush.msra.mxu0 %v1301_v40 }
 0xb9e   :  { %1070 = vrot.lane.b32.xlu0 %v1068_v7, %s3722_s28  ;;  %v1433_v7 = vld [vmem:[%s4037_s25 + $0x90] sm:$0xff] }
 0xba6   :  { %1607 = vperm.xlu0 %3481, %v1571_v30   ;;  %v1431_v30 = vld [vmem:[%s4037_s25 + $0x80] sm:$0xff]  ;;  %s3293_s25 = sld [smem:[%s4735_s0 + %s3734_s18]]  }
 0xba7   :  { %s3310_s18 = sld [smem:[%s4735_s0 + %s3751_s13]]  }
 0xbf8   :  { %v1091_v42 = vpop.permute.xlu0 %1090 }
 0xbf9   :  { %3349 = vmatmul.msk.f32.vlgmr.msra.gmra.mxu1 %vm149_vm0, %v1091_v42  ;;  %3350 = vmatmul.msk.f32.vlgmr.msra.gmra.mxu2 %vm149_vm0, %v1091_v42 }
 0xbfa   :  { %3353 = vmatmul.msk.f32.vlgmr.msra.gmra.mxu3 %vm149_vm0, %v1091_v42  ;;  %1485 = vmatpush.msra.mxu2 %v1446_v46 }
 0xbfb   :  { %1447 = vmatpush.msra.mxu1 %v1430_v48 }
 0xbfc   :  { %1486 = vmatpush.msra.mxu2 %v1445_v47 }
 0xbfd   :  { %1448 = vmatpush.msra.mxu1 %v1429_v49 }
 0xbfe   :  { %1487 = vmatpush.msra.mxu2 %v1444_v50 }
 0xbff   :  { %1449 = vmatpush.msra.mxu1 %v1428_v51 }
 0xc00   :  { %v352_v43 = vpop.permute.xlu0 %351  ;;  %1488 = vmatpush.msra.mxu2 %v1443_v52 }
 0xc01   :  { %354 = vst.msk [vmem:[#allocation2] sm:$0xff] %vm149_vm0, %v352_v43  ;;  %3356 = vmatmul.msk.f32.vlgmr.msrb.gmra.mxu2 %vm149_vm0, %v1226_v35  ;;  %3355 = vmatmul.msk.f32.vlgmr.msrb.gmra.mxu1 %vm149_vm0, %v1226_v35  ;;  %v206_v35 = vpop.f32.mrf.mxu0 }
 0xc02   :  { %1489 = vmatpush.msra.mxu2 %v1442_v54  ;;  %1450 = vmatpush.msra.mxu1 %v1427_v56  ;;  %v4090_v37 = vadd.f32 %v3706_v36, %v206_v35 }
 0xc04   :  { %1490 = vmatpush.msra.mxu2 %v1441_v55  ;;  %1451 = vmatpush.msra.mxu1 %v1426_v57 }
 0xc06   :  { %1491 = vmatpush.msra.mxu2 %v1440_v20  ;;  %1452 = vmatpush.msra.mxu1 %v1425_v5  ;;  %v3482_v5 = vpack.i.bf16 %v4097_v39, %v4093_v38 }
 0xc08   :  { %v639_v44 = vpop.permute.xlu0 %638  ;;  %v4039_v45 = vld [vmem:[#allocation2] sm:$0xff]  ;;  %1492 = vmatpush.msra.mxu2 %v1439_v1  ;;  %1453 = vmatpush.msra.mxu1 %v1424_v15 }
 0xc09   :  { %642 = vst.msk [vmem:[#allocation2 + $0x10] sm:$0xff] %vm149_vm0, %v639_v44  ;;  %3357 = vmatmul.msk.f32.vlgmr.msrb.gmra.mxu3 %vm149_vm0, %v4039_v45  ;;  %3364 = vmatmul.msk.f32.vlgmr.msra.gmra.mxu0 %vm149_vm0, %v4039_v45 }
 0xc0a   :  { %1493 = vmatpush.msra.mxu2 %v1438_v14  ;;  %1454 = vmatpush.msra.mxu1 %v1423_v11 }
 0xc0c   :  { %1494 = vmatpush.msra.mxu2 %v1437_v17  ;;  %1455 = vmatpush.msra.mxu1 %v1422_v23  ;;  %v3707_v17 = vld [vmem:[%s3811_s21] ss:$0 sm:$0xff]  ;;  %s3731_s21 = smov 9  }
 0xc0d   :  { %s3288_s7 = sld [smem:[%s4735_s0 + %s3731_s21]]   ;;  %s3738_s21 = smov 21  }
 0xc0e   :  { %1495 = vmatpush.msra.mxu2 %v1436_v18  ;;  %1456 = vmatpush.msra.mxu1 %v1421_v28 }
 0xc10   :  { %v1071_v53 = vpop.permute.xlu0 %1070  ;;  %1496 = vmatpush.msra.mxu2 %v1435_v24  ;;  %1457 = vmatpush.msra.mxu1 %v1420_v31 }
 0xc11   :  { %1074 = vst.msk [vmem:[#allocation2 + $0x28] sm:$0xff] %vm149_vm0, %v1071_v53 }
 0xc12   :  { %1497 = vmatpush.msra.mxu2 %v1434_v29  ;;  %1458 = vmatpush.msra.mxu1 %v1419_v32  ;;  %v4127_v32 = vld [vmem:[#allocation2 + $0x10] sm:$0xff] }
 0xc14   :  { %1498 = vmatpush.msra.mxu2 %v1433_v7  ;;  %1459 = vmatpush.msra.mxu1 %v1418_v8 }
 0xc15   :  { %v4101_v43 = vpop.f32.mrf.mxu0 }
 0xc16   :  { %1499 = vmatpush.msra.mxu2 %v1432_v4  ;;  %1460 = vmatpush.msra.mxu1 %v1417_v60 }
 0xc18   :  { %1500 = vmatpush.msra.mxu2 %v1431_v30  ;;  %1461 = vmatpush.msra.mxu1 %v1416_v0 }
 0xc1a   :  { %1462 = vmatpush.msra.mxu1 %v1415_v6  ;;  %1994 = vmatpush.msrb.mxu2 %v4093_v38 }
 0xc1c   :  { %1995 = vmatpush.msrb.mxu2 %v4097_v39 }
 0xc76   :  { %v1111_v40 = vpop.f32.mrf.mxu1 }
 0xc77   :  { %v1134_v10 = vadd.f32 %v1111_v40, %v4090_v37 }
 0xc79   :  { %v3351_v41 = vmul.f32 -1.442695, %v1134_v10 }
 0xc7b   :  { %3572 = vpow2.f32 %v3351_v41 }
 0xc7c   :  { %v1131_v42 = vpop.f32.mrf.mxu2 }
 0xc7d   :  { %1155 = vrot.lane.b32.xlu2 %v1131_v42, %s3719_s23  ;;  %v1195_v47 = vpop.f32.mrf.mxu3 }
 0xc7e   :  { %v4109_v52 = vpop.f32.mrf.mxu1  ;;  %v1196_v11 = vadd.f32 %v3707_v17, %v1195_v47 }
 0xc81   :  { %v3573_v44 = vpop.eup %3572 }
 0xc82   :  { %v1138_v46 = vadd.f32 1.0, %v3573_v44 }
 0xc84   :  { %3574 = vrcp.f32 %v1138_v46  ;;  %v4104_v48 = vpop.f32.mrf.mxu2  ;;  %v1150_v20 = vand.u32 2147483648, %v1138_v46  ;;  %vm1144_vm5 = vweird.f32 %v1138_v46 }
 0xc85   :  { %494 = vrot.lane.b32.xlu2 %v3870_v63, %s3722_s28  ;;  %v1148_v63 = vand.u32 2147483647, %v1138_v46 }
 0xc86   :  { %v1380_v49 = vpop.f32.mrf.mxu0  ;;  %v1151_v14 = vor.u32 1.1754944e-38, %v1150_v20 }
 0xc87   :  { %v1402_v50 = vmul.f32 %v1380_v49, %v4104_v48  ;;  %vm1149_vm7 = vcmp.eq.f32.partialorder %v1148_v63, 8.507059e+37 }
 0xc89   :  { %1501 = vmatmul.f32.vlgmr.msra.gmra.mxu2 %v1402_v50 }
 0xc8a   :  { %v3575_v51 = vpop.eup %3574 }
 0xc8b   :  { %v1140_v53 = vmul.f32 %v3575_v51, %v1138_v46  ;;  %vm1145_vm4 = vweird.f32 %v3575_v51 }
 0xc8c   :  { %v1342_v54 = vpop.f32.mrf.mxu3  ;;  %vm1146_vm6 = vmor %vm1144_vm5, %vm1145_vm4 }
 0xc8d   :  { %v1141_v55 = vsub.f32 1.0, %v1140_v53  ;;  %v1401_v56 = vmul.f32 %v1342_v54, %v4109_v52  ;;  %926 = vrot.lane.b32.xlu2 %v3964_v16, %s3722_s28  ;;  %v3378_v16 = vadd.f32 -1.0, %v4007_v34 }
 0xc8f   :  { %v1142_v57 = vmul.f32 %v3575_v51, %v1141_v55  ;;  %1463 = vmatmul.f32.vlgmr.msra.gmra.mxu1 %v1401_v56  ;;  %v1573_v24 = vmax.f32 %v3378_v16, 1.0 }
 0xc91   :  { %v1143_v1 = vadd.f32 %v3575_v51, %v1142_v57 }
 0xc93   :  { %v1147_v15 = vsel %vm1146_vm6, %v3575_v51, %v1143_v1 }
 0xc94   :  { %v1152_v18 = vsel %vm1149_vm7, %v1151_v14, %v1147_v15 }
 0xc95   :  { %v1198_v23 = vmul.f32 %v1196_v11, %v1152_v18  ;;  %3483 = vrot.lane.b32.xlu2 %v3482_v5, %s3730_s17  ;;  %v224_v18 = vld [vmem:[%s3826_s27 + $0x30] sm:$0xff]  ;;  %s4422_s17 = sld [smem:[%s4735_s0 + %s3736_s2]]  }
 0xc97   :  { %1200 = vrot.lane.b32.xlu1 %v1198_v23, %s3718_s22  ;;  %s3304_s22 = sld [smem:[%s4735_s0 + %s3747_s4]]  }
 0xc9d   :  { %1668 = vperm.xlu2 %3480, %v1573_v24   ;;  %v1524_v24 = vld [vmem:[%s3288_s7 + $0x8] sm:$0xff] }
 0xc9e   :  { %1539 = vmatpush.msra.mxu3 %v1524_v24 }
 0xcd7   :  { %v1156_v28 = vpop.permute.xlu2 %1155 }
 0xcd8   :  { %v1158_v6 = vadd.f32 %v1156_v28, %v4090_v37  ;;  %v1523_v28 = vld [vmem:[%s3288_s7] sm:$0xff]  ;;  %s3300_s7 = sld [smem:[%s4735_s0 + %s3738_s21]]  }
 0xcd9   :  { %1540 = vmatpush.msra.mxu3 %v1523_v28 }
 0xcda   :  { %v3352_v35 = vmul.f32 -1.442695, %v1158_v6 }
 0xcdf   :  { %v495_v29 = vpop.permute.xlu2 %494 }
 0xce0   :  { %498 = vst.msk [vmem:[#allocation2 + $0x8] sm:$0xff] %vm149_vm0, %v495_v29 }
 0xce7   :  { %v927_v31 = vpop.permute.xlu2 %926  ;;  %v4120_v7 = vld [vmem:[#allocation2 + $0x8] sm:$0xff] }
 0xce8   :  { %930 = vst.msk [vmem:[#allocation2 + $0x20] sm:$0xff] %vm149_vm0, %v927_v31  ;;  %3358 = vmatmul.msk.f32.gmra.mxu3 %vm149_vm0, %v4120_v7  ;;  %3365 = vmatmul.msk.f32.gmra.mxu0 %vm149_vm0, %v4120_v7 }
 0xcef   :  { %v3484_v34 = vpop.permute.xlu2 %3483  ;;  %v4158_v16 = vld [vmem:[#allocation2 + $0x20] sm:$0xff] }
 0xcf0   :  { %v4129_v4 = vunpack.i.l.bf16 %v3484_v34  ;;  %3359 = vmatmul.msk.f32.gmra.mxu3 %vm149_vm0, %v4127_v32  ;;  %3366 = vmatmul.msk.f32.gmra.mxu0 %vm149_vm0, %v4127_v32  ;;  %v4135_v8 = vunpack.i.h.bf16 %v3484_v34 }
 0xcf2   :  { %2022 = vmatpush.msra.mxu2 %v4129_v4  ;;  %2165 = vmatpush.msrb.mxu3 %v4129_v4 }
 0xcf4   :  { %2023 = vmatpush.msra.mxu2 %v4135_v8  ;;  %2166 = vmatpush.msrb.mxu3 %v4135_v8 }
 0xd09   :  { %v1201_v30 = vpop.permute.xlu1 %1200 }
 0xd0a   :  { %v1203_v60 = vadd.f32 %v1201_v30, %v4090_v37 }
 0xd0c   :  { %3576 = vtanh.f32 %v1203_v60 }
 0xd0d   :  { %3578 = vpow2.f32 %v3352_v35 }
 0xd12   :  { %v3577_v0 = vpop.eup %3576 }
 0xd13   :  { %1207 = vrot.lane.b32.xlu1 %v3577_v0, %s3722_s28  ;;  %v3579_v36 = vpop.eup %3578 }
 0xd14   :  { %v1162_v40 = vadd.f32 1.0, %v3579_v36 }
 0xd16   :  { %3580 = vrcp.f32 %v1162_v40  ;;  %v1174_v55 = vand.u32 2147483648, %v1162_v40  ;;  %vm1168_vm9 = vweird.f32 %v1162_v40  ;;  %v1172_v56 = vand.u32 2147483647, %v1162_v40 }
 0xd18   :  { %v1175_v57 = vor.u32 1.1754944e-38, %v1174_v55  ;;  %vm1173_vm11 = vcmp.eq.f32.partialorder %v1172_v56, 8.507059e+37 }
 0xd1b   :  { %782 = vrot.lane.b32.xlu1 %v3932_v21, %s3722_s28 }
 0xd1c   :  { %v3581_v42 = vpop.eup %3580 }
 0xd1d   :  { %v1164_v21 = vmul.f32 %v3581_v42, %v1162_v40  ;;  %vm1169_vm8 = vweird.f32 %v3581_v42 }
 0xd1e   :  { %vm1170_vm10 = vmor %vm1168_vm9, %vm1169_vm8 }
 0xd1f   :  { %v1165_v37 = vsub.f32 1.0, %v1164_v21 }
 0xd21   :  { %v1166_v53 = vmul.f32 %v3581_v42, %v1165_v37 }
 0xd23   :  { %v1167_v54 = vadd.f32 %v3581_v42, %v1166_v53 }
 0xd25   :  { %v1171_v20 = vsel %vm1170_vm10, %v3581_v42, %v1167_v54 }
 0xd26   :  { %v1176_v63 = vsel %vm1173_vm11, %v1175_v57, %v1171_v20 }
 0xd27   :  { %v1205_v1 = vsub.f32 1.0, %v1176_v63  ;;  %v1211_v14 = vmul.f32 %v1176_v63, %v3996_v3  ;;  %v4164_v3 = vld [vmem:[#allocation2 + $0x28] sm:$0xff]  ;;  %v3503_v63 = vld [vmem:[%s4059_s1] ss:$0 sm:$0xff]  ;;  %s4338_s1 = sld [smem:[%s4735_s0 + %s3735_s26]]  }
 0xd65   :  { %v1383_v10 = vpop.f32.mrf.mxu0 }
 0xd66   :  { %v1404_v41 = vmul.f32 %v1383_v10, %v4104_v48 }
 0xd68   :  { %1504 = vmatmul.f32.gmra.mxu2 %v1404_v41 }
 0xd6b   :  { %v1345_v44 = vpop.f32.mrf.mxu3 }
 0xd6c   :  { %v1403_v46 = vmul.f32 %v1345_v44, %v4109_v52 }
 0xd6d   :  { %v1386_v47 = vpop.f32.mrf.mxu0 }
 0xd6e   :  { %v1406_v49 = vmul.f32 %v1386_v47, %v4104_v48  ;;  %1466 = vmatmul.f32.gmra.mxu1 %v1403_v46  ;;  %v1933_v46 = vld [vmem:[%s3297_s11 + $0x8] sm:$0xff]  ;;  %v1932_v47 = vld [vmem:[%s3297_s11] sm:$0xff]  ;;  %s3741_s11 = smov 22  }
 0xd6f   :  { %1952 = vmatpush.msrb.mxu1 %v1933_v46  ;;  %s3301_s15 = sld [smem:[%s4735_s0 + %s3741_s11]]  }
 0xd70   :  { %1507 = vmatmul.f32.gmra.mxu2 %v1406_v49 }
 0xd71   :  { %1953 = vmatpush.msrb.mxu1 %v1932_v47 }
 0xd73   :  { %v1348_v50 = vpop.f32.mrf.mxu3  ;;  %2721 = vmatpush.msra.mxu1 %v4093_v38  ;;  %v1502_v38 = vpop.f32.mrf.mxu2 }
 0xd74   :  { %v1405_v51 = vmul.f32 %v1348_v50, %v4109_v52 }
 0xd75   :  { %2722 = vmatpush.msra.mxu1 %v4097_v39 }
 0xd76   :  { %1469 = vmatmul.f32.gmra.mxu1 %v1405_v51 }
 0xd85   :  { %v1208_v5 = vpop.permute.xlu1 %1207 }
 0xd86   :  { %v1210_v15 = vmul.f32 %v1208_v5, %v1205_v1 }
 0xd88   :  { %v1212_v17 = vadd.f32 %v1211_v14, %v1210_v15 }
 0xd8a   :  { %1214 = vrot.lane.b32.xlu1 %v1212_v17, %s3722_s28  ;;  %v1608_v17 = vpop.permute.xlu0 %1607 }
 0xd8d   :  { %v783_v11 = vpop.permute.xlu1 %782 }
 0xd8e   :  { %786 = vst.msk [vmem:[#allocation2 + $0x18] sm:$0xff] %vm149_vm0, %v783_v11  ;;  %v1254_v11 = vadd.f32 %v3503_v63, %v4101_v43 }
 0xd92   :  { %1576 = vperm.xlu1 %3479, %v224_v18  }
 0xd95   :  { %v4152_v23 = vld [vmem:[#allocation2 + $0x18] sm:$0xff] }
 0xd96   :  { %3360 = vmatmul.msk.f32.gmra.mxu3 %vm149_vm0, %v4152_v23  ;;  %3367 = vmatmul.msk.f32.gmra.mxu0 %vm149_vm0, %v4152_v23 }
 0xd9e   :  { %3361 = vmatmul.msk.f32.gmra.mxu3 %vm149_vm0, %v4158_v16  ;;  %3368 = vmatmul.msk.f32.gmra.mxu0 %vm149_vm0, %v4158_v16 }
 0xda6   :  { %3362 = vmatmul.msk.f32.gmra.mxu3 %vm149_vm0, %v4164_v3  ;;  %3369 = vmatmul.msk.f32.gmra.mxu0 %vm149_vm0, %v4164_v3 }
 0xdfc   :  { %v1215_v29 = vpop.permute.xlu1 %1214 }
 0xdfd   :  { %1218 = vst.msk [vmem:[#allocation2 + $0x30] sm:$0xff] %vm149_vm0, %v1215_v29 }
 0xe04   :  { %v1225_v31 = vld [vmem:[#allocation2 + $0x30] sm:$0xff] }
 0xe05   :  { %3363 = vmatmul.msk.f32.gmra.mxu3 %vm149_vm0, %v1225_v31  ;;  %3370 = vmatmul.msk.f32.gmra.mxu0 %vm149_vm0, %v1225_v31 }
 0xe0d   :  { %3371 = vmatmul.msk.f32.vlgmr.msra.gmra.mxu3 %vm149_vm0, %v4039_v45 }
 0xe0e   :  { %2309 = vmatpush.msra.mxu3 %v4129_v4 }
 0xe10   :  { %2310 = vmatpush.msra.mxu3 %v4135_v8 }
 0xe13   :  { %v1389_v34 = vpop.f32.mrf.mxu0 }
 0xe14   :  { %v1408_v30 = vmul.f32 %v1389_v34, %v4104_v48  ;;  %v1610_v34 = vperm.slane %v1608_v17, 0 }
 0xe15   :  { %3372 = vmatmul.msk.f32.gmra.mxu3 %vm149_vm0, %v4120_v7 }
 0xe16   :  { %1510 = vmatmul.f32.gmra.mxu2 %v1408_v30  ;;  %3582 = vrcp.f32 %v1610_v34  ;;  %vm1616_vm13 = vweird.f32 %v1610_v34 }
 0xe19   :  { %v1351_v60 = vpop.f32.mrf.mxu3 }
 0xe1a   :  { %v1407_v0 = vmul.f32 %v1351_v60, %v4109_v52 }
 0xe1b   :  { %v1392_v6 = vpop.f32.mrf.mxu0 }
 0xe1c   :  { %v1410_v35 = vmul.f32 %v1392_v6, %v4104_v48  ;;  %1472 = vmatmul.f32.gmra.mxu1 %v1407_v0 }
 0xe1d   :  { %3373 = vmatmul.msk.f32.gmra.mxu3 %vm149_vm0, %v4127_v32 }
 0xe1e   :  { %1513 = vmatmul.f32.gmra.mxu2 %v1410_v35 }
 0xe21   :  { %v1354_v36 = vpop.f32.mrf.mxu3 }
 0xe22   :  { %v1409_v40 = vmul.f32 %v1354_v36, %v4109_v52 }
 0xe23   :  { %v1395_v10 = vpop.f32.mrf.mxu0 }
 0xe24   :  { %v1412_v41 = vmul.f32 %v1395_v10, %v4104_v48  ;;  %1475 = vmatmul.f32.gmra.mxu1 %v1409_v40 }
 0xe25   :  { %3374 = vmatmul.msk.f32.gmra.mxu3 %vm149_vm0, %v4152_v23 }
 0xe26   :  { %1516 = vmatmul.f32.gmra.mxu2 %v1412_v41 }
 0xe29   :  { %v1357_v42 = vpop.f32.mrf.mxu3 }
 0xe2a   :  { %v1411_v44 = vmul.f32 %v1357_v42, %v4109_v52 }
 0xe2c   :  { %1478 = vmatmul.f32.gmra.mxu1 %v1411_v44 }
 0xe2d   :  { %3375 = vmatmul.msk.f32.gmra.mxu3 %vm149_vm0, %v4158_v16 }
 0xe35   :  { %3376 = vmatmul.msk.f32.gmra.mxu3 %vm149_vm0, %v4164_v3 }
 0xe3d   :  { %3377 = vmatmul.msk.f32.gmra.mxu3 %vm149_vm0, %v1225_v31 }
 0xe82   :  { %v1398_v49 = vpop.f32.mrf.mxu0 }
 0xe83   :  { %v1414_v21 = vmul.f32 %v1398_v49, %v4104_v48  ;;  %v1505_v48 = vpop.f32.mrf.mxu2 }
 0xe85   :  { %1519 = vmatmul.f32.gmra.mxu2 %v1414_v21 }
 0xe88   :  { %v1360_v37 = vpop.f32.mrf.mxu3 }
 0xe89   :  { %v1413_v50 = vmul.f32 %v1360_v37, %v4109_v52 }
 0xe8b   :  { %1481 = vmatmul.f32.gmra.mxu1 %v1413_v50 }
 0xe8d   :  { %1996 = vmatmul.f32.vlgmr.msrb.gmra.mxu2 %v3716_v9 }
 0xe93   :  { %3393 = vmatmul.msk.f32.vlgmr.msrb.gmra.mxu1 %vm149_vm0, %v4039_v45  ;;  %v1464_v45 = vpop.f32.mrf.mxu1 }
 0xe94   :  { %2885 = vmatpush.msrb.mxu1 %v4129_v4  ;;  %v1503_v5 = vadd.f32 %v1502_v38, %v1464_v45  ;;  %v3583_v38 = vpop.eup %3582 }
 0xe95   :  { %2024 = vmatmul.f32.vlgmr.msra.gmra.mxu2 %v3716_v9  ;;  %v1542_v9 = vpop.f32.mrf.mxu3  ;;  %vm1617_vm12 = vweird.f32 %v3583_v38 }
 0xe96   :  { %2886 = vmatpush.msrb.mxu1 %v4135_v8  ;;  %v1543_v18 = vadd.f32 %v1542_v9, %v1503_v5  ;;  %vm1618_vm14 = vmor %vm1616_vm13, %vm1617_vm12 }
 0xe98   :  { %v4232_v60 = vadd.f32 %v1543_v18, %v1254_v11 }
 0xe9a   :  { %v1579_v10 = vmul.f32 %v4232_v60, %v3839_v62 }
 0xe9b   :  { %3394 = vmatmul.msk.f32.gmra.mxu1 %vm149_vm0, %v4120_v7  ;;  %v1467_v39 = vpop.f32.mrf.mxu1 }
 0xe9c   :  { %v1506_v1 = vadd.f32 %v1505_v48, %v1467_v39  ;;  %v1586_v49 = vsel %vm149_vm0, %v1579_v10, 0.0  ;;  %v1669_v10 = vpop.permute.xlu2 %1668 }
 0xe9d   :  { %v1545_v52 = vpop.f32.mrf.mxu3 }
 0xe9e   :  { %v1546_v15 = vadd.f32 %v1545_v52, %v1506_v1 }
 0xea0   :  { %v4230_v28 = vadd.f32 %v1546_v15, %v1254_v11 }
 0xea2   :  { %v1580_v43 = vmul.f32 %v4230_v28, %v3868_v59 }
 0xea3   :  { %3395 = vmatmul.msk.f32.gmra.mxu1 %vm149_vm0, %v4127_v32  ;;  %v1470_v7 = vpop.f32.mrf.mxu1  ;;  %v1508_v32 = vpop.f32.mrf.mxu2 }
 0xea4   :  { %v1509_v14 = vadd.f32 %v1508_v32, %v1470_v7  ;;  %v1587_v44 = vsel %vm149_vm0, %v1580_v43, 0.0 }
 0xea5   :  { %v1548_v51 = vpop.f32.mrf.mxu3  ;;  %v1588_v50 = vadd.f32 %v1587_v44, %v1586_v49 }
 0xeab   :  { %3396 = vmatmul.msk.f32.gmra.mxu1 %vm149_vm0, %v4152_v23  ;;  %v1473_v53 = vpop.f32.mrf.mxu1  ;;  %v1511_v54 = vpop.f32.mrf.mxu2 }
 0xeac   :  { %v1512_v23 = vadd.f32 %v1511_v54, %v1473_v53  ;;  %v1612_v54 = vmul.f32 %v3583_v38, %v1610_v34 }
 0xead   :  { %v1551_v55 = vpop.f32.mrf.mxu3 }
 0xeae   :  { %v1613_v5 = vsub.f32 1.0, %v1612_v54 }
 0xeb3   :  { %3397 = vmatmul.msk.f32.gmra.mxu1 %vm149_vm0, %v4158_v16  ;;  %v1476_v56 = vpop.f32.mrf.mxu1  ;;  %v1514_v20 = vpop.f32.mrf.mxu2  ;;  %v1549_v16 = vadd.f32 %v1548_v51, %v1509_v14 }
 0xeb4   :  { %v1515_v29 = vadd.f32 %v1514_v20, %v1476_v56 }
 0xeb5   :  { %v1554_v57 = vpop.f32.mrf.mxu3  ;;  %v4234_v0 = vadd.f32 %v1549_v16, %v1254_v11  ;;  %v1614_v16 = vmul.f32 %v3583_v38, %v1613_v5 }
 0xeb6   :  { %v1555_v35 = vadd.f32 %v1554_v57, %v1515_v29  ;;  %v4262_v57 = vpop.permute.xlu1 %1576 }
 0xeb7   :  { %v1581_v41 = vmul.f32 %v4234_v0, %v3902_v13 }
 0xeb8   :  { %v4244_v42 = vadd.f32 %v1555_v35, %v1254_v11  ;;  %v1620_v35 = vand.u32 2147483647, %v1610_v34 }
 0xeb9   :  { %v1589_v21 = vsel %vm149_vm0, %v1581_v41, 0.0 }
 0xeba   :  { %v1583_v37 = vmul.f32 %v4244_v42, %v3966_v27  ;;  %v1590_v7 = vadd.f32 %v1589_v21, %v1588_v50  ;;  %vm1621_vm15 = vcmp.eq.f32.partialorder %v1620_v35, 8.507059e+37  ;;  %v1671_v21 = vperm.slane %v1669_v10, 0 }
 0xebb   :  { %3398 = vmatmul.msk.f32.gmra.mxu1 %vm149_vm0, %v4164_v3  ;;  %v1479_v3 = vpop.f32.mrf.mxu1  ;;  %v1517_v24 = vpop.f32.mrf.mxu2 }
 0xebc   :  { %v1518_v6 = vadd.f32 %v1517_v24, %v1479_v3  ;;  %v1593_v51 = vsel %vm149_vm0, %v1583_v37, 0.0  ;;  %v1615_v24 = vadd.f32 %v3583_v38, %v1614_v16  ;;  %3584 = vrcp.f32 %v1671_v21 }
 0xebd   :  { %v1557_v30 = vpop.f32.mrf.mxu3  ;;  %vm1677_vm2 = vweird.f32 %v1671_v21 }
 0xebe   :  { %v1558_v40 = vadd.f32 %v1557_v30, %v1518_v6  ;;  %v1622_v6 = vand.u32 2147483648, %v1610_v34 }
 0xec0   :  { %v4249_v47 = vadd.f32 %v1558_v40, %v1254_v11  ;;  %v1619_v40 = vsel %vm1618_vm14, %v3583_v38, %v1615_v24  ;;  %v1623_v44 = vor.u32 1.1754944e-38, %v1622_v6 }
 0xec2   :  { %v1584_v48 = vmul.f32 %v4249_v47, %v3991_v25  ;;  %v1624_v49 = vsel %vm1621_vm15, %v1623_v44, %v1619_v40 }
 0xec3   :  { %3399 = vmatmul.msk.f32.gmra.mxu1 %vm149_vm0, %v1225_v31  ;;  %v1552_v31 = vadd.f32 %v1551_v55, %v1512_v23 }
 0xec4   :  { %v1595_v56 = vsel %vm149_vm0, %v1584_v48, 0.0 }
 0xec5   :  { %v4238_v36 = vadd.f32 %v1552_v31, %v1254_v11  ;;  %v1560_v32 = vpop.f32.mrf.mxu3 }
 0xec7   :  { %v1582_v46 = vmul.f32 %v4238_v36, %v3934_v22 }
 0xec9   :  { %v1591_v39 = vsel %vm149_vm0, %v1582_v46, 0.0 }
 0xeca   :  { %v1592_v55 = vadd.f32 %v1591_v39, %v1590_v7 }
 0xecc   :  { %v1594_v63 = vadd.f32 %v1593_v51, %v1592_v55 }
 0xece   :  { %v1596_v14 = vadd.f32 %v1595_v56, %v1594_v63 }
 0xf08   :  { %v1482_v9 = vpop.f32.mrf.mxu1  ;;  %v1520_v45 = vpop.f32.mrf.mxu2 }
 0xf09   :  { %v1521_v52 = vadd.f32 %v1520_v45, %v1482_v9 }
 0xf0b   :  { %v1561_v53 = vadd.f32 %v1560_v32, %v1521_v52 }
 0xf0d   :  { %v4260_v20 = vadd.f32 %v1561_v53, %v1254_v11 }
 0xf0f   :  { %v1585_v1 = vmul.f32 %v4262_v57, %v4260_v20 }
 0xf10   :  { %v4266_v15 = vpop.f32.mrf.mxu1  ;;  %v1997_v17 = vpop.f32.mrf.mxu2 }
 0xf11   :  { %v1597_v18 = vsel %vm149_vm0, %v1585_v1, 0.0  ;;  %2029 = vrot.lane.b32.xlu2 %v1997_v17, %s3719_s23 }
 0xf12   :  { %v1598_v23 = vadd.f32 %v1597_v18, %v1596_v14 }
 0xf14   :  { %v1599_v3 = vrot.slane %v1598_v23, 4 }
 0xf16   :  { %v1600_v11 = vadd.f32 %v1599_v3, %v1598_v23  ;;  %v3585_v23 = vpop.eup %3584 }
 0xf17   :  { %v1673_v35 = vmul.f32 %v3585_v23, %v1671_v21  ;;  %vm1678_vm1 = vweird.f32 %v3585_v23 }
 0xf18   :  { %v1601_v29 = vrot.slane %v1600_v11, 2  ;;  %v4270_v31 = vpop.f32.mrf.mxu1  ;;  %v2025_v30 = vpop.f32.mrf.mxu2  ;;  %vm1679_vm3 = vmor %vm1677_vm2, %vm1678_vm1 }
 0xf19   :  { %2058 = vrot.lane.b32.xlu0 %v2025_v30, %s3727_s19 }
 0xf1a   :  { %v1602_v43 = vadd.f32 %v1601_v29, %v1600_v11 }
 0xf1c   :  { %v1603_v41 = vrot.slane %v1602_v43, 1 }
 0xf1e   :  { %v1604_v46 = vadd.f32 %v1603_v41, %v1602_v43 }
 0xf20   :  { %v1625_v37 = vmul.f32 %v1624_v49, %v1604_v46  ;;  %v4273_v50 = vpop.f32.mrf.mxu1  ;;  %v1674_v49 = vsub.f32 1.0, %v1673_v35 }
 0xf22   :  { %v4276_v9 = vsub.f32 %v4232_v60, %v1625_v37  ;;  %v4279_v45 = vsub.f32 %v4230_v28, %v1625_v37  ;;  %v4282_v34 = vsub.f32 %v4234_v0, %v1625_v37  ;;  %v4285_v38 = vsub.f32 %v4238_v36, %v1625_v37 }
 0xf23   :  { %v4288_v39 = vsub.f32 %v4244_v42, %v1625_v37  ;;  %v4291_v48 = vsub.f32 %v4249_v47, %v1625_v37  ;;  %v4302_v53 = vsub.f32 %v4260_v20, %v1625_v37 }
 0xf24   :  { %v1633_v52 = vmul.f32 %v4276_v9, %v3839_v62  ;;  %v1634_v7 = vmul.f32 %v4279_v45, %v3868_v59  ;;  %v1635_v32 = vmul.f32 %v4282_v34, %v3902_v13  ;;  %v1636_v51 = vmul.f32 %v4285_v38, %v3934_v22 }
 0xf25   :  { %v1637_v54 = vmul.f32 %v4288_v39, %v3966_v27  ;;  %v1638_v1 = vmul.f32 %v4291_v48, %v3991_v25  ;;  %v1639_v3 = vmul.f32 %v4302_v53, %v4262_v57 }
 0xf26   :  { %v1640_v55 = vmul.f32 %v1633_v52, %v1633_v52  ;;  %v1641_v56 = vmul.f32 %v1634_v7, %v1634_v7  ;;  %v1642_v63 = vmul.f32 %v1635_v32, %v1635_v32  ;;  %v1643_v5 = vmul.f32 %v1636_v51, %v1636_v51 }
 0xf27   :  { %v1644_v11 = vmul.f32 %v1637_v54, %v1637_v54  ;;  %v1645_v30 = vmul.f32 %v1638_v1, %v1638_v1  ;;  %v1646_v40 = vmul.f32 %v1639_v3, %v1639_v3  ;;  %v1675_v32 = vmul.f32 %v3585_v23, %v1674_v49 }
 0xf28   :  { %v1647_v14 = vsel %vm149_vm0, %v1640_v55, 0.0  ;;  %v1648_v17 = vsel %vm149_vm0, %v1641_v56, 0.0  ;;  %v4310_v18 = vpop.f32.mrf.mxu1  ;;  %v1650_v24 = vsel %vm149_vm0, %v1642_v63, 0.0  ;;  %v1652_v6 = vsel %vm149_vm0, %v1643_v5, 0.0  ;;  %v4322_v55 = vld [vmem:[%s4209_s16] ss:$0 sm:$0xff] }
 0xf29   :  { %v1649_v16 = vadd.f32 %v1648_v17, %v1647_v14  ;;  %v1654_v10 = vsel %vm149_vm0, %v1644_v11, 0.0  ;;  %v1656_v44 = vsel %vm149_vm0, %v1645_v30, 0.0  ;;  %v1658_v52 = vsel %vm149_vm0, %v1646_v40, 0.0 }
 0xf2a   :  { %v1676_v63 = vadd.f32 %v3585_v23, %v1675_v32  ;;  %v1683_v14 = vand.u32 2147483648, %v1671_v21  ;;  %v1681_v17 = vand.u32 2147483647, %v1671_v21 }
 0xf2b   :  { %v1651_v29 = vadd.f32 %v1650_v24, %v1649_v16 }
 0xf2c   :  { %v1680_v3 = vsel %vm1679_vm3, %v3585_v23, %v1676_v63  ;;  %v1684_v24 = vor.u32 1.1754944e-38, %v1683_v14  ;;  %vm1682_vm4 = vcmp.eq.f32.partialorder %v1681_v17, 8.507059e+37 }
 0xf2d   :  { %v1653_v43 = vadd.f32 %v1652_v6, %v1651_v29 }
 0xf2e   :  { %v1685_v30 = vsel %vm1682_vm4, %v1684_v24, %v1680_v3  ;;  %v1838_v24 = vld [vmem:[%s4338_s1] sm:$0x1] }
 0xf2f   :  { %v1655_v41 = vadd.f32 %v1654_v10, %v1653_v43 }
 0xf30   :  { %v4318_v46 = vpop.f32.mrf.mxu1 }
 0xf31   :  { %v1657_v37 = vadd.f32 %v1656_v44, %v1655_v41 }
 0xf33   :  { %v1659_v7 = vadd.f32 %v1658_v52, %v1657_v37 }
 0xf35   :  { %v1660_v51 = vrot.slane %v1659_v7, 4 }
 0xf37   :  { %v1661_v54 = vadd.f32 %v1660_v51, %v1659_v7  ;;  %v1868_v51 = vld [vmem:[%s3293_s25 + $0x8] sm:$0xff] }
 0xf38   :  { %v1970_v56 = vpop.f32.mrf.mxu1  ;;  %1908 = vmatpush.msrb.mxu0 %v1868_v51 }
 0xf39   :  { %v1662_v1 = vrot.slane %v1661_v54, 2  ;;  %v4325_v5 = vadd.f32 %v4322_v55, %v1970_v56 }
 0xf3b   :  { %v1663_v16 = vadd.f32 %v1662_v1, %v1661_v54  ;;  %v1867_v54 = vld [vmem:[%s3293_s25] sm:$0xff] }
 0xf3c   :  { %1909 = vmatpush.msrb.mxu0 %v1867_v54 }
 0xf3d   :  { %v1664_v11 = vrot.slane %v1663_v16, 1 }
 0xf3f   :  { %v1665_v29 = vadd.f32 %v1664_v11, %v1663_v16 }
 0xf41   :  { %v1686_v6 = vmul.f32 %v1685_v30, %v1665_v29  ;;  %v1839_v30 = vsub.f32 1.0, %v1838_v24 }
 0xf43   :  { %v1687_v35 = vadd.f32 1e-08, %v1686_v6 }
 0xf45   :  { %3586 = vrsqrt.f32 %v1687_v35  ;;  %vm1694_vm6 = vweird.f32 %v1687_v35 }
 0xf4b   :  { %v3587_v43 = vpop.eup %3586 }
 0xf4c   :  { %v1689_v40 = vmul.f32 %v3587_v43, %v1687_v35  ;;  %vm1695_vm5 = vweird.f32 %v3587_v43 }
 0xf4d   :  { %vm1696_vm7 = vmor %vm1694_vm6, %vm1695_vm5 }
 0xf4e   :  { %v1690_v10 = vmul.f32 %v3587_v43, %v1689_v40 }
 0xf50   :  { %v1691_v41 = vmul.f32 0.5, %v1690_v10 }
 0xf52   :  { %v1692_v44 = vsub.f32 1.5, %v1691_v41 }
 0xf54   :  { %v1693_v21 = vmul.f32 %v3587_v43, %v1692_v44 }
 0xf56   :  { %v1697_v23 = vsel %vm1696_vm7, %v3587_v43, %v1693_v21  ;;  %v4350_v43 = vadd.f32 %v4322_v55, %v4266_v15 }
 0xf57   :  { %v1698_v49 = vmul.f32 %v1697_v23, %v4276_v9  ;;  %v1699_v37 = vmul.f32 %v1697_v23, %v4279_v45  ;;  %v1700_v52 = vmul.f32 %v1697_v23, %v4282_v34  ;;  %v1701_v7 = vmul.f32 %v1697_v23, %v4285_v38 }
 0xf58   :  { %v1702_v14 = vmul.f32 %v1697_v23, %v4288_v39  ;;  %v1703_v34 = vmul.f32 %v1697_v23, %v4291_v48  ;;  %v1704_v48 = vmul.f32 %v1697_v23, %v4302_v53 }
 0xf59   :  { %v3379_v32 = vmul.f32 -1.442695, %v1698_v49  ;;  %v3380_v56 = vmul.f32 -1.442695, %v1699_v37  ;;  %v3381_v63 = vmul.f32 -1.442695, %v1700_v52 }
 0xf5a   :  { %v3382_v1 = vmul.f32 -1.442695, %v1701_v7  ;;  %v3383_v45 = vmul.f32 -1.442695, %v1702_v14  ;;  %v3384_v11 = vmul.f32 -1.442695, %v1703_v34 }
 0xf5b   :  { %3588 = vpow2.f32 %v3379_v32  ;;  %v4354_v52 = vperm.slane %v1839_v30, 0  ;;  %v3385_v53 = vmul.f32 -1.442695, %v1704_v48  ;;  %v4368_v30 = vld [vmem:[%s4338_s1] ss:$0 sm:$0xff] }
 0xf5c   :  { %3590 = vpow2.f32 %v3380_v56 }
 0xf5d   :  { %3592 = vpow2.f32 %v3381_v63 }
 0xf5e   :  { %3594 = vpow2.f32 %v3382_v1 }
 0xf61   :  { %v3589_v9 = vpop.eup %3588 }
 0xf62   :  { %v1726_v38 = vadd.f32 1.0, %v3589_v9  ;;  %v3591_v17 = vpop.eup %3590 }
 0xf63   :  { %v3593_v16 = vpop.eup %3592  ;;  %v1727_v39 = vadd.f32 1.0, %v3591_v17 }
 0xf64   :  { %3596 = vrcp.f32 %v1726_v38  ;;  %v3595_v3 = vpop.eup %3594  ;;  %v4342_v29 = vadd.f32 1.0, %v3593_v16  ;;  %v1744_v21 = vand.u32 2147483648, %v1726_v38  ;;  %v1742_v54 = vand.u32 2147483647, %v1726_v38 }
 0xf65   :  { %3598 = vpow2.f32 %v3383_v45  ;;  %v4345_v6 = vadd.f32 1.0, %v3595_v3  ;;  %vm1738_vm9 = vweird.f32 %v1726_v38  ;;  %v1757_v34 = vand.u32 2147483647, %v1727_v39 }
 0xf66   :  { %3600 = vrcp.f32 %v1727_v39  ;;  %v1745_v1 = vor.u32 1.1754944e-38, %v1744_v21  ;;  %v1759_v17 = vand.u32 2147483648, %v1727_v39  ;;  %vm1743_vm12 = vcmp.eq.f32.partialorder %v1742_v54, 8.507059e+37 }
 0xf67   :  { %3602 = vrcp.f32 %v4342_v29  ;;  %vm1753_vm13 = vweird.f32 %v1727_v39  ;;  %vm1758_vm15 = vcmp.eq.f32.partialorder %v1757_v34, 8.507059e+37  ;;  %vm1768_vm2 = vweird.f32 %v4342_v29 }
 0xf68   :  { %3604 = vpow2.f32 %v3384_v11  ;;  %vm1783_vm6 = vweird.f32 %v4345_v6 }
 0xf69   :  { %3606 = vrcp.f32 %v4345_v6 }
 0xf6a   :  { %v3597_v35 = vpop.eup %3596 }
 0xf6b   :  { %v3599_v40 = vpop.eup %3598  ;;  %v2030_v10 = vpop.permute.xlu2 %2029  ;;  %v1734_v41 = vmul.f32 %v3597_v35, %v1726_v38  ;;  %vm1739_vm8 = vweird.f32 %v3597_v35 }
 0xf6c   :  { %v2032_v44 = vadd.f32 %v2030_v10, %v4350_v43  ;;  %v3601_v49 = vpop.eup %3600  ;;  %v4358_v51 = vadd.f32 1.0, %v3599_v40  ;;  %vm1740_vm10 = vmor %vm1738_vm9, %vm1739_vm8 }
 0xf6d   :  { %v1735_v37 = vsub.f32 1.0, %v1734_v41  ;;  %v4356_v7 = vpop.eup %3602  ;;  %v1749_v32 = vmul.f32 %v3601_v49, %v1727_v39  ;;  %vm1754_vm11 = vweird.f32 %v3601_v49 }
 0xf6e   :  { %v3400_v23 = vmul.f32 -1.442695, %v2032_v44  ;;  %v1764_v56 = vmul.f32 %v4356_v7, %v4342_v29  ;;  %v3605_v63 = vpop.eup %3604  ;;  %vm1755_vm14 = vmor %vm1753_vm13, %vm1754_vm11  ;;  %v1760_v44 = vor.u32 1.1754944e-38, %v1759_v17  ;;  %vm1769_vm1 = vweird.f32 %v4356_v7 }
 0xf6f   :  { %v1736_v15 = vmul.f32 %v3597_v35, %v1735_v37  ;;  %v1750_v14 = vsub.f32 1.0, %v1749_v32  ;;  %v4362_v9 = vpop.eup %3606  ;;  %v4371_v10 = vadd.f32 1.0, %v3605_v63  ;;  %v1772_v63 = vand.u32 2147483647, %v4342_v29  ;;  %vm1770_vm3 = vmor %vm1768_vm2, %vm1769_vm1 }
 0xf70   :  { %3608 = vpow2.f32 %v3400_v23  ;;  %v1765_v16 = vsub.f32 1.0, %v1764_v56  ;;  %v1779_v11 = vmul.f32 %v4362_v9, %v4345_v6  ;;  %vm1784_vm5 = vweird.f32 %v4362_v9 }
 0xf71   :  { %v1737_v45 = vadd.f32 %v3597_v35, %v1736_v15  ;;  %v1751_v3 = vmul.f32 %v3601_v49, %v1750_v14  ;;  %3610 = vrcp.f32 %v4358_v51  ;;  %vm1773_vm4 = vcmp.eq.f32.partialorder %v1772_v63, 8.507059e+37  ;;  %vm4407_vm7 = vmor %vm1783_vm6, %vm1784_vm5 }
 0xf72   :  { %v1766_v38 = vmul.f32 %v4356_v7, %v1765_v16  ;;  %3612 = vpow2.f32 %v3385_v53  ;;  %v1774_v53 = vand.u32 2147483648, %v4342_v29 }
 0xf73   :  { %v1741_v24 = vsel %vm1740_vm10, %v3597_v35, %v1737_v45  ;;  %v1752_v40 = vadd.f32 %v3601_v49, %v1751_v3  ;;  %v1780_v35 = vsub.f32 1.0, %v1779_v11  ;;  %3614 = vrcp.f32 %v4371_v10 }
 0xf74   :  { %v1746_v48 = vsel %vm1743_vm12, %v1745_v1, %v1741_v24  ;;  %v1767_v39 = vadd.f32 %v4356_v7, %v1766_v38  ;;  %v1775_v17 = vor.u32 1.1754944e-38, %v1774_v53 }
 0xf75   :  { %v1843_v41 = vmul.f32 %v4354_v52, %v1746_v48  ;;  %v1756_v37 = vsel %vm1755_vm14, %v3601_v49, %v1752_v40  ;;  %v1781_v45 = vmul.f32 %v4362_v9, %v1780_v35  ;;  %v1789_v48 = vand.u32 2147483648, %v4345_v6 }
 0xf76   :  { %v3609_v21 = vpop.eup %3608  ;;  %v1761_v15 = vsel %vm1758_vm15, %v1760_v44, %v1756_v37  ;;  %v1771_v14 = vsel %vm1770_vm3, %v4356_v7, %v1767_v39  ;;  %v1787_v44 = vand.u32 2147483647, %v4345_v6  ;;  %vm1798_vm14 = vweird.f32 %v4358_v51 }
 0xf77   :  { %v4375_v23 = vadd.f32 1.0, %v3609_v21  ;;  %v1853_v32 = vadd.f32 %v4368_v30, %v1843_v41  ;;  %v4379_v54 = vpop.eup %3610  ;;  %v1844_v56 = vmul.f32 %v4354_v52, %v1761_v15  ;;  %v1776_v29 = vsel %vm1773_vm4, %v1775_v17, %v1771_v14 }
 0xf78   :  { %v3613_v1 = vpop.eup %3612  ;;  %v1794_v34 = vmul.f32 %v4379_v54, %v4358_v51  ;;  %v1782_v24 = vadd.f32 %v4362_v9, %v1781_v45  ;;  %v1845_v41 = vmul.f32 %v4354_v52, %v1776_v29  ;;  %v1790_v53 = vor.u32 1.1754944e-38, %v1789_v48 }
 0xf79   :  { %3616 = vrcp.f32 %v4375_v23  ;;  %v1860_v49 = vmul.f32 %v1853_v32, %v4232_v60  ;;  %v1854_v16 = vadd.f32 %v4368_v30, %v1844_v56  ;;  %v4394_v60 = vpop.eup %3614  ;;  %v4396_v3 = vadd.f32 1.0, %v3613_v1 }
 0xf7a   :  { %v1795_v7 = vsub.f32 1.0, %v1794_v34  ;;  %v1809_v35 = vmul.f32 %v4394_v60, %v4371_v10  ;;  %v1786_v32 = vsel %vm4407_vm7, %v4362_v9, %v1782_v24  ;;  %v2046_v39 = vand.u32 2147483647, %v4375_v23 }
 0xf7b   :  { %3386 = vmatmul.msk.f32.vlgmr.msrb.gmra.mxu0 %vm149_vm0, %v1860_v49  ;;  %v1861_v40 = vmul.f32 %v1854_v16, %v4230_v28  ;;  %3618 = vrcp.f32 %v4396_v3  ;;  %v2048_v28 = vand.u32 2147483648, %v4375_v23  ;;  %v3737_v49 = vmov 17  }
 0xf7c   :  { %v1796_v6 = vmul.f32 %v4379_v54, %v1795_v7  ;;  %3487 = vset.pattern.permute.xlu1 %v3737_v49  ;;  %v1855_v56 = vadd.f32 %v4368_v30, %v1845_v41  ;;  %vm1788_vm9 = vcmp.eq.f32.partialorder %v1787_v44, 8.507059e+37  ;;  %vm2042_vm10 = vweird.f32 %v4375_v23 }
 0xf7d   :  { %v1791_v63 = vsel %vm1788_vm9, %v1790_v53, %v1786_v32  ;;  %v2049_v1 = vor.u32 1.1754944e-38, %v2048_v28  ;;  %vm1799_vm12 = vweird.f32 %v4379_v54  ;;  %v1810_v45 = vsub.f32 1.0, %v1809_v35 }
 0xf7e   :  { %v1797_v14 = vadd.f32 %v4379_v54, %v1796_v6  ;;  %vm2047_vm13 = vcmp.eq.f32.partialorder %v2046_v39, 8.507059e+37  ;;  %v1804_v16 = vand.u32 2147483648, %v4358_v51  ;;  %v1862_v24 = vmul.f32 %v1855_v56, %v4234_v0  ;;  %vm1800_vm15 = vmor %vm1798_vm14, %vm1799_vm12 }
 0xf7f   :  { %v3617_v11 = vpop.eup %3616  ;;  %v1802_v7 = vand.u32 2147483647, %v4358_v51  ;;  %v1811_v48 = vmul.f32 %v4394_v60, %v1810_v45  ;;  %v70_v41 = vstv %s4422_s17  ;;  %vm1814_vm2 = vweird.f32 %v4394_v60 }
 0xf80   :  { %v2038_v38 = vmul.f32 %v3617_v11, %v4375_v23  ;;  %vm2043_vm8 = vweird.f32 %v3617_v11  ;;  %v1846_v23 = vmul.f32 %v4354_v52, %v1791_v63  ;;  %v1805_v0 = vor.u32 1.1754944e-38, %v1804_v16  ;;  %71 = vst [vmem:[#allocation4] sm:$0x1] %v70_v41 }
 0xf81   :  { %vm2044_vm11 = vmor %vm2042_vm10, %vm2043_vm8  ;;  %v3619_v34 = vpop.eup %3618  ;;  %vm1803_vm1 = vcmp.eq.f32.partialorder %v1802_v7, 8.507059e+37  ;;  %v1812_v35 = vadd.f32 %v4394_v60, %v1811_v48  ;;  %vm1813_vm3 = vweird.f32 %v4371_v10  ;;  %vm1828_vm7 = vweird.f32 %v4396_v3 }
 0xf82   :  { %v2039_v21 = vsub.f32 1.0, %v2038_v38  ;;  %vm1815_vm4 = vmor %vm1813_vm3, %vm1814_vm2  ;;  %vm1829_vm6 = vweird.f32 %v3619_v34  ;;  %v1834_v45 = vand.u32 2147483648, %v4396_v3 }
 0xf83   :  { %3387 = vmatmul.msk.f32.gmra.mxu0 %vm149_vm0, %v1861_v40  ;;  %v1824_v40 = vmul.f32 %v3619_v34, %v4396_v3  ;;  %v1816_v39 = vsel %vm1815_vm4, %v4394_v60, %v1812_v35  ;;  %v1832_v60 = vand.u32 2147483647, %v4396_v3  ;;  %vm1830_vm8 = vmor %vm1828_vm7, %vm1829_vm6 }
 0xf84   :  { %v2040_v15 = vmul.f32 %v3617_v11, %v2039_v21  ;;  %v1856_v21 = vadd.f32 %v4368_v30, %v1846_v23 }
 0xf85   :  { %v1825_v28 = vsub.f32 1.0, %v1824_v40  ;;  %vm1833_vm9 = vcmp.eq.f32.partialorder %v1832_v60, 8.507059e+37 }
 0xf86   :  { %v2041_v9 = vadd.f32 %v3617_v11, %v2040_v15  ;;  %v1863_v32 = vmul.f32 %v1856_v21, %v4238_v36  ;;  %v1817_v15 = vand.u32 2147483647, %v4371_v10 }
 0xf87   :  { %v1826_v53 = vmul.f32 %v3619_v34, %v1825_v28  ;;  %v4482_v28 = vld [vmem:[%s4085_s5 + $0x8] sm:$0xff] }
 0xf88   :  { %v2045_v17 = vsel %vm2044_vm11, %v3617_v11, %v2041_v9  ;;  %v1801_v11 = vsel %vm1800_vm15, %v4379_v54, %v1797_v14  ;;  %v1819_v54 = vand.u32 2147483648, %v4371_v10  ;;  %vm1818_vm5 = vcmp.eq.f32.partialorder %v1817_v15, 8.507059e+37 }
 0xf89   :  { %v2050_v29 = vsel %vm2047_vm13, %v2049_v1, %v2045_v17  ;;  %v1806_v37 = vsel %vm1803_vm1, %v1805_v0, %v1801_v11  ;;  %v1827_v36 = vadd.f32 %v3619_v34, %v1826_v53 }
 0xf8a   :  { %2053 = vrot.lane.b32.xlu0 %v2050_v29, %s3722_s28  ;;  %v1847_v6 = vmul.f32 %v4354_v52, %v1806_v37  ;;  %v1820_v56 = vor.u32 1.1754944e-38, %v1819_v54  ;;  %v1835_v29 = vor.u32 1.1754944e-38, %v1834_v45  ;;  %v4476_v37 = vld [vmem:[%s3300_s7] sm:$0xff] }
 0xf8b   :  { %3388 = vmatmul.msk.f32.gmra.mxu0 %vm149_vm0, %v1862_v24  ;;  %v2059_v38 = vpop.permute.xlu0 %2058  ;;  %v1831_v16 = vsel %vm1830_vm8, %v3619_v34, %v1827_v36 }
 0xf8c   :  { %v2061_v44 = vadd.f32 %v2059_v38, %v4350_v43  ;;  %v1857_v9 = vadd.f32 %v4368_v30, %v1847_v6  ;;  %v1821_v1 = vsel %vm1818_vm5, %v1820_v56, %v1816_v39  ;;  %v1836_v23 = vsel %vm1833_vm9, %v1835_v29, %v1831_v16  ;;  %v4487_v6 = vld [vmem:[%s4085_s5] sm:$0xff]  ;;  %s3740_s5 = smov 23  }
 0xf8d   :  { %v1848_v17 = vmul.f32 %v4354_v52, %v1821_v1  ;;  %v1849_v48 = vmul.f32 %v4354_v52, %v1836_v23  ;;  %v4470_v52 = vld [vmem:[%s3300_s7 + $0x8] sm:$0xff]  ;;  %s3302_s10 = sld [smem:[%s4735_s0 + %s3740_s5]]  }
 0xf8e   :  { %v3401_v51 = vmul.f32 -1.442695, %v2061_v44  ;;  %v1864_v10 = vmul.f32 %v1857_v9, %v4244_v42  ;;  %2104 = vmatpush.msrb.mxu2 %v4470_v52  ;;  %2247 = vmatpush.msra.mxu0 %v4470_v52 }
 0xf8f   :  { %v1858_v24 = vadd.f32 %v4368_v30, %v1848_v17  ;;  %v1859_v34 = vadd.f32 %v4368_v30, %v1849_v48  ;;  %v4474_v30 = vld [vmem:[#allocation4] ss:$0 sm:$0xff] }
 0xf90   :  { %3620 = vpow2.f32 %v3401_v51  ;;  %2105 = vmatpush.msrb.mxu2 %v4476_v37  ;;  %2248 = vmatpush.msra.mxu0 %v4476_v37 }
 0xf91   :  { %v1865_v11 = vmul.f32 %v1858_v24, %v4249_v47  ;;  %v1866_v47 = vmul.f32 %v1859_v34, %v4260_v20 }
 0xf92   :  { %2145 = vmatpush.msra.mxu2 %v4482_v28  ;;  %2391 = vmatpush.msrb.mxu0 %v4470_v52 }
 0xf93   :  { %3389 = vmatmul.msk.f32.gmra.mxu0 %vm149_vm0, %v1863_v32 }
 0xf94   :  { %2146 = vmatpush.msra.mxu2 %v4487_v6  ;;  %2392 = vmatpush.msrb.mxu0 %v4476_v37 }
 0xf96   :  { %v3621_v63 = vpop.eup %3620 }
 0xf97   :  { %v2065_v14 = vadd.f32 1.0, %v3621_v63 }
 0xf99   :  { %3622 = vrcp.f32 %v2065_v14  ;;  %v2077_v40 = vand.u32 2147483648, %v2065_v14  ;;  %v2075_v41 = vand.u32 2147483647, %v2065_v14  ;;  %vm2071_vm11 = vweird.f32 %v2065_v14 }
 0xf9b   :  { %3390 = vmatmul.msk.f32.gmra.mxu0 %vm149_vm0, %v1864_v10  ;;  %v2078_v0 = vor.u32 1.1754944e-38, %v2077_v40  ;;  %vm2076_vm13 = vcmp.eq.f32.partialorder %v2075_v41, 8.507059e+37 }
 0xf9f   :  { %v3623_v7 = vpop.eup %3622 }
 0xfa0   :  { %v2067_v38 = vmul.f32 %v3623_v7, %v2065_v14  ;;  %vm2072_vm10 = vweird.f32 %v3623_v7 }
 0xfa1   :  { %vm2073_vm12 = vmor %vm2071_vm11, %vm2072_vm10 }
 0xfa2   :  { %v2068_v42 = vsub.f32 1.0, %v2067_v38 }
 0xfa3   :  { %3391 = vmatmul.msk.f32.gmra.mxu0 %vm149_vm0, %v1865_v11 }
 0xfa4   :  { %v2069_v3 = vmul.f32 %v3623_v7, %v2068_v42 }
 0xfa6   :  { %v2070_v44 = vadd.f32 %v3623_v7, %v2069_v3 }
 0xfa8   :  { %v2074_v21 = vsel %vm2073_vm12, %v3623_v7, %v2070_v44 }
 0xfa9   :  { %v2079_v51 = vsel %vm2076_vm13, %v2078_v0, %v2074_v21 }
 0xfaa   :  { %2083 = vperm.xlu1 %3487, %v2079_v51  }
 0xfab   :  { %3392 = vmatmul.msk.f32.gmra.mxu0 %vm149_vm0, %v1866_v47 }
 0xfb2   :  { %3488 = vset.pattern.permute.xlu1 %v3721_v33 }
 0xff8   :  { %v1911_v20 = vpop.f32.mrf.mxu0 }
 0xff9   :  { %v1912_v35 = vadd.f32 %v4474_v30, %v1911_v20 }
 0xffc   :  { %v2054_v54 = vpop.permute.xlu0 %2053 }
 0xffd   :  { %v2056_v32 = vmul.f32 %v2054_v54, %v1912_v35 }
 0xfff   :  { %v2112_v15 = vsub.f32 1.0, %v2056_v32  ;;  %2121 = vperm.xlu2 %3480, %v2056_v32  }
0x1000   :  { %v4491_v39 = vpop.f32.mrf.mxu0 }
0x1001   :  { %2115 = vperm.xlu1 %3488, %v2112_v15  }
0x1008   :  { %v1917_v53 = vpop.f32.mrf.mxu0 }
0x1009   :  { %v4494_v56 = vadd.f32 %v4474_v30, %v1917_v53  ;;  %3489 = vset.pattern.permute.xlu1 %v3737_v49 }
0x1010   :  { %v1920_v9 = vpop.f32.mrf.mxu0 }
0x1011   :  { %v4498_v63 = vadd.f32 %v4474_v30, %v1920_v9 }
0x1018   :  { %v1923_v1 = vpop.f32.mrf.mxu0 }
0x1019   :  { %v4501_v14 = vadd.f32 %v4474_v30, %v1923_v1 }
0x101c   :  { %v2084_v36 = vpop.permute.xlu1 %2083 }
0x101d   :  { %v2086_v45 = vmul.f32 0.0, %v2084_v36 }
0x101f   :  { %3402 = vmatmul.msk.f32.vlgmr.msrb.gmra.mxu2 %vm149_vm0, %v2086_v45 }
0x1020   :  { %v1926_v10 = vpop.f32.mrf.mxu0  ;;  %2289 = vmatpush.msrb.mxu2 %v4482_v28 }
0x1021   :  { %v4506_v17 = vadd.f32 %v4474_v30, %v1926_v10 }
0x1022   :  { %2290 = vmatpush.msrb.mxu2 %v4487_v6 }
0x1059   :  { %v2122_v23 = vpop.permute.xlu2 %2121 }
0x1073   :  { %v2116_v29 = vpop.permute.xlu1 %2115 }
0x1074   :  { %v2118_v7 = vmul.f32 0.0, %v2116_v29 }
0x10a2   :  { %v2107_v60 = vpop.f32.mrf.mxu2 }
0x10a3   :  { %v2110_v16 = vadd.f32 %v2107_v60, %v4350_v43 }
0x10a5   :  { %3624 = vtanh.f32 %v2110_v16 }
0x10ab   :  { %v3625_v24 = vpop.eup %3624 }
0x10ac   :  { %v2124_v38 = vmul.f32 %v3625_v24, %v2122_v23 }
0x10ae   :  { %v2125_v11 = vadd.f32 %v2124_v38, %v2118_v7 }
0x10b0   :  { %v2126_v48 = vmul.f32 %v2125_v11, %v3839_v62 }
0x10b2   :  { %v4512_v42 = vadd.f32 %v2126_v48, %v3837_v61  ;;  %v1959_v61 = vadd.f32 %v4322_v55, %v4270_v31 }
0x10b4   :  { %3403 = vmatmul.msk.f32.vlgmr.msra.gmra.mxu2 %vm149_vm0, %v4512_v42  ;;  %3404 = vmatmul.msk.f32.vlgmr.msrb.gmra.mxu3 %vm149_vm0, %v4512_v42 }
0x10b5   :  { %2453 = vmatpush.msrb.mxu3 %v4129_v4  ;;  %2433 = vmatpush.msra.mxu2 %v4482_v28 }
0x10b7   :  { %2454 = vmatpush.msrb.mxu3 %v4135_v8  ;;  %2434 = vmatpush.msra.mxu2 %v4487_v6 }
0x1137   :  { %v2148_v43 = vpop.f32.mrf.mxu2  ;;  %v2168_v40 = vpop.f32.mrf.mxu3 }
0x1138   :  { %2201 = vrot.lane.b32.xlu0 %v2168_v40, %s3727_s19  ;;  %2172 = vrot.lane.b32.xlu2 %v2148_v43, %s3719_s23  ;;  %v1915_v43 = vadd.f32 %v4474_v30, %v4491_v39 }
0x1192   :  { %v2173_v62 = vpop.permute.xlu2 %2172 }
0x1193   :  { %v2175_v3 = vadd.f32 %v2173_v62, %v1959_v61 }
0x1195   :  { %v3405_v41 = vmul.f32 -1.442695, %v2175_v3 }
0x1197   :  { %3626 = vpow2.f32 %v3405_v41 }
0x119d   :  { %v3627_v34 = vpop.eup %3626 }
0x119e   :  { %v2179_v44 = vadd.f32 1.0, %v3627_v34 }
0x11a0   :  { %3628 = vrcp.f32 %v2179_v44  ;;  %v2191_v20 = vand.u32 2147483648, %v2179_v44  ;;  %v2189_v32 = vand.u32 2147483647, %v2179_v44  ;;  %vm2185_vm15 = vweird.f32 %v2179_v44 }
0x11a2   :  { %v2192_v31 = vor.u32 1.1754944e-38, %v2191_v20  ;;  %vm2190_vm2 = vcmp.eq.f32.partialorder %v2189_v32, 8.507059e+37 }
0x11a6   :  { %v3629_v0 = vpop.eup %3628 }
0x11a7   :  { %v2181_v21 = vmul.f32 %v3629_v0, %v2179_v44  ;;  %vm2186_vm14 = vweird.f32 %v3629_v0  ;;  %v4535_v44 = vpop.f32.mrf.mxu0 }
0x11a8   :  { %vm2187_vm1 = vmor %vm2185_vm15, %vm2186_vm14 }
0x11a9   :  { %v2182_v51 = vsub.f32 1.0, %v2181_v21 }
0x11aa   :  { %v2202_v47 = vpop.permute.xlu0 %2201 }
0x11ab   :  { %v2204_v35 = vadd.f32 %v2202_v47, %v1959_v61  ;;  %v2183_v54 = vmul.f32 %v3629_v0, %v2182_v51 }
0x11ad   :  { %v3406_v15 = vmul.f32 -1.442695, %v2204_v35  ;;  %v2184_v53 = vadd.f32 %v3629_v0, %v2183_v54 }
0x11af   :  { %3630 = vpow2.f32 %v3406_v15  ;;  %v2188_v9 = vsel %vm2187_vm1, %v3629_v0, %v2184_v53  ;;  %v2270_v15 = vmul.f32 %v4512_v42, %v3866_v58  ;;  %v1962_v58 = vadd.f32 %v4322_v55, %v4273_v50 }
0x11b0   :  { %v2193_v1 = vsel %vm2190_vm2, %v2192_v31, %v2188_v9 }
0x11b1   :  { %2196 = vrot.lane.b32.xlu0 %v2193_v1, %s3722_s28 }
0x11b5   :  { %v3631_v36 = vpop.eup %3630 }
0x11b6   :  { %v2208_v45 = vadd.f32 1.0, %v3631_v36 }
0x11b8   :  { %3632 = vrcp.f32 %v2208_v45  ;;  %v2220_v29 = vand.u32 2147483648, %v2208_v45  ;;  %v2218_v23 = vand.u32 2147483647, %v2208_v45  ;;  %vm2214_vm4 = vweird.f32 %v2208_v45 }
0x11ba   :  { %v2221_v38 = vor.u32 1.1754944e-38, %v2220_v29  ;;  %vm2219_vm6 = vcmp.eq.f32.partialorder %v2218_v23, 8.507059e+37 }
0x11be   :  { %v3633_v10 = vpop.eup %3632 }
0x11bf   :  { %v2210_v60 = vmul.f32 %v3633_v10, %v2208_v45  ;;  %vm2215_vm3 = vweird.f32 %v3633_v10 }
0x11c0   :  { %vm2216_vm5 = vmor %vm2214_vm4, %vm2215_vm3 }
0x11c1   :  { %v2211_v16 = vsub.f32 1.0, %v2210_v60 }
0x11c3   :  { %v2212_v24 = vmul.f32 %v3633_v10, %v2211_v16 }
0x11c5   :  { %v2213_v7 = vadd.f32 %v3633_v10, %v2212_v24 }
0x11c7   :  { %v2217_v11 = vsel %vm2216_vm5, %v3633_v10, %v2213_v7 }
0x11c8   :  { %v2222_v48 = vsel %vm2219_vm6, %v2221_v38, %v2217_v11 }
0x11c9   :  { %2226 = vperm.xlu1 %3489, %v2222_v48  }
0x11d1   :  { %3490 = vset.pattern.permute.xlu1 %v3721_v33 }
0x1223   :  { %v2197_v40 = vpop.permute.xlu0 %2196 }
0x1224   :  { %v2199_v62 = vmul.f32 %v2197_v40, %v1915_v43 }
0x1226   :  { %v2255_v3 = vsub.f32 1.0, %v2199_v62  ;;  %2264 = vperm.xlu2 %3480, %v2199_v62  }
0x1228   :  { %2258 = vperm.xlu1 %3490, %v2255_v3  }
0x1230   :  { %3491 = vset.pattern.permute.xlu1 %v3737_v49 }
0x123b   :  { %v2227_v41 = vpop.permute.xlu1 %2226 }
0x123c   :  { %v2229_v34 = vmul.f32 %v2227_v41, %v4512_v42 }
0x123e   :  { %3407 = vmatmul.msk.f32.vlgmr.msra.gmra.mxu0 %vm149_vm0, %v2229_v34 }
0x123f   :  { %2535 = vmatpush.msra.mxu0 %v4470_v52 }
0x1241   :  { %2536 = vmatpush.msra.mxu0 %v4476_v37 }
0x1280   :  { %v2265_v47 = vpop.permute.xlu2 %2264 }
0x129a   :  { %v2259_v21 = vpop.permute.xlu1 %2258 }
0x129b   :  { %v2261_v20 = vmul.f32 %v2259_v21, %v4512_v42 }
0x12bb   :  { %v2250_v0 = vpop.f32.mrf.mxu0 }
0x12bc   :  { %v2253_v39 = vadd.f32 %v2250_v0, %v1959_v61 }
0x12be   :  { %3634 = vtanh.f32 %v2253_v39 }
0x12c4   :  { %v3635_v51 = vpop.eup %3634 }
0x12c5   :  { %v2267_v35 = vmul.f32 %v3635_v51, %v2265_v47 }
0x12c7   :  { %v2268_v54 = vadd.f32 %v2267_v35, %v2261_v20 }
0x12c9   :  { %v2269_v32 = vmul.f32 %v2268_v54, %v3868_v59 }
0x12cb   :  { %v4541_v53 = vadd.f32 %v2270_v15, %v2269_v32 }
0x12cd   :  { %3408 = vmatmul.msk.f32.vlgmr.msrb.gmra.mxu2 %vm149_vm0, %v4541_v53  ;;  %3409 = vmatmul.msk.f32.vlgmr.msra.gmra.mxu3 %vm149_vm0, %v4541_v53 }
0x12ce   :  { %2597 = vmatpush.msra.mxu3 %v4129_v4  ;;  %2577 = vmatpush.msrb.mxu2 %v4482_v28 }
0x12d0   :  { %2598 = vmatpush.msra.mxu3 %v4135_v8  ;;  %2578 = vmatpush.msrb.mxu2 %v4487_v6 }
0x1350   :  { %v2292_v59 = vpop.f32.mrf.mxu2  ;;  %v2312_v61 = vpop.f32.mrf.mxu3 }
0x1351   :  { %2345 = vrot.lane.b32.xlu0 %v2312_v61, %s3727_s19  ;;  %2316 = vrot.lane.b32.xlu2 %v2292_v59, %s3719_s23 }
0x13ab   :  { %v2317_v42 = vpop.permute.xlu2 %2316 }
0x13ac   :  { %v2319_v31 = vadd.f32 %v2317_v42, %v1962_v58 }
0x13ae   :  { %v3410_v9 = vmul.f32 -1.442695, %v2319_v31 }
0x13b0   :  { %3636 = vpow2.f32 %v3410_v9 }
0x13b6   :  { %v3637_v1 = vpop.eup %3636 }
0x13b7   :  { %v2323_v36 = vadd.f32 1.0, %v3637_v1 }
0x13b9   :  { %3638 = vrcp.f32 %v2323_v36  ;;  %v2335_v29 = vand.u32 2147483648, %v2323_v36  ;;  %v2333_v7 = vand.u32 2147483647, %v2323_v36  ;;  %vm2329_vm8 = vweird.f32 %v2323_v36 }
0x13bb   :  { %v2336_v50 = vor.u32 1.1754944e-38, %v2335_v29  ;;  %vm2334_vm10 = vcmp.eq.f32.partialorder %v2333_v7, 8.507059e+37 }
0x13bf   :  { %v3639_v45 = vpop.eup %3638 }
0x13c0   :  { %v2325_v10 = vmul.f32 %v3639_v45, %v2323_v36  ;;  %vm2330_vm7 = vweird.f32 %v3639_v45 }
0x13c1   :  { %vm2331_vm9 = vmor %vm2329_vm8, %vm2330_vm7 }
0x13c2   :  { %v2326_v60 = vsub.f32 1.0, %v2325_v10 }
0x13c3   :  { %v2346_v16 = vpop.permute.xlu0 %2345 }
0x13c4   :  { %v2348_v24 = vadd.f32 %v2346_v16, %v1962_v58  ;;  %v2327_v23 = vmul.f32 %v3639_v45, %v2326_v60  ;;  %v2414_v16 = vmul.f32 %v4541_v53, %v3898_v12  ;;  %v1965_v12 = vadd.f32 %v4322_v55, %v4310_v18 }
0x13c6   :  { %v3411_v38 = vmul.f32 -1.442695, %v2348_v24  ;;  %v2328_v11 = vadd.f32 %v3639_v45, %v2327_v23 }
0x13c8   :  { %3640 = vpow2.f32 %v3411_v38  ;;  %v2332_v48 = vsel %vm2331_vm9, %v3639_v45, %v2328_v11 }
0x13c9   :  { %v2337_v43 = vsel %vm2334_vm10, %v2336_v50, %v2332_v48 }
0x13ca   :  { %2340 = vrot.lane.b32.xlu0 %v2337_v43, %s3722_s28 }
0x13ce   :  { %v3641_v40 = vpop.eup %3640 }
0x13cf   :  { %v2352_v62 = vadd.f32 1.0, %v3641_v40 }
0x13d1   :  { %3642 = vrcp.f32 %v2352_v62  ;;  %v2364_v0 = vand.u32 2147483648, %v2352_v62  ;;  %v2362_v21 = vand.u32 2147483647, %v2352_v62  ;;  %vm2358_vm12 = vweird.f32 %v2352_v62 }
0x13d3   :  { %v2365_v47 = vor.u32 1.1754944e-38, %v2364_v0  ;;  %vm2363_vm14 = vcmp.eq.f32.partialorder %v2362_v21, 8.507059e+37 }
0x13d7   :  { %v3643_v3 = vpop.eup %3642 }
0x13d8   :  { %v2354_v41 = vmul.f32 %v3643_v3, %v2352_v62  ;;  %vm2359_vm11 = vweird.f32 %v3643_v3 }
0x13d9   :  { %vm2360_vm13 = vmor %vm2358_vm12, %vm2359_vm11 }
0x13da   :  { %v2355_v34 = vsub.f32 1.0, %v2354_v41 }
0x13dc   :  { %v2356_v39 = vmul.f32 %v3643_v3, %v2355_v34 }
0x13de   :  { %v2357_v51 = vadd.f32 %v3643_v3, %v2356_v39 }
0x13e0   :  { %v2361_v20 = vsel %vm2360_vm13, %v3643_v3, %v2357_v51 }
0x13e1   :  { %v2366_v35 = vsel %vm2363_vm14, %v2365_v47, %v2361_v20 }
0x13e2   :  { %2370 = vperm.xlu1 %3491, %v2366_v35  }
0x13ea   :  { %3492 = vset.pattern.permute.xlu1 %v3721_v33 }
0x143c   :  { %v2341_v54 = vpop.permute.xlu0 %2340 }
0x143d   :  { %v2343_v32 = vmul.f32 %v2341_v54, %v4494_v56 }
0x143f   :  { %v2399_v15 = vsub.f32 1.0, %v2343_v32  ;;  %2408 = vperm.xlu2 %3480, %v2343_v32  }
0x1441   :  { %2402 = vperm.xlu1 %3492, %v2399_v15  }
0x1449   :  { %3493 = vset.pattern.permute.xlu1 %v3737_v49 }
0x1454   :  { %v2371_v59 = vpop.permute.xlu1 %2370 }
0x1455   :  { %v2373_v61 = vmul.f32 %v2371_v59, %v4541_v53 }
0x1457   :  { %3412 = vmatmul.msk.f32.vlgmr.msrb.gmra.mxu0 %vm149_vm0, %v2373_v61 }
0x1458   :  { %2679 = vmatpush.msrb.mxu0 %v4470_v52 }
0x145a   :  { %2680 = vmatpush.msrb.mxu0 %v4476_v37 }
0x1499   :  { %v2409_v56 = vpop.permute.xlu2 %2408 }
0x14b3   :  { %v2403_v9 = vpop.permute.xlu1 %2402 }
0x14b4   :  { %v2405_v36 = vmul.f32 %v2403_v9, %v4541_v53 }
0x14d4   :  { %v2394_v42 = vpop.f32.mrf.mxu0 }
0x14d5   :  { %v2397_v31 = vadd.f32 %v2394_v42, %v1962_v58 }
0x14d7   :  { %3644 = vtanh.f32 %v2397_v31 }
0x14dd   :  { %v3645_v1 = vpop.eup %3644 }
0x14de   :  { %v2411_v45 = vmul.f32 %v3645_v1, %v2409_v56 }
0x14e0   :  { %v2412_v10 = vadd.f32 %v2411_v45, %v2405_v36 }
0x14e2   :  { %v2413_v60 = vmul.f32 %v2412_v10, %v3902_v13 }
0x14e4   :  { %v4567_v29 = vadd.f32 %v2414_v16, %v2413_v60 }
0x14e6   :  { %3413 = vmatmul.msk.f32.vlgmr.msra.gmra.mxu2 %vm149_vm0, %v4567_v29  ;;  %3414 = vmatmul.msk.f32.vlgmr.msrb.gmra.mxu3 %vm149_vm0, %v4567_v29 }
0x14e7   :  { %2741 = vmatpush.msra.mxu2 %v4129_v4  ;;  %2823 = vmatpush.msrb.mxu3 %v4470_v52 }
0x14e9   :  { %2742 = vmatpush.msra.mxu2 %v4135_v8  ;;  %2824 = vmatpush.msrb.mxu3 %v4476_v37 }
0x1569   :  { %v2436_v13 = vpop.f32.mrf.mxu2  ;;  %v2456_v58 = vpop.f32.mrf.mxu3 }
0x156a   :  { %2489 = vrot.lane.b32.xlu0 %v2456_v58, %s3727_s19  ;;  %2460 = vrot.lane.b32.xlu2 %v2436_v13, %s3719_s23 }
0x15c4   :  { %v2461_v53 = vpop.permute.xlu2 %2460 }
0x15c5   :  { %v2463_v24 = vadd.f32 %v2461_v53, %v1965_v12 }
0x15c7   :  { %v3415_v23 = vmul.f32 -1.442695, %v2463_v24  ;;  %v2558_v24 = vmul.f32 %v4567_v29, %v3930_v19 }
0x15c9   :  { %3646 = vpow2.f32 %v3415_v23 }
0x15cf   :  { %v3647_v4 = vpop.eup %3646 }
0x15d0   :  { %v2467_v7 = vadd.f32 1.0, %v3647_v4 }
0x15d2   :  { %3648 = vrcp.f32 %v2467_v7  ;;  %v2479_v48 = vand.u32 2147483648, %v2467_v7  ;;  %v2477_v62 = vand.u32 2147483647, %v2467_v7  ;;  %vm2473_vm1 = vweird.f32 %v2467_v7 }
0x15d4   :  { %v2480_v18 = vor.u32 1.1754944e-38, %v2479_v48  ;;  %vm2478_vm3 = vcmp.eq.f32.partialorder %v2477_v62, 8.507059e+37 }
0x15d8   :  { %v3649_v38 = vpop.eup %3648 }
0x15d9   :  { %v2469_v8 = vmul.f32 %v3649_v38, %v2467_v7  ;;  %vm2474_vm15 = vweird.f32 %v3649_v38 }
0x15da   :  { %vm2475_vm2 = vmor %vm2473_vm1, %vm2474_vm15 }
0x15db   :  { %v2470_v11 = vsub.f32 1.0, %v2469_v8 }
0x15dc   :  { %v2490_v50 = vpop.permute.xlu0 %2489 }
0x15dd   :  { %v2492_v43 = vadd.f32 %v2490_v50, %v1965_v12  ;;  %v2471_v40 = vmul.f32 %v3649_v38, %v2470_v11 }
0x15df   :  { %v3416_v3 = vmul.f32 -1.442695, %v2492_v43  ;;  %v2472_v41 = vadd.f32 %v3649_v38, %v2471_v40 }
0x15e1   :  { %3650 = vpow2.f32 %v3416_v3  ;;  %v2476_v55 = vsel %vm2475_vm2, %v3649_v38, %v2472_v41 }
0x15e2   :  { %v2481_v34 = vsel %vm2478_vm3, %v2480_v18, %v2476_v55 }
0x15e3   :  { %2484 = vrot.lane.b32.xlu0 %v2481_v34, %s3722_s28 }
0x15e7   :  { %v3651_v0 = vpop.eup %3650 }
0x15e8   :  { %v2496_v39 = vadd.f32 1.0, %v3651_v0 }
0x15ea   :  { %3652 = vrcp.f32 %v2496_v39  ;;  %v2508_v20 = vand.u32 2147483648, %v2496_v39  ;;  %v2506_v54 = vand.u32 2147483647, %v2496_v39  ;;  %vm2502_vm5 = vweird.f32 %v2496_v39 }
0x15ec   :  { %v2509_v15 = vor.u32 1.1754944e-38, %v2508_v20  ;;  %vm2507_vm7 = vcmp.eq.f32.partialorder %v2506_v54, 8.507059e+37 }
0x15f0   :  { %v3653_v21 = vpop.eup %3652 }
0x15f1   :  { %v2498_v51 = vmul.f32 %v3653_v21, %v2496_v39  ;;  %vm2503_vm4 = vweird.f32 %v3653_v21 }
0x15f2   :  { %vm2504_vm6 = vmor %vm2502_vm5, %vm2503_vm4 }
0x15f3   :  { %v2499_v47 = vsub.f32 1.0, %v2498_v51 }
0x15f5   :  { %v2500_v35 = vmul.f32 %v3653_v21, %v2499_v47 }
0x15f7   :  { %v2501_v32 = vadd.f32 %v3653_v21, %v2500_v35 }
0x15f9   :  { %v2505_v59 = vsel %vm2504_vm6, %v3653_v21, %v2501_v32 }
0x15fa   :  { %v2510_v61 = vsel %vm2507_vm7, %v2509_v15, %v2505_v59 }
0x15fb   :  { %2514 = vperm.xlu1 %3493, %v2510_v61  }
0x1603   :  { %3494 = vset.pattern.permute.xlu1 %v3721_v33 }
0x1655   :  { %v2485_v42 = vpop.permute.xlu0 %2484 }
0x1656   :  { %v2487_v31 = vmul.f32 %v2485_v42, %v4498_v63 }
0x1658   :  { %v2543_v9 = vsub.f32 1.0, %v2487_v31  ;;  %2552 = vperm.xlu2 %3480, %v2487_v31  }
0x165a   :  { %2546 = vperm.xlu1 %3494, %v2543_v9  }
0x1662   :  { %3495 = vset.pattern.permute.xlu1 %v3737_v49 }
0x166d   :  { %v2515_v1 = vpop.permute.xlu1 %2514 }
0x166e   :  { %v2517_v56 = vmul.f32 %v2515_v1, %v4567_v29 }
0x1670   :  { %3417 = vmatmul.msk.f32.vlgmr.msra.gmra.mxu0 %vm149_vm0, %v2517_v56 }
0x1671   :  { %2865 = vmatpush.msra.mxu0 %v4482_v28 }
0x1673   :  { %2866 = vmatpush.msra.mxu0 %v4487_v6 }
0x16b2   :  { %v2553_v63 = vpop.permute.xlu2 %2552 }
0x16cc   :  { %v2547_v10 = vpop.permute.xlu1 %2546 }
0x16cd   :  { %v2549_v16 = vmul.f32 %v2547_v10, %v4567_v29 }
0x16ed   :  { %v2538_v36 = vpop.f32.mrf.mxu0 }
0x16ee   :  { %v2541_v45 = vadd.f32 %v2538_v36, %v1965_v12 }
0x16f0   :  { %3654 = vtanh.f32 %v2541_v45 }
0x16f6   :  { %v3655_v60 = vpop.eup %3654 }
0x16f7   :  { %v2555_v13 = vmul.f32 %v3655_v60, %v2553_v63 }
0x16f9   :  { %v2556_v58 = vadd.f32 %v2555_v13, %v2549_v16 }
0x16fb   :  { %v2557_v53 = vmul.f32 %v2556_v58, %v3934_v22  ;;  %v4604_v22 = vld [vmem:[%s4209_s16] ss:$0 sm:$0xff]  ;;  %s3742_s16 = smov 24  }
0x16fc   :  { %v1968_v19 = vadd.f32 %v4604_v22, %v4318_v46  ;;  %s3303_s24 = sld [smem:[%s4735_s0 + %s3742_s16]]  }
0x16fd   :  { %v4593_v23 = vadd.f32 %v2558_v24, %v2557_v53  ;;  %v4624_v53 = vpop.f32.mrf.mxu1 }
0x16ff   :  { %3418 = vmatmul.msk.f32.vlgmr.msrb.gmra.mxu2 %vm149_vm0, %v4593_v23  ;;  %3419 = vmatmul.msk.f32.vlgmr.msra.gmra.mxu3 %vm149_vm0, %v4593_v23  ;;  %v2702_v13 = vmul.f32 %v4593_v23, %v3962_v26 }
0x1700   :  { %2967 = vmatpush.msrb.mxu2 %v4470_v52 }
0x1702   :  { %2968 = vmatpush.msrb.mxu2 %v4476_v37 }
0x1782   :  { %v2580_v28 = vpop.f32.mrf.mxu2  ;;  %v2600_v6 = vpop.f32.mrf.mxu3 }
0x1783   :  { %2633 = vrot.lane.b32.xlu0 %v2600_v6, %s3727_s19  ;;  %2604 = vrot.lane.b32.xlu2 %v2580_v28, %s3719_s23 }
0x17dd   :  { %v2605_v29 = vpop.permute.xlu2 %2604 }
0x17de   :  { %v2607_v12 = vadd.f32 %v2605_v29, %v1968_v19 }
0x17e0   :  { %v3420_v4 = vmul.f32 -1.442695, %v2607_v12 }
0x17e2   :  { %3656 = vpow2.f32 %v3420_v4 }
0x17e8   :  { %v3657_v7 = vpop.eup %3656 }
0x17e9   :  { %v2611_v38 = vadd.f32 1.0, %v3657_v7 }
0x17eb   :  { %3658 = vrcp.f32 %v2611_v38  ;;  %v2623_v50 = vand.u32 2147483648, %v2611_v38  ;;  %v2621_v40 = vand.u32 2147483647, %v2611_v38  ;;  %vm2617_vm9 = vweird.f32 %v2611_v38 }
0x17ed   :  { %v2624_v46 = vor.u32 1.1754944e-38, %v2623_v50  ;;  %vm2622_vm11 = vcmp.eq.f32.partialorder %v2621_v40, 8.507059e+37 }
0x17f1   :  { %v3659_v52 = vpop.eup %3658 }
0x17f2   :  { %v2613_v37 = vmul.f32 %v3659_v52, %v2611_v38  ;;  %vm2618_vm8 = vweird.f32 %v3659_v52 }
0x17f3   :  { %vm2619_vm10 = vmor %vm2617_vm9, %vm2618_vm8 }
0x17f4   :  { %v2614_v8 = vsub.f32 1.0, %v2613_v37 }
0x17f5   :  { %v2634_v11 = vpop.permute.xlu0 %2633 }
0x17f6   :  { %v2636_v48 = vadd.f32 %v2634_v11, %v1968_v19  ;;  %v2615_v43 = vmul.f32 %v3659_v52, %v2614_v8 }
0x17f8   :  { %v3421_v62 = vmul.f32 -1.442695, %v2636_v48  ;;  %v2616_v3 = vadd.f32 %v3659_v52, %v2615_v43 }
0x17fa   :  { %3660 = vpow2.f32 %v3421_v62  ;;  %v2620_v41 = vsel %vm2619_vm10, %v3659_v52, %v2616_v3 }
0x17fb   :  { %v2625_v18 = vsel %vm2622_vm11, %v2624_v46, %v2620_v41 }
0x17fc   :  { %2628 = vrot.lane.b32.xlu0 %v2625_v18, %s3722_s28 }
0x1800   :  { %v3661_v55 = vpop.eup %3660 }
0x1801   :  { %v2640_v34 = vadd.f32 1.0, %v3661_v55 }
0x1803   :  { %3662 = vrcp.f32 %v2640_v34  ;;  %v2652_v51 = vand.u32 2147483648, %v2640_v34  ;;  %v2650_v20 = vand.u32 2147483647, %v2640_v34  ;;  %vm2646_vm13 = vweird.f32 %v2640_v34 }
0x1805   :  { %v2653_v54 = vor.u32 1.1754944e-38, %v2652_v51  ;;  %vm2651_vm15 = vcmp.eq.f32.partialorder %v2650_v20, 8.507059e+37 }
0x1809   :  { %v3663_v0 = vpop.eup %3662 }
0x180a   :  { %v2642_v39 = vmul.f32 %v3663_v0, %v2640_v34  ;;  %vm2647_vm12 = vweird.f32 %v3663_v0 }
0x180b   :  { %vm2648_vm14 = vmor %vm2646_vm13, %vm2647_vm12 }
0x180c   :  { %v2643_v21 = vsub.f32 1.0, %v2642_v39 }
0x180e   :  { %v2644_v47 = vmul.f32 %v3663_v0, %v2643_v21 }
0x1810   :  { %v2645_v35 = vadd.f32 %v3663_v0, %v2644_v47 }
0x1812   :  { %v2649_v32 = vsel %vm2648_vm14, %v3663_v0, %v2645_v35 }
0x1813   :  { %v2654_v15 = vsel %vm2651_vm15, %v2653_v54, %v2649_v32 }
0x1814   :  { %2658 = vperm.xlu1 %3495, %v2654_v15  }
0x181c   :  { %3496 = vset.pattern.permute.xlu1 %v3721_v33 }
0x186e   :  { %v2629_v59 = vpop.permute.xlu0 %2628 }
0x186f   :  { %v2631_v61 = vmul.f32 %v2629_v59, %v4501_v14 }
0x1871   :  { %v2687_v42 = vsub.f32 1.0, %v2631_v61  ;;  %2696 = vperm.xlu2 %3480, %v2631_v61  }
0x1873   :  { %2690 = vperm.xlu1 %3496, %v2687_v42  }
0x187b   :  { %3497 = vset.pattern.permute.xlu1 %v3737_v49 }
0x1886   :  { %v2659_v31 = vpop.permute.xlu1 %2658 }
0x1887   :  { %v2661_v9 = vmul.f32 %v2659_v31, %v4593_v23 }
0x1889   :  { %3422 = vmatmul.msk.f32.vlgmr.msrb.gmra.mxu0 %vm149_vm0, %v2661_v9 }
0x18cb   :  { %v2697_v10 = vpop.permute.xlu2 %2696 }
0x18e5   :  { %v2691_v36 = vpop.permute.xlu1 %2690 }
0x18e6   :  { %v2693_v60 = vmul.f32 %v2691_v36, %v4593_v23 }
0x1906   :  { %v2682_v1 = vpop.f32.mrf.mxu0 }
0x1907   :  { %v2685_v56 = vadd.f32 %v2682_v1, %v1968_v19 }
0x1909   :  { %3664 = vtanh.f32 %v2685_v56 }
0x190f   :  { %v3665_v45 = vpop.eup %3664 }
0x1910   :  { %v2699_v63 = vmul.f32 %v3665_v45, %v2697_v10 }
0x1912   :  { %v2700_v14 = vadd.f32 %v2699_v63, %v2693_v60 }
0x1914   :  { %v2701_v16 = vmul.f32 %v2700_v14, %v3966_v27 }
0x1916   :  { %v4618_v58 = vadd.f32 %v2702_v13, %v2701_v16 }
0x1918   :  { %3423 = vmatmul.msk.f32.vlgmr.msra.gmra.mxu1 %vm149_vm0, %v4618_v58  ;;  %3424 = vmatmul.msk.f32.vlgmr.msra.gmra.mxu2 %vm149_vm0, %v4618_v58 }
0x1995   :  { %v2724_v24 = vpop.f32.mrf.mxu1 }
0x1996   :  { %2748 = vrot.lane.b32.xlu2 %v2724_v24, %s3719_s23 }
0x199b   :  { %v2744_v28 = vpop.f32.mrf.mxu2 }
0x199c   :  { %2777 = vrot.lane.b32.xlu0 %v2744_v28, %s3727_s19 }
0x19f0   :  { %v2749_v27 = vpop.permute.xlu2 %2748 }
0x19f1   :  { %v2751_v6 = vadd.f32 %v2749_v27, %v4325_v5 }
0x19f3   :  { %v3425_v26 = vmul.f32 -1.442695, %v2751_v6 }
0x19f5   :  { %3666 = vpow2.f32 %v3425_v26 }
0x19fb   :  { %v3667_v23 = vpop.eup %3666 }
0x19fc   :  { %v2755_v19 = vadd.f32 1.0, %v3667_v23 }
0x19fe   :  { %3668 = vrcp.f32 %v2755_v19  ;;  %v2767_v7 = vand.u32 2147483648, %v2755_v19  ;;  %v2765_v52 = vand.u32 2147483647, %v2755_v19  ;;  %vm2761_vm2 = vweird.f32 %v2755_v19 }
0x1a00   :  { %v2768_v8 = vor.u32 1.1754944e-38, %v2767_v7  ;;  %vm2766_vm4 = vcmp.eq.f32.partialorder %v2765_v52, 8.507059e+37  ;;  %v3711_v7 = vld [vmem:[%s3826_s27 + $0x30] sm:$0xff]  ;;  %s3308_s27 = sld [smem:[%s4735_s0 + %s3748_s6]]  }
0x1a04   :  { %v3669_v29 = vpop.eup %3668 }
0x1a05   :  { %v2757_v12 = vmul.f32 %v3669_v29, %v2755_v19  ;;  %vm2762_vm1 = vweird.f32 %v3669_v29 }
0x1a06   :  { %vm2763_vm3 = vmor %vm2761_vm2, %vm2762_vm1  ;;  %vm3058_vm2 = vcmask 261120  }
0x1a07   :  { %v2758_v4 = vsub.f32 1.0, %v2757_v12 }
0x1a09   :  { %v2759_v38 = vmul.f32 %v3669_v29, %v2758_v4 }
0x1a0b   :  { %v2760_v37 = vadd.f32 %v3669_v29, %v2759_v38  ;;  %v2990_v38 = vsub.f32 1.0, %v3711_v7 }
0x1a0d   :  { %v2764_v11 = vsel %vm2763_vm3, %v3669_v29, %v2760_v37 }
0x1a0e   :  { %v2778_v50 = vpop.permute.xlu0 %2777  ;;  %v2769_v48 = vsel %vm2766_vm4, %v2768_v8, %v2764_v11 }
0x1a0f   :  { %v2780_v43 = vadd.f32 %v2778_v50, %v4325_v5  ;;  %2772 = vrot.lane.b32.xlu0 %v2769_v48, %s3722_s28 }
0x1a11   :  { %v3426_v40 = vmul.f32 -1.442695, %v2780_v43 }
0x1a13   :  { %3670 = vpow2.f32 %v3426_v40 }
0x1a19   :  { %v3671_v62 = vpop.eup %3670 }
0x1a1a   :  { %v2784_v3 = vadd.f32 1.0, %v3671_v62 }
0x1a1c   :  { %3672 = vrcp.f32 %v2784_v3  ;;  %v2796_v55 = vand.u32 2147483648, %v2784_v3  ;;  %v2794_v0 = vand.u32 2147483647, %v2784_v3  ;;  %vm2790_vm6 = vweird.f32 %v2784_v3 }
0x1a1e   :  { %v2797_v21 = vor.u32 1.1754944e-38, %v2796_v55  ;;  %vm2795_vm8 = vcmp.eq.f32.partialorder %v2794_v0, 8.507059e+37 }
0x1a22   :  { %v3673_v46 = vpop.eup %3672 }
0x1a23   :  { %v2786_v41 = vmul.f32 %v3673_v46, %v2784_v3  ;;  %vm2791_vm5 = vweird.f32 %v3673_v46 }
0x1a24   :  { %vm2792_vm7 = vmor %vm2790_vm6, %vm2791_vm5 }
0x1a25   :  { %v2787_v18 = vsub.f32 1.0, %v2786_v41  ;;  %v1930_v41 = vadd.f32 %v4474_v30, %v4535_v44  ;;  %v3001_v30 = vld [vmem:[%s3302_s10] sm:$0xff]  ;;  %v3000_v44 = vld [vmem:[%s3301_s15 + $0x8] sm:$0xff] }
0x1a26   :  { %3040 = vmatpush.msrb.mxu0 %v3000_v44 }
0x1a27   :  { %v2788_v34 = vmul.f32 %v3673_v46, %v2787_v18 }
0x1a29   :  { %v2789_v39 = vadd.f32 %v3673_v46, %v2788_v34 }
0x1a2b   :  { %v2793_v51 = vsel %vm2792_vm7, %v3673_v46, %v2789_v39 }
0x1a2c   :  { %v2798_v47 = vsel %vm2795_vm8, %v2797_v21, %v2793_v51  ;;  %v2999_v51 = vld [vmem:[%s3301_s15] sm:$0xff] }
0x1a2d   :  { %2802 = vperm.xlu1 %3497, %v2798_v47   ;;  %3041 = vmatpush.msrb.mxu0 %v2999_v51  ;;  %v3712_v47 = vld [vmem:[%s4019_s14] sm:$0xff]  ;;  %s3743_s14 = smov 27   ;;  %v3136_v51 = vld [vmem:[%s3305_s3 + $0x18] sm:$0xff] }
0x1a2e   :  { %s4684_s29 = sld [smem:[%s4735_s0 + %s3743_s14]]   ;;  %3156 = vmatpush.msra.mxu1 %v3136_v51 }
0x1a35   :  { %3498 = vset.pattern.permute.xlu1 %v3721_v33 }
0x1a81   :  { %v2773_v20 = vpop.permute.xlu0 %2772 }
0x1a82   :  { %v2775_v35 = vmul.f32 %v2773_v20, %v4506_v17 }
0x1a84   :  { %v2831_v54 = vsub.f32 1.0, %v2775_v35  ;;  %2840 = vperm.xlu2 %3480, %v2775_v35  }
0x1a86   :  { %2834 = vperm.xlu1 %3498, %v2831_v54  }
0x1a8e   :  { %3499 = vset.pattern.permute.xlu1 %v3737_v49  ;;  %v2846_v49 = vmul.f32 %v4618_v58, %v3989_v2 }
0x1a9f   :  { %v2803_v32 = vpop.permute.xlu1 %2802 }
0x1aa0   :  { %v2805_v15 = vmul.f32 %v2803_v32, %v4618_v58 }
0x1aa2   :  { %3427 = vmatmul.msk.f32.vlgmr.msrb.gmra.mxu3 %vm149_vm0, %v2805_v15 }
0x1ade   :  { %v2841_v9 = vpop.permute.xlu2 %2840 }
0x1af8   :  { %v2835_v42 = vpop.permute.xlu1 %2834 }
0x1af9   :  { %v2837_v1 = vmul.f32 %v2835_v42, %v4618_v58 }
0x1b25   :  { %v2826_v59 = vpop.f32.mrf.mxu3 }
0x1b26   :  { %v2829_v61 = vadd.f32 %v2826_v59, %v4325_v5 }
0x1b28   :  { %3674 = vtanh.f32 %v2829_v61 }
0x1b2e   :  { %v3675_v31 = vpop.eup %3674 }
0x1b2f   :  { %v2843_v17 = vmul.f32 %v3675_v31, %v2841_v9 }
0x1b31   :  { %v2844_v56 = vadd.f32 %v2843_v17, %v2837_v1 }
0x1b33   :  { %v2845_v36 = vmul.f32 %v2844_v56, %v3991_v25  ;;  %v4651_v25 = vadd.f32 %v4604_v22, %v4624_v53  ;;  %v3744_v56 = vmov 4.0  }
0x1b35   :  { %v4641_v45 = vadd.f32 %v2846_v49, %v2845_v36 }
0x1b37   :  { %3428 = vmatmul.msk.f32.vlgmr.msra.gmra.mxu0 %vm149_vm0, %v4641_v45  ;;  %3429 = vmatmul.msk.f32.vlgmr.msrb.gmra.mxu1 %vm149_vm0, %v4641_v45 }
0x1bb4   :  { %v2868_v5 = vpop.f32.mrf.mxu0  ;;  %v2888_v10 = vpop.f32.mrf.mxu1 }
0x1bb5   :  { %2921 = vrot.lane.b32.xlu0 %v2888_v10, %s3727_s19  ;;  %2892 = vrot.lane.b32.xlu2 %v2868_v5, %s3719_s23  ;;  %s3739_s23 = smov 2   ;;  %v3507_v5 = vld [vmem:[%s3303_s24] ss:$0 sm:$0xff] }
0x1bb6   :  { %s3281_s19 = sld [smem:[%s4735_s0 + %s3739_s23]]  }
0x1bbc   :  { %v2998_v0 = vld [vmem:[%s3281_s19] sm:$0xff] }
0x1c0f   :  { %v2893_v60 = vpop.permute.xlu2 %2892 }
0x1c10   :  { %v2895_v2 = vadd.f32 %v2893_v60, %v4651_v25 }
0x1c12   :  { %v3430_v63 = vmul.f32 -1.442695, %v2895_v2 }
0x1c14   :  { %3676 = vpow2.f32 %v3430_v63 }
0x1c1a   :  { %v3677_v14 = vpop.eup %3676 }
0x1c1b   :  { %v2899_v16 = vadd.f32 1.0, %v3677_v14 }
0x1c1d   :  { %3678 = vrcp.f32 %v2899_v16  ;;  %v2911_v27 = vand.u32 2147483648, %v2899_v16  ;;  %v2909_v22 = vand.u32 2147483647, %v2899_v16  ;;  %vm2905_vm10 = vweird.f32 %v2899_v16 }
0x1c1f   :  { %v2912_v19 = vor.u32 1.1754944e-38, %v2911_v27  ;;  %vm2910_vm12 = vcmp.eq.f32.partialorder %v2909_v22, 8.507059e+37  ;;  %v3745_v27 = vmov 3.0  }
0x1c23   :  { %v3679_v13 = vpop.eup %3678 }
0x1c24   :  { %v2901_v58 = vmul.f32 %v3679_v13, %v2899_v16  ;;  %vm2906_vm9 = vweird.f32 %v3679_v13 }
0x1c25   :  { %vm2907_vm11 = vmor %vm2905_vm10, %vm2906_vm9 }
0x1c26   :  { %v2902_v24 = vsub.f32 1.0, %v2901_v58 }
0x1c27   :  { %v2922_v28 = vpop.permute.xlu0 %2921 }
0x1c28   :  { %v2924_v6 = vadd.f32 %v2922_v28, %v4651_v25  ;;  %v2903_v26 = vmul.f32 %v3679_v13, %v2902_v24 }
0x1c2a   :  { %v3431_v53 = vmul.f32 -1.442695, %v2924_v6  ;;  %v2904_v23 = vadd.f32 %v3679_v13, %v2903_v26 }
0x1c2c   :  { %3680 = vpow2.f32 %v3431_v53  ;;  %v2908_v29 = vsel %vm2907_vm11, %v3679_v13, %v2904_v23 }
0x1c2d   :  { %v2913_v12 = vsel %vm2910_vm12, %v2912_v19, %v2908_v29 }
0x1c2e   :  { %2916 = vrot.lane.b32.xlu0 %v2913_v12, %s3722_s28  ;;  %s3749_s28 = smov 30  }
0x1c2f   :  { %s3309_s8 = sld [smem:[%s4735_s0 + %s3749_s28]]  }
0x1c32   :  { %v3681_v4 = vpop.eup %3680 }
0x1c33   :  { %v2928_v52 = vadd.f32 1.0, %v3681_v4 }
0x1c35   :  { %3682 = vrcp.f32 %v2928_v52  ;;  %v2940_v50 = vand.u32 2147483648, %v2928_v52  ;;  %v2938_v43 = vand.u32 2147483647, %v2928_v52  ;;  %vm2934_vm14 = vweird.f32 %v2928_v52 }
0x1c36   :  { %2993 = vperm.xlu0 %3481, %v2990_v38  }
0x1c37   :  { %v2941_v62 = vor.u32 1.1754944e-38, %v2940_v50  ;;  %vm2939_vm1 = vcmp.eq.f32.partialorder %v2938_v43, 8.507059e+37 }
0x1c3b   :  { %v3683_v37 = vpop.eup %3682 }
0x1c3c   :  { %v2930_v8 = vmul.f32 %v3683_v37, %v2928_v52  ;;  %vm2935_vm13 = vweird.f32 %v3683_v37 }
0x1c3d   :  { %vm2936_vm15 = vmor %vm2934_vm14, %vm2935_vm13 }
0x1c3e   :  { %v2931_v11 = vsub.f32 1.0, %v2930_v8 }
0x1c40   :  { %v2932_v48 = vmul.f32 %v3683_v37, %v2931_v11 }
0x1c42   :  { %v2933_v40 = vadd.f32 %v3683_v37, %v2932_v48 }
0x1c44   :  { %v2937_v3 = vsel %vm2936_vm15, %v3683_v37, %v2933_v40 }
0x1c45   :  { %v2942_v46 = vsel %vm2939_vm1, %v2941_v62, %v2937_v3 }
0x1c46   :  { %2946 = vperm.xlu1 %3499, %v2942_v46  }
0x1c4e   :  { %3500 = vset.pattern.permute.xlu1 %v3721_v33  ;;  %v3002_v33 = vld [vmem:[%s3302_s10 + $0x8] sm:$0xff] }
0x1c4f   :  { %3017 = vmatpush.msra.mxu3 %v3002_v33 }
0x1c51   :  { %3018 = vmatpush.msra.mxu3 %v3001_v30 }
0x1c52   :  { %3433 = vmatmul.msk.f32.vlgmr.msra.gmra.mxu3 %vm149_vm0, %v3712_v47  ;;  %v3135_v47 = vld [vmem:[%s3305_s3 + $0x10] sm:$0xff] }
0x1c53   :  { %3157 = vmatpush.msra.mxu1 %v3135_v47 }
0x1ca0   :  { %v2917_v18 = vpop.permute.xlu0 %2916 }
0x1ca1   :  { %v2919_v55 = vmul.f32 %v2917_v18, %v1930_v41 }
0x1ca3   :  { %v2975_v34 = vsub.f32 1.0, %v2919_v55  ;;  %2984 = vperm.xlu2 %3480, %v2919_v55  }
0x1ca5   :  { %2978 = vperm.xlu1 %3500, %v2975_v34  }
0x1ca8   :  { %v2994_v42 = vpop.permute.xlu0 %2993 }
0x1ca9   :  { %v2996_v9 = vmul.f32 %v2994_v42, %v4641_v45 }
0x1cad   :  { %3054 = vperm.xlu1 %3500, %v2998_v0  }
0x1cb8   :  { %v2947_v39 = vpop.permute.xlu1 %2946 }
0x1cb9   :  { %v2949_v21 = vmul.f32 %v2947_v39, %v4641_v45 }
0x1cbb   :  { %3432 = vmatmul.msk.f32.vlgmr.msrb.gmra.mxu2 %vm149_vm0, %v2949_v21 }
0x1cd5   :  { %v3020_v49 = vpop.f32.mrf.mxu3 }
0x1cfd   :  { %v2985_v15 = vpop.permute.xlu2 %2984 }
0x1d17   :  { %v2979_v54 = vpop.permute.xlu1 %2978 }
0x1d18   :  { %v2981_v59 = vmul.f32 %v2979_v54, %v4641_v45 }
0x1d3e   :  { %v2970_v20 = vpop.f32.mrf.mxu2 }
0x1d3f   :  { %v2973_v35 = vadd.f32 %v2970_v20, %v4651_v25  ;;  %v3134_v20 = vld [vmem:[%s3305_s3 + $0x8] sm:$0xff] }
0x1d40   :  { %3158 = vmatpush.msra.mxu1 %v3134_v20 }
0x1d41   :  { %3684 = vtanh.f32 %v2973_v35  ;;  %v3133_v35 = vld [vmem:[%s3305_s3] sm:$0xff] }
0x1d42   :  { %3686 = vrcp.f32 %v3744_v56  ;;  %3159 = vmatpush.msra.mxu1 %v3133_v35 }
0x1d43   :  { %3688 = vrcp.f32 %v3745_v27 }
0x1d47   :  { %v3685_v32 = vpop.eup %3684 }
0x1d48   :  { %v2987_v61 = vmul.f32 %v3685_v32, %v2985_v15  ;;  %v3687_v36 = vpop.eup %3686 }
0x1d49   :  { %v3067_v60 = vmul.f32 4.0, %v3687_v36  ;;  %vm3071_vm3 = vweird.f32 %v3687_v36  ;;  %v3689_v23 = vpop.eup %3688 }
0x1d4a   :  { %v2988_v31 = vadd.f32 %v2987_v61, %v2981_v59  ;;  %v3085_v12 = vmul.f32 3.0, %v3689_v23  ;;  %vm3089_vm4 = vweird.f32 %v3689_v23  ;;  %v3051_v59 = vld [vmem:[%s3304_s22] sm:$0x1] }
0x1d4b   :  { %v3068_v63 = vsub.f32 1.0, %v3067_v60 }
0x1d4c   :  { %v2989_v1 = vmul.f32 %v2988_v31, %v4262_v57  ;;  %v4688_v57 = vpop.permute.xlu1 %3054  ;;  %v3086_v38 = vsub.f32 1.0, %v3085_v12  ;;  %v3123_v31 = vsub.f32 1.0, %v3051_v59 }
0x1d4d   :  { %v3069_v13 = vmul.f32 %v3687_v36, %v3068_v63 }
0x1d4e   :  { %v2997_v17 = vadd.f32 %v2996_v9, %v2989_v1  ;;  %v3087_v8 = vmul.f32 %v3689_v23, %v3086_v38 }
0x1d4f   :  { %v3070_v28 = vadd.f32 %v3687_v36, %v3069_v13 }
0x1d50   :  { %3434 = vmatmul.msk.f32.vlgmr.msrb.gmra.mxu0 %vm149_vm0, %v2997_v17  ;;  %v3088_v48 = vadd.f32 %v3689_v23, %v3087_v8 }
0x1d51   :  { %v4693_v22 = vsel %vm3071_vm3, %v3687_v36, %v3070_v28  ;;  %v3125_v36 = vperm.slane %v3123_v31, 0 }
0x1d52   :  { %v4699_v62 = vsel %vm3089_vm4, %v3689_v23, %v3088_v48 }
0x1dcd   :  { %v3043_v10 = vpop.f32.mrf.mxu0 }
0x1dce   :  { %v3044_v25 = vadd.f32 %v3043_v10, %v3020_v49  ;;  %v3508_v10 = vld [vmem:[%s3304_s22] ss:$0 sm:$0xff] }
0x1dd0   :  { %v4686_v45 = vadd.f32 %v3507_v5, %v3044_v25 }
0x1dd2   :  { %v3057_v2 = vmul.f32 %v4688_v57, %v4686_v45 }
0x1dd4   :  { %v3059_v14 = vsel %vm3058_vm2, %v3057_v2, 0.0 }
0x1dd5   :  { %v3060_v16 = vrot.slane %v3059_v14, 4 }
0x1dd7   :  { %v3061_v58 = vadd.f32 %v3060_v16, %v3059_v14  ;;  %v3509_v14 = vld [vmem:[%s4684_s29] ss:$0 sm:$0xff] }
0x1dd9   :  { %v3062_v24 = vrot.slane %v3061_v58, 2 }
0x1ddb   :  { %v3063_v6 = vadd.f32 %v3062_v24, %v3061_v58 }
0x1ddd   :  { %v3064_v26 = vrot.slane %v3063_v6, 1 }
0x1ddf   :  { %v3065_v53 = vadd.f32 %v3064_v26, %v3063_v6 }
0x1de1   :  { %v3073_v19 = vmul.f32 %v4693_v22, %v3065_v53 }
0x1de3   :  { %v3074_v29 = vsub.f32 %v4686_v45, %v3073_v19 }
0x1de5   :  { %v3075_v4 = vmul.f32 %v3074_v29, %v4688_v57 }
0x1de7   :  { %v3076_v7 = vmul.f32 %v3075_v4, %v3075_v4 }
0x1de9   :  { %v3077_v52 = vsel %vm3058_vm2, %v3076_v7, 0.0 }
0x1dea   :  { %v3078_v37 = vrot.slane %v3077_v52, 4 }
0x1dec   :  { %v3079_v11 = vadd.f32 %v3078_v37, %v3077_v52 }
0x1dee   :  { %v3080_v50 = vrot.slane %v3079_v11, 2 }
0x1df0   :  { %v3081_v43 = vadd.f32 %v3080_v50, %v3079_v11 }
0x1df2   :  { %v3082_v40 = vrot.slane %v3081_v43, 1 }
0x1df4   :  { %v3083_v3 = vadd.f32 %v3082_v40, %v3081_v43 }
0x1df6   :  { %v3091_v46 = vmul.f32 %v4699_v62, %v3083_v3 }
0x1df8   :  { %v3092_v41 = vadd.f32 1e-08, %v3091_v46 }
0x1dfa   :  { %3690 = vrsqrt.f32 %v3092_v41  ;;  %vm3099_vm6 = vweird.f32 %v3092_v41 }
0x1e00   :  { %v3691_v18 = vpop.eup %3690 }
0x1e01   :  { %v3094_v55 = vmul.f32 %v3691_v18, %v3092_v41  ;;  %vm3100_vm5 = vweird.f32 %v3691_v18 }
0x1e02   :  { %vm3101_vm7 = vmor %vm3099_vm6, %vm3100_vm5  ;;  %vm3274_vm6 = vcmask 7168  }
0x1e03   :  { %v3095_v34 = vmul.f32 %v3691_v18, %v3094_v55  ;;  %v3227_v55 = vld [vmem:[%s3308_s27 + $0x8] sm:$0xff] }
0x1e04   :  { %3249 = vmatpush.msra.mxu2 %v3227_v55 }
0x1e05   :  { %v3096_v0 = vmul.f32 0.5, %v3095_v34  ;;  %v3226_v34 = vld [vmem:[%s3308_s27] sm:$0xff] }
0x1e06   :  { %3250 = vmatpush.msra.mxu2 %v3226_v34 }
0x1e07   :  { %v3097_v39 = vsub.f32 1.5, %v3096_v0  ;;  %v72_v0 = vstv %s3309_s8 }
0x1e08   :  { %73 = vst [vmem:[#allocation5] sm:$0x1] %v72_v0 }
0x1e09   :  { %v3098_v21 = vmul.f32 %v3691_v18, %v3097_v39 }
0x1e0b   :  { %v3102_v33 = vsel %vm3101_vm7, %v3691_v18, %v3098_v21 }
0x1e0c   :  { %v3103_v30 = vmul.f32 %v3102_v33, %v3074_v29 }
0x1e0e   :  { %v3435_v44 = vmul.f32 -1.442695, %v3103_v30  ;;  %v3164_v30 = vld [vmem:[%s3307_s12] sm:$0x1] }
0x1e0f   :  { %v3216_v47 = vsub.f32 1.0, %v3164_v30 }
0x1e10   :  { %3692 = vpow2.f32 %v3435_v44 }
0x1e16   :  { %v3693_v54 = vpop.eup %3692 }
0x1e17   :  { %v3107_v32 = vadd.f32 1.0, %v3693_v54 }
0x1e19   :  { %3694 = vrcp.f32 %v3107_v32  ;;  %v3119_v9 = vand.u32 2147483648, %v3107_v32  ;;  %v3117_v17 = vand.u32 2147483647, %v3107_v32  ;;  %vm3113_vm9 = vweird.f32 %v3107_v32 }
0x1e1b   :  { %v3120_v49 = vor.u32 1.1754944e-38, %v3119_v9  ;;  %vm3118_vm11 = vcmp.eq.f32.partialorder %v3117_v17, 8.507059e+37 }
0x1e1f   :  { %v3695_v15 = vpop.eup %3694 }
0x1e20   :  { %v3109_v61 = vmul.f32 %v3695_v15, %v3107_v32  ;;  %vm3114_vm8 = vweird.f32 %v3695_v15 }
0x1e21   :  { %vm3115_vm10 = vmor %vm3113_vm9, %vm3114_vm8 }
0x1e22   :  { %v3110_v42 = vsub.f32 1.0, %v3109_v61 }
0x1e24   :  { %v3111_v1 = vmul.f32 %v3695_v15, %v3110_v42  ;;  %v3510_v42 = vld [vmem:[%s3307_s12] ss:$0 sm:$0xff] }
0x1e26   :  { %v3112_v56 = vadd.f32 %v3695_v15, %v3111_v1 }
0x1e28   :  { %v3116_v5 = vsel %vm3115_vm10, %v3695_v15, %v3112_v56  ;;  %v3218_v15 = vperm.slane %v3216_v47, 0  ;;  %v3511_v56 = vld [vmem:[#allocation5] ss:$0 sm:$0xff] }
0x1e29   :  { %v3121_v25 = vsel %vm3118_vm11, %v3120_v49, %v3116_v5 }
0x1e2a   :  { %v3127_v60 = vmul.f32 %v3125_v36, %v3121_v25 }
0x1e2c   :  { %v3131_v2 = vadd.f32 %v3508_v10, %v3127_v60 }
0x1e2e   :  { %v3132_v63 = vmul.f32 %v3131_v2, %v4686_v45 }
0x1e30   :  { %3436 = vmatmul.msk.f32.vlgmr.msra.gmra.mxu1 %vm3058_vm2, %v3132_v63 }
0x1ead   :  { %v3161_v16 = vpop.f32.mrf.mxu1 }
0x1eae   :  { %v4711_v13 = vadd.f32 %v3509_v14, %v3161_v16 }
0x1eb0   :  { %v3165_v58 = vmul.f32 %v4711_v13, %v4688_v57 }
0x1eb2   :  { %v3166_v24 = vsel %vm149_vm0, %v3165_v58, 0.0 }
0x1eb3   :  { %v3167_v28 = vrot.slane %v3166_v24, 4 }
0x1eb5   :  { %v3168_v27 = vadd.f32 %v3167_v28, %v3166_v24 }
0x1eb7   :  { %v3169_v6 = vrot.slane %v3168_v27, 2 }
0x1eb9   :  { %v3170_v26 = vadd.f32 %v3169_v6, %v3168_v27 }
0x1ebb   :  { %v3171_v53 = vrot.slane %v3170_v26, 1 }
0x1ebd   :  { %v3172_v23 = vadd.f32 %v3171_v53, %v3170_v26 }
0x1ebf   :  { %v3173_v19 = vmul.f32 %v3172_v23, %v4693_v22 }
0x1ec1   :  { %v3174_v45 = vsub.f32 %v4711_v13, %v3173_v19 }
0x1ec3   :  { %v3175_v29 = vmul.f32 %v3174_v45, %v4688_v57 }
0x1ec5   :  { %v3176_v12 = vmul.f32 %v3175_v29, %v3175_v29 }
0x1ec7   :  { %v3177_v4 = vsel %vm149_vm0, %v3176_v12, 0.0 }
0x1ec8   :  { %v3178_v7 = vrot.slane %v3177_v4, 4 }
0x1eca   :  { %v3179_v38 = vadd.f32 %v3178_v7, %v3177_v4 }
0x1ecc   :  { %v3180_v52 = vrot.slane %v3179_v38, 2 }
0x1ece   :  { %v3181_v37 = vadd.f32 %v3180_v52, %v3179_v38 }
0x1ed0   :  { %v3182_v8 = vrot.slane %v3181_v37, 1 }
0x1ed2   :  { %v3183_v11 = vadd.f32 %v3182_v8, %v3181_v37 }
0x1ed4   :  { %v3184_v50 = vmul.f32 %v3183_v11, %v4699_v62 }
0x1ed6   :  { %v3185_v48 = vadd.f32 1e-08, %v3184_v50 }
0x1ed8   :  { %3696 = vrsqrt.f32 %v3185_v48  ;;  %vm3192_vm13 = vweird.f32 %v3185_v48 }
0x1ede   :  { %v3697_v43 = vpop.eup %3696 }
0x1edf   :  { %v3187_v40 = vmul.f32 %v3697_v43, %v3185_v48  ;;  %vm3193_vm12 = vweird.f32 %v3697_v43 }
0x1ee0   :  { %vm3194_vm14 = vmor %vm3192_vm13, %vm3193_vm12 }
0x1ee1   :  { %v3188_v22 = vmul.f32 %v3697_v43, %v3187_v40 }
0x1ee3   :  { %v3189_v3 = vmul.f32 0.5, %v3188_v22 }
0x1ee5   :  { %v3190_v57 = vsub.f32 1.5, %v3189_v3 }
0x1ee7   :  { %v3191_v46 = vmul.f32 %v3697_v43, %v3190_v57 }
0x1ee9   :  { %v3195_v62 = vsel %vm3194_vm14, %v3697_v43, %v3191_v46 }
0x1eea   :  { %v3196_v41 = vmul.f32 %v3195_v62, %v3174_v45 }
0x1eec   :  { %v3437_v18 = vmul.f32 -1.442695, %v3196_v41 }
0x1eee   :  { %3698 = vpow2.f32 %v3437_v18 }
0x1ef4   :  { %v3699_v39 = vpop.eup %3698 }
0x1ef5   :  { %v3200_v21 = vadd.f32 1.0, %v3699_v39 }
0x1ef7   :  { %3700 = vrcp.f32 %v3200_v21  ;;  %v3212_v20 = vand.u32 2147483648, %v3200_v21  ;;  %v3210_v54 = vand.u32 2147483647, %v3200_v21  ;;  %vm3206_vm1 = vweird.f32 %v3200_v21 }
0x1ef9   :  { %v3213_v59 = vor.u32 1.1754944e-38, %v3212_v20  ;;  %vm3211_vm3 = vcmp.eq.f32.partialorder %v3210_v54, 8.507059e+37 }
0x1efd   :  { %v3701_v33 = vpop.eup %3700 }
0x1efe   :  { %v3202_v44 = vmul.f32 %v3701_v33, %v3200_v21  ;;  %vm3207_vm15 = vweird.f32 %v3701_v33 }
0x1eff   :  { %vm3208_vm2 = vmor %vm3206_vm1, %vm3207_vm15 }
0x1f00   :  { %v3203_v51 = vsub.f32 1.0, %v3202_v44 }
0x1f02   :  { %v3204_v35 = vmul.f32 %v3701_v33, %v3203_v51 }
0x1f04   :  { %v3205_v32 = vadd.f32 %v3701_v33, %v3204_v35 }
0x1f06   :  { %v3209_v61 = vsel %vm3208_vm2, %v3701_v33, %v3205_v32 }
0x1f07   :  { %v3214_v31 = vsel %vm3211_vm3, %v3213_v59, %v3209_v61 }
0x1f08   :  { %v3220_v9 = vmul.f32 %v3218_v15, %v3214_v31 }
0x1f0a   :  { %v3224_v1 = vadd.f32 %v3510_v42, %v3220_v9 }
0x1f0c   :  { %v3225_v17 = vmul.f32 %v3224_v1, %v4711_v13 }
0x1f0e   :  { %3438 = vmatmul.msk.f32.vlgmr.msra.gmra.mxu2 %vm149_vm0, %v3225_v17 }
0x1f91   :  { %v3252_v36 = vpop.f32.mrf.mxu2 }
0x1f92   :  { %v3253_v49 = vadd.f32 %v3511_v56, %v3252_v36 }
0x1f94   :  { %v3439_v5 = vmul.f32 -1.442695, %v3253_v49 }
0x1f96   :  { %3702 = vpow2.f32 %v3439_v5 }
0x1f9c   :  { %v3703_v10 = vpop.eup %3702 }
0x1f9d   :  { %v3258_v25 = vadd.f32 1.0, %v3703_v10 }
0x1f9f   :  { %3704 = vrcp.f32 %v3258_v25  ;;  %v3270_v14 = vand.u32 2147483648, %v3258_v25  ;;  %v3268_v13 = vand.u32 2147483647, %v3258_v25  ;;  %vm3264_vm0 = vweird.f32 %v3258_v25 }
0x1fa1   :  { %v3271_v24 = vor.u32 1.1754944e-38, %v3270_v14  ;;  %vm3269_vm7 = vcmp.eq.f32.partialorder %v3268_v13, 8.507059e+37 }
0x1fa5   :  { %v3705_v60 = vpop.eup %3704 }
0x1fa6   :  { %v3260_v2 = vmul.f32 %v3705_v60, %v3258_v25  ;;  %vm3265_vm4 = vweird.f32 %v3705_v60 }
0x1fa7   :  { %vm3266_vm5 = vmor %vm3264_vm0, %vm3265_vm4 }
0x1fa8   :  { %v3261_v63 = vsub.f32 1.0, %v3260_v2 }
0x1faa   :  { %v3262_v16 = vmul.f32 %v3705_v60, %v3261_v63 }
0x1fac   :  { %v3263_v58 = vadd.f32 %v3705_v60, %v3262_v16 }
0x1fae   :  { %v3267_v28 = vsel %vm3266_vm5, %v3705_v60, %v3263_v58 }
0x1faf   :  { %v3272_v27 = vsel %vm3269_vm7, %v3271_v24, %v3267_v28 }
0x1fb0   :  { %3275 = vst.msk [vmem:[%s3310_s18] sm:$0xff] %vm3274_vm6, %v3272_v27 }

</bundles_post_ra>
